<compile_context>
chip_gen: v7x
topology: tpu7x:2x2x1
jax: 0.10.0
libtpu: 0.0.40
codegen_flags: <defaults>
</compile_context>

<pallas_src>
import numpy as np
import jax
import jax.numpy as jnp
from jax.experimental import pallas as pl
from jax.experimental.pallas import tpu as pltpu

# Model config (hard-coded in the PyTorch module's __init__)
DT, DA, DV = 768, 65, 2048          # input_dims
GDT, GDA, GDV = 768, 1000, 2048     # global_input_dims
H = 200                             # hidden_dims
OUT_DIM = 2                         # output_dims


def _kernel(text_ref, video_ref, audio_ref, scal_ref,
            w_t_ref, b_t_ref, w_v_ref, b_v_ref, w_a_ref, b_a_ref,
            w_sc_t_ref, w_sc_v_ref, w_sc_a_ref, b_sc_ref,
            w_fc_t_ref, w_fc_a_ref, w_fc_v_ref,
            out_ref):
    f32 = jnp.float32
    bf16 = jnp.bfloat16

    tbw = text_ref.shape[0]          # TB * W   (flattened batch-tile x words)
    tb = out_ref.shape[0]            # TB
    w_words = tbw // tb              # W

    scal = scal_ref[...]             # (TBW, 5) f32
    inv_vlens = scal[:, 0:1]
    inv_alens = scal[:, 1:2]
    vmask = scal[:, 2:3]             # v_masks * masks (precombined in wrapper)
    amask = scal[:, 3:4]             # a_masks * masks
    len_bias = scal[:, 4:5]          # (1 - (idx < tlen)) * -1e8

    # Temporal pooling over frames (leading axis -> cheap VPU adds), f32 accumulation.
    video_avg = jnp.sum(video_ref[...].astype(f32), axis=0) * inv_vlens   # (TBW, dv)
    audio_avg = jnp.sum(audio_ref[...].astype(f32), axis=0) * inv_alens   # (TBW, da)

    text = text_ref[...]                                                  # (TBW, dt) bf16

    # Projections: batch*word flattened into MXU M dim; bf16 inputs, f32 accumulation.
    out_t = jnp.tanh(jnp.dot(text, w_t_ref[...],
                             preferred_element_type=f32) + b_t_ref[...])          # (TBW, h)
    v_h = jnp.tanh(jnp.dot(video_avg.astype(bf16), w_v_ref[...],
                           preferred_element_type=f32) + b_v_ref[...])            # (TBW, h)
    a_h = jnp.tanh(jnp.dot(audio_avg.astype(bf16), w_a_ref[...],
                           preferred_element_type=f32) + b_a_ref[...])            # (TBW, h)

    # Fused scoring heads: columns = [raw_tv, raw_ta, imp_t].
    scores = (jnp.dot(out_t, w_sc_t_ref[...], preferred_element_type=f32)
              + jnp.dot(v_h, w_sc_v_ref[...], preferred_element_type=f32)
              + jnp.dot(a_h, w_sc_a_ref[...], preferred_element_type=f32)
              + b_sc_ref[...])                                                    # (TBW, 3)

    imp = (scores[:, 2:3]
           + jnp.maximum(scores[:, 0:1], 0.0) * vmask
           + jnp.maximum(scores[:, 1:2], 0.0) * amask
           + len_bias)                                                            # (TBW, 1)

    # Per-batch softmax over the word axis (f32-tile-aligned sublane split/reduce).
    imp3 = imp.reshape(tb, w_words, 1)
    m = jnp.max(imp3, axis=1, keepdims=True)
    e = jnp.exp(imp3 - m)
    wgt = (e / jnp.sum(e, axis=1, keepdims=True)).reshape(tbw, 1)                 # (TBW, 1)

    # Attention pooling on the MXU: block-diagonal segment matrix reduces words->batch.
    col = jax.lax.broadcasted_iota(jnp.int32, (tb, tbw), 1)
    row = jax.lax.broadcasted_iota(jnp.int32, (tb, tbw), 0)
    lo = row * w_words
    seg = jnp.logical_and(col >= lo, col < lo + w_words).astype(f32)              # (TB, TBW)

    pooled_t = jnp.dot(seg, wgt * text.astype(f32), preferred_element_type=f32)   # (TB, dt)
    pooled_a = jnp.dot(seg, wgt * audio_avg, preferred_element_type=f32)          # (TB, da)
    pooled_v = jnp.dot(seg, wgt * video_avg, preferred_element_type=f32)          # (TB, dv)

    # Local part of the final FC (global-rep terms and bias are added outside the kernel).
    out = (jnp.dot(jnp.tanh(pooled_t), w_fc_t_ref[...], preferred_element_type=f32)
           + jnp.dot(jnp.tanh(pooled_a), w_fc_a_ref[...], preferred_element_type=f32)
           + jnp.dot(jnp.tanh(pooled_v), w_fc_v_ref[...], preferred_element_type=f32))

    out_ref[...] = out


def _const_spec(shape):
    n = len(shape)
    return pl.BlockSpec(tuple(shape), lambda i, _z=(0,) * n: _z)


def _pick_tb(batch):
    # Batch-tile size: collapse the grid for small batches; otherwise pick a divisor
    # that is a multiple of 8 (keeps the (8,128) block constraint on the output).
    if batch <= 32:
        return batch
    best = None
    for d in range(8, 33, 8):
        if batch % d == 0:
            best = d
    return best if best is not None else batch


@jax.jit
def forward(params, bert_global_reps, audio_global_reps, video_global_reps,
            video_tensor, vlens, audio_tensor, alens, text_tensor, tlens,
            masks, v_masks, a_masks):
    f32, bf16 = jnp.float32, jnp.bfloat16
    B, W, dt = text_tensor.shape
    vl, dv = video_tensor.shape[2], video_tensor.shape[3]
    al, da = audio_tensor.shape[2], audio_tensor.shape[3]
    h = params["w_t"].shape[1]
    out_dim = params["b_fc"].shape[1]

    tb = _pick_tb(B)
    grid = (B // tb,)

    # ---- activation relayout (plain XLA glue): word axis on sublanes, bf16 DMA ----
    text_flat = text_tensor.reshape(B * W, dt).astype(bf16)
    video_f = jnp.transpose(video_tensor, (2, 0, 1, 3)).reshape(vl, B * W, dv).astype(bf16)
    audio_f = jnp.transpose(audio_tensor, (2, 0, 1, 3)).reshape(al, B * W, da).astype(bf16)

    # ---- pack the per-word scalars into one (B*W, 5) array ----
    # TODO(synk): zero vlens/alens produce inf/NaN exactly like the PyTorch reference.
    inv_vlens = (1.0 / vlens.astype(f32)).reshape(B * W, 1)
    inv_alens = (1.0 / alens.astype(f32)).reshape(B * W, 1)
    vm = (v_masks.astype(f32) * masks.astype(f32)).reshape(B * W, 1)
    am = (a_masks.astype(f32) * masks.astype(f32)).reshape(B * W, 1)
    idx = jnp.arange(W, dtype=f32)[None, :]
    len_bias = ((1.0 - (idx < tlens.astype(f32).reshape(B, 1)).astype(f32))
                * (-100000000.0)).reshape(B * W, 1)
    scal = jnp.concatenate([inv_vlens, inv_alens, vm, am, len_bias], axis=1)   # (B*W, 5)

    # ---- fuse the three importance heads into (h, 3) weights ----
    w_itv_t, w_itv_v = params["w_itv"][:h], params["w_itv"][h:]
    w_ita_t, w_ita_a = params["w_ita"][:h], params["w_ita"][h:]
    zcol = jnp.zeros((h, 1), f32)
    w_sc_t = jnp.concatenate([w_itv_t, w_ita_t, params["w_it"]], axis=1)       # (h, 3)
    w_sc_v = jnp.concatenate([w_itv_v, zcol, zcol], axis=1)                    # (h, 3)
    w_sc_a = jnp.concatenate([zcol, w_ita_a, zcol], axis=1)                    # (h, 3)
    b_sc = jnp.concatenate([params["b_itv"], params["b_ita"], params["b_it"]], axis=1)

    # ---- split the final FC; hoist the global-rep contribution out of the kernel ----
    w_fc = params["w_fc"]
    w_fc_t = w_fc[:dt]
    w_fc_a = w_fc[dt:dt + da]
    w_fc_v = w_fc[dt + da:dt + da + dv]
    w_fc_g = w_fc[dt + da + dv:]
    g_bias = (jnp.tanh(jnp.concatenate(
        [bert_global_reps, audio_global_reps, video_global_reps], axis=-1).astype(f32))
        @ w_fc_g + params["b_fc"])                                             # (B, out_dim)

    args = (text_flat, video_f, audio_f, scal,
            params["w_t"].astype(bf16), params["b_t"],
            params["w_v"].astype(bf16), params["b_v"],
            params["w_a"].astype(bf16), params["b_a"],
            w_sc_t, w_sc_v, w_sc_a, b_sc,
            w_fc_t, w_fc_a, w_fc_v)

    in_specs = [
        pl.BlockSpec((tb * W, dt), lambda i: (i, 0)),
        pl.BlockSpec((vl, tb * W, dv), lambda i: (0, i, 0)),
        pl.BlockSpec((al, tb * W, da), lambda i: (0, i, 0)),
        pl.BlockSpec((tb * W, 5), lambda i: (i, 0)),
    ] + [_const_spec(a.shape) for a in args[4:]]

    local = pl.pallas_call(
        _kernel,
        grid=grid,
        in_specs=in_specs,
        out_specs=pl.BlockSpec((tb, out_dim), lambda i: (i, 0)),
        out_shape=jax.ShapeDtypeStruct((B, out_dim), f32),
        compiler_params=pltpu.CompilerParams(dimension_semantics=("parallel",)),
    )(*args)

    return local + g_bias


def reference(params, bert_g, audio_g, video_g, video, vlens, audio, alens,
              text, tlens, masks, v_masks, a_masks):
    B, W, _ = text.shape
    video_avg = jnp.sum(video, axis=2) / vlens[..., None]
    audio_avg = jnp.sum(audio, axis=2) / alens[..., None]
    out_t = jnp.tanh(text @ params["w_t"] + params["b_t"])
    v_h = jnp.tanh(video_avg @ params["w_v"] + params["b_v"])
    a_h = jnp.tanh(audio_avg @ params["w_a"] + params["b_a"])
    imp_tv = jax.nn.relu(jnp.concatenate([out_t, v_h], -1) @ params["w_itv"]
                         + params["b_itv"])[..., 0]
    imp_ta = jax.nn.relu(jnp.concatenate([out_t, a_h], -1) @ params["w_ita"]
                         + params["b_ita"])[..., 0]
    imp_t = (out_t @ params["w_it"] + params["b_it"])[..., 0]
    idx = jnp.arange(W)[None, :]
    len_bias = (1.0 - (idx < tlens[:, None]).astype(jnp.float32)) * (-100000000.0)
    imp = imp_t + imp_tv * v_masks * masks + imp_ta * a_masks * masks + len_bias
    gw = jax.nn.softmax(imp, axis=1)
    out_tensor = jnp.concatenate([text, audio_avg, video_avg], -1)
    last = jnp.sum(gw[..., None] * out_tensor, axis=1)
    last = jnp.concatenate([last, bert_g, audio_g, video_g], -1)
    last = jnp.tanh(last)
    return last @ params["w_fc"] + params["b_fc"]


def init_params(key):
    def linear(k, fan_in, fan_out):
        bound = 1.0 / float(np.sqrt(fan_in))
        kw, kb = jax.random.split(k)
        w = jax.random.uniform(kw, (fan_in, fan_out), jnp.float32, -bound, bound)
        b = jax.random.uniform(kb, (1, fan_out), jnp.float32, -bound, bound)
        return w, b

    keys = jax.random.split(key, 7)
    p = {}
    p["w_t"], p["b_t"] = linear(keys[0], DT, H)
    p["w_v"], p["b_v"] = linear(keys[1], DV, H)
    p["w_a"], p["b_a"] = linear(keys[2], DA, H)
    p["w_ita"], p["b_ita"] = linear(keys[3], 2 * H, 1)
    p["w_itv"], p["b_itv"] = linear(keys[4], 2 * H, 1)
    p["w_it"], p["b_it"] = linear(keys[5], H, 1)
    p["w_fc"], p["b_fc"] = linear(keys[6], GDT + GDA + GDV + DT + DA + DV, OUT_DIM)
    return p


if __name__ == "__main__":
    key = jax.random.PRNGKey(0)
    keys = jax.random.split(key, 12)

    B, W, VL, AL = 2, 8, 4, 4

    params = init_params(keys[0])

    text = jax.random.normal(keys[1], (B, W, DT), jnp.float32)
    video = jax.random.normal(keys[2], (B, W, VL, DV), jnp.float32)
    audio = jax.random.normal(keys[3], (B, W, AL, DA), jnp.float32)
    bert_g = jax.random.normal(keys[4], (B, GDT), jnp.float32)
    audio_g = jax.random.normal(keys[5], (B, GDA), jnp.float32)
    video_g = jax.random.normal(keys[6], (B, GDV), jnp.float32)

    vlens = jax.random.randint(keys[7], (B, W), 1, VL + 1).astype(jnp.float32)
    alens = jax.random.randint(keys[8], (B, W), 1, AL + 1).astype(jnp.float32)
    tlens = jnp.array([5.0, 8.0], jnp.float32)

    idx = jnp.arange(W)[None, :]
    masks = (idx < tlens[:, None]).astype(jnp.float32)
    v_masks = jax.random.bernoulli(keys[9], 0.8, (B, W)).astype(jnp.float32)
    a_masks = jax.random.bernoulli(keys[10], 0.8, (B, W)).astype(jnp.float32)

    out = forward(params, bert_g, audio_g, video_g, video, vlens, audio, alens,
                  text, tlens, masks, v_masks, a_masks)
    out = jax.block_until_ready(out)

    ref = reference(params, bert_g, audio_g, video_g, video, vlens, audio, alens,
                    text, tlens, masks, v_masks, a_masks)

    assert out.shape == (B, OUT_DIM)
    # Kernel intentionally uses bf16 activations/weights (f32 accumulation), so compare
    # against the f32 reference at a bf16-appropriate tolerance.
    if not np.allclose(np.asarray(out), np.asarray(ref), atol=2e-2, rtol=2e-2):
        raise AssertionError(f"mismatch: kernel={np.asarray(out)} ref={np.asarray(ref)}")

    print("KERNEL_OK")
</pallas_src>

<mosaic_0001>
module attributes {stable_mosaic.version = 11 : i64} {
  func.func @_kernel(%arg0: i32, %arg1: memref<16x768xbf16, #tpu.memory_space<vmem>>, %arg2: memref<4x16x2048xbf16, #tpu.memory_space<vmem>>, %arg3: memref<4x16x65xbf16, #tpu.memory_space<vmem>>, %arg4: memref<16x5xf32, #tpu.memory_space<vmem>>, %arg5: memref<768x200xbf16, #tpu.memory_space<vmem>>, %arg6: memref<1x200xf32, #tpu.memory_space<vmem>>, %arg7: memref<2048x200xbf16, #tpu.memory_space<vmem>>, %arg8: memref<1x200xf32, #tpu.memory_space<vmem>>, %arg9: memref<65x200xbf16, #tpu.memory_space<vmem>>, %arg10: memref<1x200xf32, #tpu.memory_space<vmem>>, %arg11: memref<200x3xf32, #tpu.memory_space<vmem>>, %arg12: memref<200x3xf32, #tpu.memory_space<vmem>>, %arg13: memref<200x3xf32, #tpu.memory_space<vmem>>, %arg14: memref<1x3xf32, #tpu.memory_space<vmem>>, %arg15: memref<768x2xf32, #tpu.memory_space<vmem>>, %arg16: memref<65x2xf32, #tpu.memory_space<vmem>>, %arg17: memref<2048x2xf32, #tpu.memory_space<vmem>>, %arg18: memref<2x2xf32, #tpu.memory_space<vmem>>) attributes {dimension_semantics = [#tpu.dimension_semantics<parallel>], iteration_bounds = array<i64: 1>, scalar_prefetch = 0 : i64, scratch_operands = 0 : i64, tpu.core_type = #tpu.core_type<tc>, window_params = [{transform_indices = @transform_0, window_bounds = array<i64: 16, 768>}, {transform_indices = @transform_1, window_bounds = array<i64: 4, 16, 2048>}, {transform_indices = @transform_2, window_bounds = array<i64: 4, 16, 65>}, {transform_indices = @transform_3, window_bounds = array<i64: 16, 5>}, {pipeline_mode = #tpu.pipeline_mode<synchronous>, transform_indices = @transform_4, window_bounds = array<i64: 768, 200>}, {pipeline_mode = #tpu.pipeline_mode<synchronous>, transform_indices = @transform_5, window_bounds = array<i64: 1, 200>}, {pipeline_mode = #tpu.pipeline_mode<synchronous>, transform_indices = @transform_6, window_bounds = array<i64: 2048, 200>}, {pipeline_mode = #tpu.pipeline_mode<synchronous>, transform_indices = @transform_7, window_bounds = array<i64: 1, 200>}, {pipeline_mode = #tpu.pipeline_mode<synchronous>, transform_indices = @transform_8, window_bounds = array<i64: 65, 200>}, {pipeline_mode = #tpu.pipeline_mode<synchronous>, transform_indices = @transform_9, window_bounds = array<i64: 1, 200>}, {pipeline_mode = #tpu.pipeline_mode<synchronous>, transform_indices = @transform_10, window_bounds = array<i64: 200, 3>}, {pipeline_mode = #tpu.pipeline_mode<synchronous>, transform_indices = @transform_11, window_bounds = array<i64: 200, 3>}, {pipeline_mode = #tpu.pipeline_mode<synchronous>, transform_indices = @transform_12, window_bounds = array<i64: 200, 3>}, {pipeline_mode = #tpu.pipeline_mode<synchronous>, transform_indices = @transform_13, window_bounds = array<i64: 1, 3>}, {pipeline_mode = #tpu.pipeline_mode<synchronous>, transform_indices = @transform_14, window_bounds = array<i64: 768, 2>}, {pipeline_mode = #tpu.pipeline_mode<synchronous>, transform_indices = @transform_15, window_bounds = array<i64: 65, 2>}, {pipeline_mode = #tpu.pipeline_mode<synchronous>, transform_indices = @transform_16, window_bounds = array<i64: 2048, 2>}, {transform_indices = @transform_17, window_bounds = array<i64: 2, 2>}]} {
    %c0 = arith.constant 0 : index
    %c0_0 = arith.constant 0 : index
    %0 = vector.load %arg4[%c0, %c0_0] : memref<16x5xf32, #tpu.memory_space<vmem>>, vector<16x5xf32>
    %1 = vector.extract_strided_slice %0 {offsets = [0, 0], sizes = [16, 1], strides = [1, 1]} : vector<16x5xf32> to vector<16x1xf32>
    %2 = vector.extract_strided_slice %0 {offsets = [0, 1], sizes = [16, 1], strides = [1, 1]} : vector<16x5xf32> to vector<16x1xf32>
    %3 = vector.extract_strided_slice %0 {offsets = [0, 2], sizes = [16, 1], strides = [1, 1]} : vector<16x5xf32> to vector<16x1xf32>
    %4 = vector.extract_strided_slice %0 {offsets = [0, 3], sizes = [16, 1], strides = [1, 1]} : vector<16x5xf32> to vector<16x1xf32>
    %5 = vector.extract_strided_slice %0 {offsets = [0, 4], sizes = [16, 1], strides = [1, 1]} : vector<16x5xf32> to vector<16x1xf32>
    %c0_1 = arith.constant 0 : index
    %c0_2 = arith.constant 0 : index
    %c0_3 = arith.constant 0 : index
    %6 = vector.load %arg2[%c0_1, %c0_2, %c0_3] : memref<4x16x2048xbf16, #tpu.memory_space<vmem>>, vector<4x16x2048xbf16>
    %7 = arith.extf %6 : vector<4x16x2048xbf16> to vector<4x16x2048xf32>
    %cst = arith.constant dense<0.000000e+00> : vector<16x2048xf32>
    %8 = vector.multi_reduction <add>, %7, %cst [0] : vector<4x16x2048xf32> to vector<16x2048xf32>
    %9 = vector.broadcast %1 : vector<16x1xf32> to vector<16x2048xf32>
    %10 = arith.mulf %8, %9 : vector<16x2048xf32>
    %c0_4 = arith.constant 0 : index
    %c0_5 = arith.constant 0 : index
    %c0_6 = arith.constant 0 : index
    %11 = vector.load %arg3[%c0_4, %c0_5, %c0_6] : memref<4x16x65xbf16, #tpu.memory_space<vmem>>, vector<4x16x65xbf16>
    %12 = arith.extf %11 : vector<4x16x65xbf16> to vector<4x16x65xf32>
    %cst_7 = arith.constant dense<0.000000e+00> : vector<16x65xf32>
    %13 = vector.multi_reduction <add>, %12, %cst_7 [0] : vector<4x16x65xf32> to vector<16x65xf32>
    %14 = vector.broadcast %2 : vector<16x1xf32> to vector<16x65xf32>
    %15 = arith.mulf %13, %14 : vector<16x65xf32>
    %c0_8 = arith.constant 0 : index
    %c0_9 = arith.constant 0 : index
    %16 = vector.load %arg1[%c0_8, %c0_9] : memref<16x768xbf16, #tpu.memory_space<vmem>>, vector<16x768xbf16>
    %c0_10 = arith.constant 0 : index
    %c0_11 = arith.constant 0 : index
    %17 = vector.load %arg5[%c0_10, %c0_11] : memref<768x200xbf16, #tpu.memory_space<vmem>>, vector<768x200xbf16>
    %cst_12 = arith.constant dense<0.000000e+00> : vector<16x200xf32>
    %18 = tpu.matmul %16, %17, %cst_12 {dimension_numbers = #tpu.dot_dimension_numbers<[1], [0], [0], [1], [0, 0, 1, 1], [], []>} : vector<16x768xbf16>, vector<768x200xbf16>, vector<16x200xf32> -> vector<16x200xf32>
    %c0_13 = arith.constant 0 : index
    %c0_14 = arith.constant 0 : index
    %19 = vector.load %arg6[%c0_13, %c0_14] : memref<1x200xf32, #tpu.memory_space<vmem>>, vector<1x200xf32>
    %20 = vector.broadcast %19 : vector<1x200xf32> to vector<16x200xf32>
    %21 = arith.addf %18, %20 : vector<16x200xf32>
    %22 = math.tanh %21 : vector<16x200xf32>
    %23 = arith.truncf %10 : vector<16x2048xf32> to vector<16x2048xbf16>
    %c0_15 = arith.constant 0 : index
    %c0_16 = arith.constant 0 : index
    %24 = vector.load %arg7[%c0_15, %c0_16] : memref<2048x200xbf16, #tpu.memory_space<vmem>>, vector<2048x200xbf16>
    %cst_17 = arith.constant dense<0.000000e+00> : vector<16x200xf32>
    %25 = tpu.matmul %23, %24, %cst_17 {dimension_numbers = #tpu.dot_dimension_numbers<[1], [0], [0], [1], [0, 0, 1, 1], [], []>} : vector<16x2048xbf16>, vector<2048x200xbf16>, vector<16x200xf32> -> vector<16x200xf32>
    %c0_18 = arith.constant 0 : index
    %c0_19 = arith.constant 0 : index
    %26 = vector.load %arg8[%c0_18, %c0_19] : memref<1x200xf32, #tpu.memory_space<vmem>>, vector<1x200xf32>
    %27 = vector.broadcast %26 : vector<1x200xf32> to vector<16x200xf32>
    %28 = arith.addf %25, %27 : vector<16x200xf32>
    %29 = math.tanh %28 : vector<16x200xf32>
    %30 = arith.truncf %15 : vector<16x65xf32> to vector<16x65xbf16>
    %c0_20 = arith.constant 0 : index
    %c0_21 = arith.constant 0 : index
    %31 = vector.load %arg9[%c0_20, %c0_21] : memref<65x200xbf16, #tpu.memory_space<vmem>>, vector<65x200xbf16>
    %cst_22 = arith.constant dense<0.000000e+00> : vector<16x200xf32>
    %32 = tpu.matmul %30, %31, %cst_22 {dimension_numbers = #tpu.dot_dimension_numbers<[1], [0], [0], [1], [0, 0, 1, 1], [], []>} : vector<16x65xbf16>, vector<65x200xbf16>, vector<16x200xf32> -> vector<16x200xf32>
    %c0_23 = arith.constant 0 : index
    %c0_24 = arith.constant 0 : index
    %33 = vector.load %arg10[%c0_23, %c0_24] : memref<1x200xf32, #tpu.memory_space<vmem>>, vector<1x200xf32>
    %34 = vector.broadcast %33 : vector<1x200xf32> to vector<16x200xf32>
    %35 = arith.addf %32, %34 : vector<16x200xf32>
    %36 = math.tanh %35 : vector<16x200xf32>
    %c0_25 = arith.constant 0 : index
    %c0_26 = arith.constant 0 : index
    %37 = vector.load %arg11[%c0_25, %c0_26] : memref<200x3xf32, #tpu.memory_space<vmem>>, vector<200x3xf32>
    %cst_27 = arith.constant dense<0.000000e+00> : vector<16x3xf32>
    %38 = tpu.matmul %22, %37, %cst_27 {dimension_numbers = #tpu.dot_dimension_numbers<[1], [0], [0], [1], [0, 0, 1, 1], [], []>} : vector<16x200xf32>, vector<200x3xf32>, vector<16x3xf32> -> vector<16x3xf32>
    %c0_28 = arith.constant 0 : index
    %c0_29 = arith.constant 0 : index
    %39 = vector.load %arg12[%c0_28, %c0_29] : memref<200x3xf32, #tpu.memory_space<vmem>>, vector<200x3xf32>
    %cst_30 = arith.constant dense<0.000000e+00> : vector<16x3xf32>
    %40 = tpu.matmul %29, %39, %cst_30 {dimension_numbers = #tpu.dot_dimension_numbers<[1], [0], [0], [1], [0, 0, 1, 1], [], []>} : vector<16x200xf32>, vector<200x3xf32>, vector<16x3xf32> -> vector<16x3xf32>
    %41 = arith.addf %38, %40 : vector<16x3xf32>
    %c0_31 = arith.constant 0 : index
    %c0_32 = arith.constant 0 : index
    %42 = vector.load %arg13[%c0_31, %c0_32] : memref<200x3xf32, #tpu.memory_space<vmem>>, vector<200x3xf32>
    %cst_33 = arith.constant dense<0.000000e+00> : vector<16x3xf32>
    %43 = tpu.matmul %36, %42, %cst_33 {dimension_numbers = #tpu.dot_dimension_numbers<[1], [0], [0], [1], [0, 0, 1, 1], [], []>} : vector<16x200xf32>, vector<200x3xf32>, vector<16x3xf32> -> vector<16x3xf32>
    %44 = arith.addf %41, %43 : vector<16x3xf32>
    %c0_34 = arith.constant 0 : index
    %c0_35 = arith.constant 0 : index
    %45 = vector.load %arg14[%c0_34, %c0_35] : memref<1x3xf32, #tpu.memory_space<vmem>>, vector<1x3xf32>
    %46 = vector.broadcast %45 : vector<1x3xf32> to vector<16x3xf32>
    %47 = arith.addf %44, %46 : vector<16x3xf32>
    %48 = vector.extract_strided_slice %47 {offsets = [0, 2], sizes = [16, 1], strides = [1, 1]} : vector<16x3xf32> to vector<16x1xf32>
    %49 = vector.extract_strided_slice %47 {offsets = [0, 0], sizes = [16, 1], strides = [1, 1]} : vector<16x3xf32> to vector<16x1xf32>
    %cst_36 = arith.constant 0.000000e+00 : f32
    %50 = vector.broadcast %cst_36 : f32 to vector<16x1xf32>
    %51 = arith.maximumf %49, %50 : vector<16x1xf32>
    %52 = arith.mulf %51, %3 : vector<16x1xf32>
    %53 = arith.addf %48, %52 : vector<16x1xf32>
    %54 = vector.extract_strided_slice %47 {offsets = [0, 1], sizes = [16, 1], strides = [1, 1]} : vector<16x3xf32> to vector<16x1xf32>
    %cst_37 = arith.constant 0.000000e+00 : f32
    %55 = vector.broadcast %cst_37 : f32 to vector<16x1xf32>
    %56 = arith.maximumf %54, %55 : vector<16x1xf32>
    %57 = arith.mulf %56, %4 : vector<16x1xf32>
    %58 = arith.addf %53, %57 : vector<16x1xf32>
    %59 = arith.addf %58, %5 : vector<16x1xf32>
    %60 = vector.shape_cast %59 : vector<16x1xf32> to vector<2x8x1xf32>
    %cst_38 = arith.constant dense<0xFF800000> : vector<2x1xf32>
    %61 = vector.multi_reduction <maximumf>, %60, %cst_38 [1] : vector<2x8x1xf32> to vector<2x1xf32>
    %62 = vector.shape_cast %61 : vector<2x1xf32> to vector<2x1x1xf32>
    %63 = vector.broadcast %62 : vector<2x1x1xf32> to vector<2x8x1xf32>
    %64 = arith.subf %60, %63 : vector<2x8x1xf32>
    %65 = math.exp %64 : vector<2x8x1xf32>
    %cst_39 = arith.constant dense<0.000000e+00> : vector<2x1xf32>
    %66 = vector.multi_reduction <add>, %65, %cst_39 [1] : vector<2x8x1xf32> to vector<2x1xf32>
    %67 = vector.shape_cast %66 : vector<2x1xf32> to vector<2x1x1xf32>
    %68 = vector.broadcast %67 : vector<2x1x1xf32> to vector<2x8x1xf32>
    %69 = arith.divf %65, %68 : vector<2x8x1xf32>
    %70 = vector.shape_cast %69 : vector<2x8x1xf32> to vector<16x1xf32>
    %71 = tpu.iota {dimensions = array<i32: 1>} : vector<2x16xi32>
    %72 = tpu.iota {dimensions = array<i32: 0>} : vector<2x16xi32>
    %c8_i32 = arith.constant 8 : i32
    %73 = vector.broadcast %c8_i32 : i32 to vector<2x16xi32>
    %74 = arith.muli %72, %73 : vector<2x16xi32>
    %75 = arith.cmpi sge, %71, %74 : vector<2x16xi32>
    %c8_i32_40 = arith.constant 8 : i32
    %76 = vector.broadcast %c8_i32_40 : i32 to vector<2x16xi32>
    %77 = arith.addi %74, %76 : vector<2x16xi32>
    %78 = arith.cmpi slt, %71, %77 : vector<2x16xi32>
    %79 = arith.andi %75, %78 : vector<2x16xi1>
    %80 = arith.extui %79 : vector<2x16xi1> to vector<2x16xi32>
    %81 = arith.sitofp %80 : vector<2x16xi32> to vector<2x16xf32>
    %82 = arith.extf %16 : vector<16x768xbf16> to vector<16x768xf32>
    %83 = vector.broadcast %70 : vector<16x1xf32> to vector<16x768xf32>
    %84 = arith.mulf %83, %82 : vector<16x768xf32>
    %cst_41 = arith.constant dense<0.000000e+00> : vector<2x768xf32>
    %85 = tpu.matmul %81, %84, %cst_41 {dimension_numbers = #tpu.dot_dimension_numbers<[1], [0], [0], [1], [0, 0, 1, 1], [], []>} : vector<2x16xf32>, vector<16x768xf32>, vector<2x768xf32> -> vector<2x768xf32>
    %86 = vector.broadcast %70 : vector<16x1xf32> to vector<16x65xf32>
    %87 = arith.mulf %86, %15 : vector<16x65xf32>
    %cst_42 = arith.constant dense<0.000000e+00> : vector<2x65xf32>
    %88 = tpu.matmul %81, %87, %cst_42 {dimension_numbers = #tpu.dot_dimension_numbers<[1], [0], [0], [1], [0, 0, 1, 1], [], []>} : vector<2x16xf32>, vector<16x65xf32>, vector<2x65xf32> -> vector<2x65xf32>
    %89 = vector.broadcast %70 : vector<16x1xf32> to vector<16x2048xf32>
    %90 = arith.mulf %89, %10 : vector<16x2048xf32>
    %cst_43 = arith.constant dense<0.000000e+00> : vector<2x2048xf32>
    %91 = tpu.matmul %81, %90, %cst_43 {dimension_numbers = #tpu.dot_dimension_numbers<[1], [0], [0], [1], [0, 0, 1, 1], [], []>} : vector<2x16xf32>, vector<16x2048xf32>, vector<2x2048xf32> -> vector<2x2048xf32>
    %92 = math.tanh %85 : vector<2x768xf32>
    %c0_44 = arith.constant 0 : index
    %c0_45 = arith.constant 0 : index
    %93 = vector.load %arg15[%c0_44, %c0_45] : memref<768x2xf32, #tpu.memory_space<vmem>>, vector<768x2xf32>
    %cst_46 = arith.constant dense<0.000000e+00> : vector<2x2xf32>
    %94 = tpu.matmul %92, %93, %cst_46 {dimension_numbers = #tpu.dot_dimension_numbers<[1], [0], [0], [1], [0, 0, 1, 1], [], []>} : vector<2x768xf32>, vector<768x2xf32>, vector<2x2xf32> -> vector<2x2xf32>
    %95 = math.tanh %88 : vector<2x65xf32>
    %c0_47 = arith.constant 0 : index
    %c0_48 = arith.constant 0 : index
    %96 = vector.load %arg16[%c0_47, %c0_48] : memref<65x2xf32, #tpu.memory_space<vmem>>, vector<65x2xf32>
    %cst_49 = arith.constant dense<0.000000e+00> : vector<2x2xf32>
    %97 = tpu.matmul %95, %96, %cst_49 {dimension_numbers = #tpu.dot_dimension_numbers<[1], [0], [0], [1], [0, 0, 1, 1], [], []>} : vector<2x65xf32>, vector<65x2xf32>, vector<2x2xf32> -> vector<2x2xf32>
    %98 = arith.addf %94, %97 : vector<2x2xf32>
    %99 = math.tanh %91 : vector<2x2048xf32>
    %c0_50 = arith.constant 0 : index
    %c0_51 = arith.constant 0 : index
    %100 = vector.load %arg17[%c0_50, %c0_51] : memref<2048x2xf32, #tpu.memory_space<vmem>>, vector<2048x2xf32>
    %cst_52 = arith.constant dense<0.000000e+00> : vector<2x2xf32>
    %101 = tpu.matmul %99, %100, %cst_52 {dimension_numbers = #tpu.dot_dimension_numbers<[1], [0], [0], [1], [0, 0, 1, 1], [], []>} : vector<2x2048xf32>, vector<2048x2xf32>, vector<2x2xf32> -> vector<2x2xf32>
    %102 = arith.addf %98, %101 : vector<2x2xf32>
    %c0_53 = arith.constant 0 : index
    %c0_54 = arith.constant 0 : index
    %103 = vector.load %arg18[%c0_53, %c0_54] : memref<2x2xf32, #tpu.memory_space<vmem>>, vector<2x2xf32>
    tpu.vector_store %arg18[%c0_53, %c0_54], %102 {strides = array<i32>} : memref<2x2xf32, #tpu.memory_space<vmem>>, vector<2x2xf32>,
    return
  }
  func.func @transform_0(%arg0: i32) -> (i32, i32) {
    %c0_i32 = arith.constant 0 : i32
    %c0_i32_0 = arith.constant 0 : i32
    return %arg0, %c0_i32 : i32, i32
  }
  func.func @transform_1(%arg0: i32) -> (i32, i32, i32) {
    %c0_i32 = arith.constant 0 : i32
    %c0_i32_0 = arith.constant 0 : i32
    %c0_i32_1 = arith.constant 0 : i32
    return %c0_i32, %arg0, %c0_i32_0 : i32, i32, i32
  }
  func.func @transform_2(%arg0: i32) -> (i32, i32, i32) {
    %c0_i32 = arith.constant 0 : i32
    %c0_i32_0 = arith.constant 0 : i32
    %c0_i32_1 = arith.constant 0 : i32
    return %c0_i32, %arg0, %c0_i32_0 : i32, i32, i32
  }
  func.func @transform_3(%arg0: i32) -> (i32, i32) {
    %c0_i32 = arith.constant 0 : i32
    %c0_i32_0 = arith.constant 0 : i32
    return %arg0, %c0_i32 : i32, i32
  }
  func.func @transform_4(%arg0: i32) -> (i32, i32) {
    %c0_i32 = arith.constant 0 : i32
    %c0_i32_0 = arith.constant 0 : i32
    %c0_i32_1 = arith.constant 0 : i32
    return %c0_i32, %c0_i32_0 : i32, i32
  }
  func.func @transform_5(%arg0: i32) -> (i32, i32) {
    %c0_i32 = arith.constant 0 : i32
    %c0_i32_0 = arith.constant 0 : i32
    %c0_i32_1 = arith.constant 0 : i32
    return %c0_i32, %c0_i32_0 : i32, i32
  }
  func.func @transform_6(%arg0: i32) -> (i32, i32) {
    %c0_i32 = arith.constant 0 : i32
    %c0_i32_0 = arith.constant 0 : i32
    %c0_i32_1 = arith.constant 0 : i32
    return %c0_i32, %c0_i32_0 : i32, i32
  }
  func.func @transform_7(%arg0: i32) -> (i32, i32) {
    %c0_i32 = arith.constant 0 : i32
    %c0_i32_0 = arith.constant 0 : i32
    %c0_i32_1 = arith.constant 0 : i32
    return %c0_i32, %c0_i32_0 : i32, i32
  }
  func.func @transform_8(%arg0: i32) -> (i32, i32) {
    %c0_i32 = arith.constant 0 : i32
    %c0_i32_0 = arith.constant 0 : i32
    %c0_i32_1 = arith.constant 0 : i32
    return %c0_i32, %c0_i32_0 : i32, i32
  }
  func.func @transform_9(%arg0: i32) -> (i32, i32) {
    %c0_i32 = arith.constant 0 : i32
    %c0_i32_0 = arith.constant 0 : i32
    %c0_i32_1 = arith.constant 0 : i32
    return %c0_i32, %c0_i32_0 : i32, i32
  }
  func.func @transform_10(%arg0: i32) -> (i32, i32) {
    %c0_i32 = arith.constant 0 : i32
    %c0_i32_0 = arith.constant 0 : i32
    %c0_i32_1 = arith.constant 0 : i32
    return %c0_i32, %c0_i32_0 : i32, i32
  }
  func.func @transform_11(%arg0: i32) -> (i32, i32) {
    %c0_i32 = arith.constant 0 : i32
    %c0_i32_0 = arith.constant 0 : i32
    %c0_i32_1 = arith.constant 0 : i32
    return %c0_i32, %c0_i32_0 : i32, i32
  }
  func.func @transform_12(%arg0: i32) -> (i32, i32) {
    %c0_i32 = arith.constant 0 : i32
    %c0_i32_0 = arith.constant 0 : i32
    %c0_i32_1 = arith.constant 0 : i32
    return %c0_i32, %c0_i32_0 : i32, i32
  }
  func.func @transform_13(%arg0: i32) -> (i32, i32) {
    %c0_i32 = arith.constant 0 : i32
    %c0_i32_0 = arith.constant 0 : i32
    %c0_i32_1 = arith.constant 0 : i32
    return %c0_i32, %c0_i32_0 : i32, i32
  }
  func.func @transform_14(%arg0: i32) -> (i32, i32) {
    %c0_i32 = arith.constant 0 : i32
    %c0_i32_0 = arith.constant 0 : i32
    %c0_i32_1 = arith.constant 0 : i32
    return %c0_i32, %c0_i32_0 : i32, i32
  }
  func.func @transform_15(%arg0: i32) -> (i32, i32) {
    %c0_i32 = arith.constant 0 : i32
    %c0_i32_0 = arith.constant 0 : i32
    %c0_i32_1 = arith.constant 0 : i32
    return %c0_i32, %c0_i32_0 : i32, i32
  }
  func.func @transform_16(%arg0: i32) -> (i32, i32) {
    %c0_i32 = arith.constant 0 : i32
    %c0_i32_0 = arith.constant 0 : i32
    %c0_i32_1 = arith.constant 0 : i32
    return %c0_i32, %c0_i32_0 : i32, i32
  }
  func.func @transform_17(%arg0: i32) -> (i32, i32) {
    %c0_i32 = arith.constant 0 : i32
    %c0_i32_0 = arith.constant 0 : i32
    return %arg0, %c0_i32 : i32, i32
  }
}

</mosaic_0001>

<bundles_post_ra>
// kernel: forward.1
= control target key start
LH: loop header
LB: loop body
LE: loop exit
PB: predicated region body
PF: predicated region fallthrough
CT: control target
= control target key end

     0   :  { %v7841_v0 = vmov 0   ;;  %vm3169_vm0 = vcmask 1040384   ;;  %vm405_vm4 = vcmask 531456   ;;  %vm3275_vm5 = vcmask 588800   ;;  %s11270_s3 = inlined_call_operand.vmem [shape: f32[16,5], index: 3, kind: input, shape index: {}]   ;;  %s11271_s6 = inlined_call_operand.vmem [shape: bf16[2048,200], index: 6, kind: input, shape index: {}]   ;;  %s11272_s1 = inlined_call_operand.vmem [shape: bf16[4,16,2048], index: 1, kind: input, shape index: {}]   ;;  %s11273_s8 = inlined_call_operand.vmem [shape: bf16[65,200], index: 8, kind: input, shape index: {}]   ;;  %s11274_s4 = inlined_call_operand.vmem [shape: bf16[768,200], index: 4, kind: input, shape index: {}]   ;;  %s11275_s0 = inlined_call_operand.vmem [shape: bf16[16,768], index: 0, kind: input, shape index: {}]   ;;  %s11276_s2 = inlined_call_operand.vmem [shape: bf16[4,16,65], index: 2, kind: input, shape index: {}]   ;;  %s11277_s11 = inlined_call_operand.vmem [shape: f32[200,3], index: 11, kind: input, shape index: {}]   ;;  %s11278_s7 = inlined_call_operand.vmem [shape: f32[1,200], index: 7, kind: input, shape index: {}]   ;;  %s11279_s5 = inlined_call_operand.vmem [shape: f32[1,200], index: 5, kind: input, shape index: {}]   ;;  %s11280_s10 = inlined_call_operand.vmem [shape: f32[200,3], index: 10, kind: input, shape index: {}]   ;;  %s11281_s9 = inlined_call_operand.vmem [shape: f32[1,200], index: 9, kind: input, shape index: {}]   ;;  %s11282_s12 = inlined_call_operand.vmem [shape: f32[200,3], index: 12, kind: input, shape index: {}]   ;;  %s11283_s13 = inlined_call_operand.vmem [shape: f32[1,3], index: 13, kind: input, shape index: {}]   ;;  %s11284_s15 = inlined_call_operand.vmem [shape: f32[65,2], index: 15, kind: input, shape index: {}]   ;;  %s11285_s14 = inlined_call_operand.vmem [shape: f32[768,2], index: 14, kind: input, shape index: {}]   ;;  %s11286_s16 = inlined_call_operand.vmem [shape: f32[2048,2], index: 16, kind: input, shape index: {}]   ;;  %s11287_s17 = inlined_call_operand.vmem [shape: f32[2,2], index: 17, kind: output, shape index: {}]  }
   0x1   :  { %11290 = sst [smem:[#allocation2_spill]] %s11270_s3  ;;  %7203 = vset.pattern.permute.xlu0 %v7841_v0  ;;  %v59_v36 = vld [vmem:[%s11272_s1] sm:$0xff]  ;;  %v8061_v40 = vld [vmem:[%s11272_s1 + $0x48] sm:$0xff]  ;;  %vm3585_vm6 = vcmask 23568   ;;  %vm3669_vm7 = vcmask 130048   ;;  %vm7849_vm8 = vmmov 0  }
   0x2   :  { %11291 = sst [smem:[#allocation3_spill]] %s11271_s6  ;;  %s11292_s26 = sld [smem:[#allocation2_spill]]  ;;  %v67_v37 = vld [vmem:[%s11272_s1 + $0x40] sm:$0xff]  ;;  %v8066_v41 = vld [vmem:[%s11272_s1 + $0xc8] sm:$0xff]  ;;  %v123_v44 = vunpack.c.l.bf16 %v59_v36  ;;  %v124_v45 = vunpack.c.h.bf16 %v59_v36  ;;  %v142_v55 = vunpack.c.h.bf16 %v8061_v40  ;;  %vm5789_vm9 = vcmask 9216  }
   0x3   :  { %s11293_s30 = sld [smem:[#allocation3_spill]]  ;;  %v75_v38 = vld [vmem:[%s11272_s1 + $0x80] sm:$0xff]  ;;  %v8077_v46 = vld [vmem:[%s11272_s1 + $0x8] sm:$0xff]  ;;  %v139_v48 = vunpack.c.l.bf16 %v67_v37  ;;  %v140_v49 = vunpack.c.h.bf16 %v67_v37  ;;  %v174_v56 = vunpack.c.h.bf16 %v8066_v41  ;;  %s7845_s6 = smov 126  }
   0x4   :  { %v83_v39 = vld [vmem:[%s11272_s1 + $0xc0] sm:$0xff]  ;;  %v8082_v47 = vld [vmem:[%s11272_s1 + $0x88] sm:$0xff]  ;;  %v156_v50 = vunpack.c.h.bf16 %v75_v38  ;;  %v155_v53 = vunpack.c.l.bf16 %v75_v38  ;;  %v126_v62 = vunpack.c.h.bf16 %v8077_v46 }
   0x5   :  { %v91_v42 = vld [vmem:[%s11272_s1 + $0x100] sm:$0xff]  ;;  %v172_v51 = vunpack.c.h.bf16 %v83_v39  ;;  %v8087_v52 = vld [vmem:[%s11272_s1 + $0x148] sm:$0xff]  ;;  %v171_v54 = vunpack.c.l.bf16 %v83_v39  ;;  %v158_v63 = vunpack.c.h.bf16 %v8082_v47 }
   0x6   :  { %v99_v43 = vld [vmem:[%s11272_s1 + $0x140] sm:$0xff]  ;;  %v187_v59 = vunpack.c.l.bf16 %v91_v42  ;;  %v188_v60 = vunpack.c.h.bf16 %v91_v42  ;;  %v8100_v61 = vld [vmem:[%s11272_s1 + $0x108] sm:$0xff] }
   0x7   :  { %v107_v57 = vld [vmem:[%s11272_s1 + $0x180] sm:$0xff] }
   0x8   :  { %v57_v1 = vld [vmem:[%s11292_s26] sm:$0xff]  ;;  %v58_v2 = vld [vmem:[%s11292_s26 + $0x8] sm:$0xff] }
   0x9   :  { %349 = vperm.xlu0 %7203, %v57_v1   ;;  %v7208_v3 = vld [vmem:[%s11293_s30 + $0x4] ss:$8 sps:$4 sm:$0xff]   ;;  %v7210_v4 = vld [vmem:[%s11293_s30] ss:$8 sps:$4 sm:$0xff]   ;;  %v7211_v5 = vld [vmem:[%s11293_s30 + $0x14] ss:$8 sps:$4 sm:$0xff]   ;;  %v203_v1 = vunpack.c.l.bf16 %v99_v43 }
   0xa   :  { %2751 = vmatprep.subr.bf16.mxu1 %v7208_v3  ;;  %v7213_v6 = vld [vmem:[%s11293_s30 + $0x10] ss:$8 sps:$4 sm:$0xff]   ;;  %v7214_v7 = vld [vmem:[%s11293_s30 + $0x24] ss:$8 sps:$4 sm:$0xff]   ;;  %v7216_v8 = vld [vmem:[%s11293_s30 + $0x20] ss:$8 sps:$4 sm:$0xff]   ;;  %v254_v3 = vadd.f32 %v156_v50, %v124_v45 }
   0xb   :  { %2752 = vmatpush1.bf16.msra.mxu1 %v7210_v4  ;;  %v7217_v9 = vld [vmem:[%s11293_s30 + $0x34] ss:$8 sps:$4 sm:$0xff]   ;;  %v7219_v10 = vld [vmem:[%s11293_s30 + $0x30] ss:$8 sps:$4 sm:$0xff]   ;;  %v7220_v11 = vld [vmem:[%s11293_s30 + $0x44] ss:$8 sps:$4 sm:$0xff]   ;;  %v302_v4 = vadd.f32 %v172_v51, %v140_v49 }
   0xc   :  { %2753 = vmatprep.subr.bf16.mxu1 %v7211_v5  ;;  %v7222_v12 = vld [vmem:[%s11293_s30 + $0x40] ss:$8 sps:$4 sm:$0xff]   ;;  %v7223_v13 = vld [vmem:[%s11293_s30 + $0x54] ss:$8 sps:$4 sm:$0xff]   ;;  %v7225_v14 = vld [vmem:[%s11293_s30 + $0x50] ss:$8 sps:$4 sm:$0xff]  }
   0xd   :  { %354 = vperm.xlu0 %7203, %v58_v2   ;;  %v7226_v15 = vld [vmem:[%s11293_s30 + $0x64] ss:$8 sps:$4 sm:$0xff]   ;;  %v7228_v16 = vld [vmem:[%s11293_s30 + $0x60] ss:$8 sps:$4 sm:$0xff]   ;;  %v7229_v17 = vld [vmem:[%s11293_s30 + $0x74] ss:$8 sps:$4 sm:$0xff]   ;;  %v204_v2 = vunpack.c.h.bf16 %v99_v43 }
   0xe   :  { %v7231_v18 = vld [vmem:[%s11293_s30 + $0x70] ss:$8 sps:$4 sm:$0xff]   ;;  %v7232_v19 = vld [vmem:[%s11293_s30 + $0x84] ss:$8 sps:$4 sm:$0xff]   ;;  %v7234_v20 = vld [vmem:[%s11293_s30 + $0x80] ss:$8 sps:$4 sm:$0xff]  }
   0xf   :  { %2754 = vmatpush1.bf16.msra.mxu1 %v7213_v6  ;;  %v7235_v21 = vld [vmem:[%s11293_s30 + $0x94] ss:$8 sps:$4 sm:$0xff]   ;;  %v7237_v22 = vld [vmem:[%s11293_s30 + $0x90] ss:$8 sps:$4 sm:$0xff]   ;;  %v7238_v23 = vld [vmem:[%s11293_s30 + $0xa4] ss:$8 sps:$4 sm:$0xff]   ;;  %v251_v6 = vadd.f32 %v155_v53, %v123_v44 }
  0x10   :  { %2755 = vmatprep.subr.bf16.mxu1 %v7214_v7  ;;  %v7240_v24 = vld [vmem:[%s11293_s30 + $0xa0] ss:$8 sps:$4 sm:$0xff]   ;;  %v7241_v25 = vld [vmem:[%s11293_s30 + $0xb4] ss:$8 sps:$4 sm:$0xff]   ;;  %v7243_v26 = vld [vmem:[%s11293_s30 + $0xb0] ss:$8 sps:$4 sm:$0xff]   ;;  %v299_v7 = vadd.f32 %v171_v54, %v139_v48 }
  0x11   :  { %v7244_v27 = vld [vmem:[%s11293_s30 + $0xc4] ss:$8 sps:$4 sm:$0xff]   ;;  %v7246_v28 = vld [vmem:[%s11293_s30 + $0xc0] ss:$8 sps:$4 sm:$0xff]   ;;  %v7247_v29 = vld [vmem:[%s11293_s30 + $0xd4] ss:$8 sps:$4 sm:$0xff]  }
  0x12   :  { %v7249_v30 = vld [vmem:[%s11293_s30 + $0xd0] ss:$8 sps:$4 sm:$0xff]   ;;  %v7250_v31 = vld [vmem:[%s11293_s30 + $0xe4] ss:$8 sps:$4 sm:$0xff]   ;;  %v7252_v32 = vld [vmem:[%s11293_s30 + $0xe0] ss:$8 sps:$4 sm:$0xff]  }
  0x13   :  { %2756 = vmatpush1.bf16.msra.mxu1 %v7216_v8  ;;  %v7253_v33 = vld [vmem:[%s11293_s30 + $0xf4] ss:$8 sps:$4 sm:$0xff]   ;;  %v7255_v34 = vld [vmem:[%s11293_s30 + $0xf0] ss:$8 sps:$4 sm:$0xff]   ;;  %v7258_v35 = vld [vmem:[%s11293_s30 + $0x104] ss:$8 sps:$4 sm:$0xff]   ;;  %v206_v8 = vunpack.c.h.bf16 %v8087_v52 }
  0x14   :  { %2757 = vmatprep.subr.bf16.mxu1 %v7217_v9  ;;  %v115_v58 = vld [vmem:[%s11272_s1 + $0x1c0] sm:$0xff]  ;;  %v8107_v5 = vld [vmem:[%s11272_s1 + $0x1c8] sm:$0xff]  ;;  %v308_v9 = vadd.f32 %v174_v56, %v142_v55  ;;  %v7261_v44 = vld [vmem:[%s11293_s30 + $0x114] ss:$8 sps:$4 sm:$0xff]  }
  0x15   :  { %v7259_v48 = vld [vmem:[%s11293_s30 + $0x110] ss:$8 sps:$4 sm:$0xff]   ;;  %v7264_v49 = vld [vmem:[%s11293_s30 + $0x124] ss:$8 sps:$4 sm:$0xff]   ;;  %v7262_v50 = vld [vmem:[%s11293_s30 + $0x120] ss:$8 sps:$4 sm:$0xff]  }
  0x16   :  { %v7267_v51 = vld [vmem:[%s11293_s30 + $0x134] ss:$8 sps:$4 sm:$0xff]   ;;  %v7265_v53 = vld [vmem:[%s11293_s30 + $0x130] ss:$8 sps:$4 sm:$0xff]   ;;  %v7270_v54 = vld [vmem:[%s11293_s30 + $0x144] ss:$8 sps:$4 sm:$0xff]  }
  0x17   :  { %2758 = vmatpush1.bf16.msra.mxu1 %v7219_v10  ;;  %v219_v10 = vunpack.c.l.bf16 %v107_v57  ;;  %v7268_v55 = vld [vmem:[%s11293_s30 + $0x140] ss:$8 sps:$4 sm:$0xff]   ;;  %v7273_v56 = vld [vmem:[%s11293_s30 + $0x154] ss:$8 sps:$4 sm:$0xff]  }
  0x18   :  { %2759 = vmatprep.subr.bf16.mxu1 %v7220_v11  ;;  %v220_v11 = vunpack.c.h.bf16 %v107_v57  ;;  %v7271_v57 = vld [vmem:[%s11293_s30 + $0x150] ss:$8 sps:$4 sm:$0xff]  }
  0x1b   :  { %2760 = vmatpush1.bf16.msra.mxu1 %v7222_v12  ;;  %v8113_v12 = vld [vmem:[%s11272_s1 + $0x188] sm:$0xff] }
  0x1c   :  { %2761 = vmatprep.subr.bf16.mxu1 %v7223_v13  ;;  %v190_v13 = vunpack.c.h.bf16 %v8100_v61 }
  0x1f   :  { %2762 = vmatpush1.bf16.msra.mxu1 %v7225_v14  ;;  %v260_v14 = vadd.f32 %v158_v63, %v126_v62  ;;  %v7277_v62 = vld [vmem:[%s11293_s30 + $0x170] ss:$8 sps:$4 sm:$0xff]   ;;  %v7282_v63 = vld [vmem:[%s11293_s30 + $0x184] ss:$8 sps:$4 sm:$0xff]  }
  0x20   :  { %2763 = vmatprep.subr.bf16.mxu1 %v7226_v15  ;;  %v235_v15 = vunpack.c.l.bf16 %v115_v58 }
  0x23   :  { %2764 = vmatpush1.bf16.msra.mxu1 %v7228_v16  ;;  %v236_v16 = vunpack.c.h.bf16 %v115_v58  ;;  %v7276_v58 = vld [vmem:[%s11293_s30 + $0x164] ss:$8 sps:$4 sm:$0xff]  }
  0x24   :  { %2765 = vmatprep.subr.bf16.mxu1 %v7229_v17  ;;  %v255_v17 = vadd.f32 %v254_v3, %v188_v60  ;;  %v7279_v60 = vld [vmem:[%s11293_s30 + $0x174] ss:$8 sps:$4 sm:$0xff]   ;;  %v7283_v3 = vld [vmem:[%s11293_s30 + $0x190] ss:$8 sps:$4 sm:$0xff]  }
  0x27   :  { %2766 = vmatpush1.bf16.msra.mxu1 %v7231_v18  ;;  %v303_v18 = vadd.f32 %v302_v4, %v204_v2  ;;  %v7285_v2 = vld [vmem:[%s11293_s30 + $0x194] ss:$8 sps:$4 sm:$0xff]   ;;  %v7288_v4 = vld [vmem:[%s11293_s30 + $0x1a4] ss:$8 sps:$4 sm:$0xff]  }
  0x28   :  { %2767 = vmatprep.subr.bf16.mxu1 %v7232_v19  ;;  %v252_v19 = vadd.f32 %v251_v6, %v187_v59  ;;  %v7274_v59 = vld [vmem:[%s11293_s30 + $0x160] ss:$8 sps:$4 sm:$0xff]  }
  0x29   :  { %v7286_v6 = vld [vmem:[%s11293_s30 + $0x1a0] ss:$8 sps:$4 sm:$0xff]  }
  0x2b   :  { %2768 = vmatpush1.bf16.msra.mxu1 %v7234_v20  ;;  %v300_v20 = vadd.f32 %v299_v7, %v203_v1  ;;  %v7280_v1 = vld [vmem:[%s11293_s30 + $0x180] ss:$8 sps:$4 sm:$0xff]   ;;  %v7291_v7 = vld [vmem:[%s11293_s30 + $0x1b4] ss:$8 sps:$4 sm:$0xff]  }
  0x2c   :  { %2769 = vmatprep.subr.bf16.mxu1 %v7235_v21  ;;  %v238_v21 = vunpack.c.h.bf16 %v8107_v5 }
  0x2f   :  { %2770 = vmatpush1.bf16.msra.mxu1 %v7237_v22  ;;  %v309_v22 = vadd.f32 %v308_v9, %v206_v8  ;;  %v8215_v8 = vld [vmem:[%s11272_s1 + $0x50] sm:$0xff] }
  0x30   :  { %2771 = vmatprep.subr.bf16.mxu1 %v7238_v23  ;;  %v222_v23 = vunpack.c.h.bf16 %v8113_v12  ;;  %v8220_v9 = vld [vmem:[%s11272_s1 + $0xd0] sm:$0xff] }
  0x33   :  { %2772 = vmatpush1.bf16.msra.mxu1 %v7240_v24  ;;  %v261_v24 = vadd.f32 %v260_v14, %v190_v13  ;;  %v173_v13 = vunpack.c.l.bf16 %v8066_v41  ;;  %v7294_v14 = vld [vmem:[%s11293_s30 + $0x1c4] ss:$8 sps:$4 sm:$0xff]   ;;  %v125_v41 = vunpack.c.l.bf16 %v8077_v46  ;;  %v8258_v46 = vld [vmem:[%s11272_s1 + $0x110] sm:$0xff] }
  0x34   :  { %2773 = vmatprep.subr.bf16.mxu1 %v7241_v25 }
  0x37   :  { %2774 = vmatpush1.bf16.msra.mxu1 %v7243_v26  ;;  %v256_v26 = vadd.f32 %v255_v17, %v220_v11  ;;  %v141_v11 = vunpack.c.l.bf16 %v8061_v40  ;;  %v144_v17 = vunpack.c.h.bf16 %v8215_v8  ;;  %v176_v40 = vunpack.c.h.bf16 %v8220_v9 }
  0x38   :  { %2775 = vmatprep.subr.bf16.mxu1 %v7244_v27  ;;  %v304_v27 = vadd.f32 %v303_v18, %v236_v16  ;;  %v8238_v16 = vld [vmem:[%s11272_s1 + $0x90] sm:$0xff]  ;;  %v157_v18 = vunpack.c.l.bf16 %v8082_v47 }
  0x3b   :  { %2776 = vmatpush1.bf16.msra.mxu1 %v7246_v28  ;;  %v253_v28 = vadd.f32 %v252_v19, %v219_v10  ;;  %v7289_v10 = vld [vmem:[%s11293_s30 + $0x1b0] ss:$8 sps:$4 sm:$0xff]  }
  0x3c   :  { %2777 = vmatprep.subr.bf16.mxu1 %v7247_v29  ;;  %v301_v29 = vadd.f32 %v300_v20, %v235_v15  ;;  %v8233_v15 = vld [vmem:[%s11272_s1 + $0x10] sm:$0xff]  ;;  %v7292_v20 = vld [vmem:[%s11293_s30 + $0x1c0] ss:$8 sps:$4 sm:$0xff]  }
  0x3d   :  { %v8247_v19 = vld [vmem:[%s11272_s1 + $0x150] sm:$0xff]  ;;  %v128_v47 = vunpack.c.h.bf16 %v8233_v15 }
  0x3f   :  { %2778 = vmatpush1.bf16.msra.mxu1 %v7249_v30  ;;  %v310_v30 = vadd.f32 %v309_v22, %v238_v21  ;;  %v7297_v21 = vld [vmem:[%s11293_s30 + $0x1d4] ss:$8 sps:$4 sm:$0xff]   ;;  %v160_v22 = vunpack.c.h.bf16 %v8238_v16 }
  0x40   :  { %2779 = vmatprep.subr.bf16.mxu1 %v7250_v31  ;;  %v262_v31 = vadd.f32 %v261_v24, %v222_v23  ;;  %v205_v23 = vunpack.c.l.bf16 %v8087_v52  ;;  %v305_v24 = vadd.f32 %v173_v13, %v141_v11  ;;  %v189_v52 = vunpack.c.l.bf16 %v8100_v61  ;;  %v7394_v61 = vld [vmem:[%s11274_s4 + $0x14] ss:$8 sps:$4 sm:$0xff]  }
  0x43   :  { %2780 = vmatpush1.bf16.msra.mxu1 %v7252_v32 }
  0x44   :  { %2781 = vmatprep.subr.bf16.mxu1 %v7253_v33 }
  0x47   :  { %2782 = vmatpush1.bf16.msra.mxu1 %v7255_v34 }
  0x48   :  { %2794 = vmatprep.subr.bf16.mxu1 %v7258_v35  ;;  %v7256_v35 = vld [vmem:[%s11293_s30 + $0x100] ss:$8 sps:$4 sm:$0xff]  }
  0x88   :  { %v8118_v25 = vpop.permute.xlu0 %349 }
  0x89   :  { %v8123_v33 = vmul.f32 %v8118_v25, %v256_v26  ;;  %v8132_v36 = vmul.f32 %v8118_v25, %v253_v28  ;;  %v8145_v43 = vmul.f32 %v8118_v25, %v262_v31  ;;  %v8266_v26 = vld [vmem:[%s11272_s1 + $0x1d0] sm:$0xff]  ;;  %v208_v28 = vunpack.c.h.bf16 %v8247_v19 }
  0x8a   :  { %v257_v31 = vadd.f32 %v157_v18, %v125_v41  ;;  %v7309_v41 = vld [vmem:[%s11293_s30 + $0x214] ss:$8 sps:$4 sm:$0xff]  }
  0x8c   :  { %v8120_v32 = vpop.permute.xlu0 %354 }
  0x8d   :  { %v8126_v34 = vmul.f32 %v8120_v32, %v304_v27  ;;  %v8135_v37 = vmul.f32 %v8120_v32, %v301_v29  ;;  %v8138_v38 = vmul.f32 %v8120_v32, %v310_v30  ;;  %v7388_v27 = vld [vmem:[%s11274_s4 + $0x4] ss:$8 sps:$4 sm:$0xff]   ;;  %v314_v29 = vadd.f32 %v176_v40, %v144_v17  ;;  %v7393_v30 = vld [vmem:[%s11274_s4] ss:$8 sps:$4 sm:$0xff]  }
  0x8e   :  { %1054 = vmatprep.subr.bf16.mxu0 %v7388_v27  ;;  %v7412_v17 = vld [vmem:[%s11274_s4 + $0x44] ss:$8 sps:$4 sm:$0xff]   ;;  %v7315_v27 = vld [vmem:[%s11293_s30 + $0x234] ss:$8 sps:$4 sm:$0xff]  }
  0x8f   :  { %v1188_v39 = vpack.c.bf16 %v8126_v34, %v8123_v33  ;;  %v1187_v42 = vpack.c.bf16 %v8135_v37, %v8132_v36  ;;  %v1190_v45 = vpack.c.bf16 %v8138_v38, %v8145_v43  ;;  %1055 = vmatpush1.bf16.msra.mxu0 %v7393_v30  ;;  %v7313_v30 = vld [vmem:[%s11293_s30 + $0x230] ss:$8 sps:$4 sm:$0xff]  }
  0x90   :  { %1056 = vmatprep.subr.bf16.mxu0 %v7394_v61  ;;  %v7441_v61 = vld [vmem:[%s11274_s4 + $0x80] ss:$8 sps:$4 sm:$0xff]  }
  0x91   :  { %2783 = vmatprep.mubr.bf16.mxu1 %v1188_v39  ;;  %v7295_v39 = vld [vmem:[%s11293_s30 + $0x1d0] ss:$8 sps:$4 sm:$0xff]  }
  0x92   :  { %2784 = vmatmul.mubr.bf16.vlgmr.msra.gmra.mrb[0].mxu1 %v1187_v42  ;;  %v7300_v42 = vld [vmem:[%s11293_s30 + $0x1e4] ss:$8 sps:$4 sm:$0xff]  }
  0x93   :  { %2795 = vmatpush1.bf16.msra.mxu1 %v7256_v35  ;;  %2826 = vmatprep.mubr.bf16.mxu1 %v1190_v45  ;;  %v8279_v35 = vld [vmem:[%s11272_s1 + $0x190] sm:$0xff]  ;;  %v266_v45 = vadd.f32 %v160_v22, %v128_v47  ;;  %v7312_v47 = vld [vmem:[%s11293_s30 + $0x224] ss:$8 sps:$4 sm:$0xff]  }
  0x94   :  { %2796 = vmatprep.subr.bf16.mxu1 %v7261_v44  ;;  %v192_v44 = vunpack.c.h.bf16 %v8258_v46  ;;  %v7418_v22 = vld [vmem:[%s11274_s4 + $0x54] ss:$8 sps:$4 sm:$0xff]  }
  0x97   :  { %2797 = vmatpush1.bf16.msra.mxu1 %v7259_v48  ;;  %v237_v48 = vunpack.c.l.bf16 %v8107_v5  ;;  %v7303_v5 = vld [vmem:[%s11293_s30 + $0x1f4] ss:$8 sps:$4 sm:$0xff]  }
  0x98   :  { %2798 = vmatprep.subr.bf16.mxu1 %v7264_v49  ;;  %v306_v49 = vadd.f32 %v305_v24, %v205_v23  ;;  %v7423_v23 = vld [vmem:[%s11274_s4 + $0x50] ss:$8 sps:$4 sm:$0xff]   ;;  %v7310_v24 = vld [vmem:[%s11293_s30 + $0x220] ss:$8 sps:$4 sm:$0xff]  }
  0x9b   :  { %2799 = vmatpush1.bf16.msra.mxu1 %v7262_v50  ;;  %v7399_v50 = vld [vmem:[%s11274_s4 + $0x10] ss:$8 sps:$4 sm:$0xff]  }
  0x9c   :  { %2800 = vmatprep.subr.bf16.mxu1 %v7267_v51  ;;  %v240_v51 = vunpack.c.h.bf16 %v8266_v26  ;;  %1057 = vmatpush1.bf16.msra.mxu0 %v7399_v50  ;;  %v7442_v50 = vld [vmem:[%s11274_s4 + $0x94] ss:$8 sps:$4 sm:$0xff]  }
  0x9f   :  { %2801 = vmatpush1.bf16.msra.mxu1 %v7265_v53  ;;  %v315_v53 = vadd.f32 %v314_v29, %v208_v28  ;;  %v7424_v28 = vld [vmem:[%s11274_s4 + $0x64] ss:$8 sps:$4 sm:$0xff]   ;;  %v7429_v29 = vld [vmem:[%s11274_s4 + $0x60] ss:$8 sps:$4 sm:$0xff]  }
  0xa0   :  { %2802 = vmatprep.subr.bf16.mxu1 %v7270_v54  ;;  %v221_v54 = vunpack.c.l.bf16 %v8113_v12  ;;  %v307_v12 = vadd.f32 %v306_v49, %v237_v48  ;;  %v7319_v48 = vld [vmem:[%s11293_s30 + $0x250] ss:$8 sps:$4 sm:$0xff]   ;;  %v7324_v49 = vld [vmem:[%s11293_s30 + $0x264] ss:$8 sps:$4 sm:$0xff]  }
  0xa3   :  { %2803 = vmatpush1.bf16.msra.mxu1 %v7268_v55  ;;  %v258_v55 = vadd.f32 %v257_v31, %v189_v52  ;;  %v7318_v52 = vld [vmem:[%s11293_s30 + $0x244] ss:$8 sps:$4 sm:$0xff]   ;;  %v7430_v31 = vld [vmem:[%s11274_s4 + $0x74] ss:$8 sps:$4 sm:$0xff]  }
  0xa4   :  { %2804 = vmatprep.subr.bf16.mxu1 %v7273_v56  ;;  %v7298_v56 = vld [vmem:[%s11293_s30 + $0x1e0] ss:$8 sps:$4 sm:$0xff]  }
  0xa7   :  { %2805 = vmatpush1.bf16.msra.mxu1 %v7271_v57  ;;  %v224_v57 = vunpack.c.h.bf16 %v8279_v35 }
  0xa8   :  { %2806 = vmatprep.subr.bf16.mxu1 %v7276_v58  ;;  %v267_v58 = vadd.f32 %v266_v45, %v192_v44  ;;  %v7321_v44 = vld [vmem:[%s11293_s30 + $0x254] ss:$8 sps:$4 sm:$0xff]   ;;  %v7436_v45 = vld [vmem:[%s11274_s4 + $0x84] ss:$8 sps:$4 sm:$0xff]  }
  0xab   :  { %2807 = vmatpush1.bf16.msra.mxu1 %v7274_v59  ;;  %v7400_v59 = vld [vmem:[%s11274_s4 + $0x24] ss:$8 sps:$4 sm:$0xff]  }
  0xac   :  { %2808 = vmatprep.subr.bf16.mxu1 %v7279_v60  ;;  %v7405_v60 = vld [vmem:[%s11274_s4 + $0x20] ss:$8 sps:$4 sm:$0xff]   ;;  %1058 = vmatprep.subr.bf16.mxu0 %v7400_v59  ;;  %v7459_v59 = vld [vmem:[%s11274_s4 + $0xb0] ss:$8 sps:$4 sm:$0xff]  }
  0xad   :  { %1059 = vmatpush1.bf16.msra.mxu0 %v7405_v60  ;;  %v7460_v60 = vld [vmem:[%s11274_s4 + $0xc4] ss:$8 sps:$4 sm:$0xff]  }
  0xaf   :  { %2809 = vmatpush1.bf16.msra.mxu1 %v7277_v62  ;;  %v316_v62 = vadd.f32 %v315_v53, %v240_v51  ;;  %v7447_v51 = vld [vmem:[%s11274_s4 + $0x90] ss:$8 sps:$4 sm:$0xff]   ;;  %v7322_v53 = vld [vmem:[%s11293_s30 + $0x260] ss:$8 sps:$4 sm:$0xff]  }
  0xb0   :  { %2810 = vmatprep.subr.bf16.mxu1 %v7282_v63  ;;  %v259_v63 = vadd.f32 %v258_v55, %v221_v54  ;;  %v7327_v54 = vld [vmem:[%s11293_s30 + $0x274] ss:$8 sps:$4 sm:$0xff]   ;;  %v7448_v55 = vld [vmem:[%s11274_s4 + $0xa4] ss:$8 sps:$4 sm:$0xff]  }
  0xb1   :  { %v8329_v11 = vmul.f32 %v8120_v32, %v316_v62  ;;  %v7333_v62 = vld [vmem:[%s11293_s30 + $0x294] ss:$8 sps:$4 sm:$0xff]  }
  0xb2   :  { %v8332_v13 = vmul.f32 %v8118_v25, %v259_v63  ;;  %v7465_v63 = vld [vmem:[%s11274_s4 + $0xc0] ss:$8 sps:$4 sm:$0xff]  }
  0xb3   :  { %2811 = vmatpush1.bf16.msra.mxu1 %v7280_v1  ;;  %v7301_v1 = vld [vmem:[%s11293_s30 + $0x1f0] ss:$8 sps:$4 sm:$0xff]  }
  0xb4   :  { %2812 = vmatprep.subr.bf16.mxu1 %v7285_v2  ;;  %v7306_v2 = vld [vmem:[%s11293_s30 + $0x204] ss:$8 sps:$4 sm:$0xff]  }
  0xb7   :  { %2813 = vmatpush1.bf16.msra.mxu1 %v7283_v3  ;;  %v268_v3 = vadd.f32 %v267_v58, %v224_v57  ;;  %v7330_v57 = vld [vmem:[%s11293_s30 + $0x284] ss:$8 sps:$4 sm:$0xff]   ;;  %v7454_v58 = vld [vmem:[%s11274_s4 + $0xb4] ss:$8 sps:$4 sm:$0xff]  }
  0xb8   :  { %2814 = vmatprep.subr.bf16.mxu1 %v7288_v4  ;;  %v7406_v4 = vld [vmem:[%s11274_s4 + $0x34] ss:$8 sps:$4 sm:$0xff]  }
  0xb9   :  { %1060 = vmatprep.subr.bf16.mxu0 %v7406_v4  ;;  %v7471_v4 = vld [vmem:[%s11274_s4 + $0xd0] ss:$8 sps:$4 sm:$0xff]  }
  0xbb   :  { %2815 = vmatpush1.bf16.msra.mxu1 %v7286_v6  ;;  %v8320_v6 = vmul.f32 %v8120_v32, %v307_v12  ;;  %v7328_v12 = vld [vmem:[%s11293_s30 + $0x280] ss:$8 sps:$4 sm:$0xff]  }
  0xbc   :  { %2816 = vmatprep.subr.bf16.mxu1 %v7291_v7  ;;  %v7411_v7 = vld [vmem:[%s11274_s4 + $0x30] ss:$8 sps:$4 sm:$0xff]  }
  0xbd   :  { %1061 = vmatpush1.bf16.msra.mxu0 %v7411_v7  ;;  %v1189_v40 = vpack.c.bf16 %v8320_v6, %v8332_v13  ;;  %v7334_v7 = vld [vmem:[%s11293_s30 + $0x2a0] ss:$8 sps:$4 sm:$0xff]  }
  0xbe   :  { %1062 = vmatprep.subr.bf16.mxu0 %v7412_v17  ;;  %v7339_v17 = vld [vmem:[%s11293_s30 + $0x2b4] ss:$8 sps:$4 sm:$0xff]  }
  0xbf   :  { %2817 = vmatpush1.bf16.msra.mxu1 %v7289_v10  ;;  %v7304_v10 = vld [vmem:[%s11293_s30 + $0x200] ss:$8 sps:$4 sm:$0xff]  }
  0xc0   :  { %2818 = vmatprep.subr.bf16.mxu1 %v7294_v14  ;;  %v8335_v14 = vmul.f32 %v8118_v25, %v268_v3  ;;  %v7336_v3 = vld [vmem:[%s11293_s30 + $0x2a4] ss:$8 sps:$4 sm:$0xff]  }
  0xc2   :  { %v1192_v18 = vpack.c.bf16 %v8329_v11, %v8335_v14 }
  0xc3   :  { %2819 = vmatpush1.bf16.msra.mxu1 %v7292_v20  ;;  %v7417_v20 = vld [vmem:[%s11274_s4 + $0x40] ss:$8 sps:$4 sm:$0xff]  }
  0xc4   :  { %2820 = vmatprep.subr.bf16.mxu1 %v7297_v21  ;;  %v7307_v21 = vld [vmem:[%s11293_s30 + $0x210] ss:$8 sps:$4 sm:$0xff]   ;;  %1063 = vmatpush1.bf16.msra.mxu0 %v7417_v20 }
  0xc5   :  { %1064 = vmatprep.subr.bf16.mxu0 %v7418_v22  ;;  %v7337_v20 = vld [vmem:[%s11293_s30 + $0x2b0] ss:$8 sps:$4 sm:$0xff]   ;;  %v143_v22 = vunpack.c.l.bf16 %v8215_v8 }
  0xc7   :  { %2821 = vmatpush1.bf16.msra.mxu1 %v7295_v39  ;;  %v7435_v39 = vld [vmem:[%s11274_s4 + $0x70] ss:$8 sps:$4 sm:$0xff]  }
  0xc8   :  { %2822 = vmatprep.subr.bf16.mxu1 %v7300_v42  ;;  %1065 = vmatpush1.bf16.msra.mxu0 %v7423_v23  ;;  %v7316_v42 = vld [vmem:[%s11293_s30 + $0x240] ss:$8 sps:$4 sm:$0xff]   ;;  %v175_v23 = vunpack.c.l.bf16 %v8220_v9  ;;  %v127_v9 = vunpack.c.l.bf16 %v8233_v15 }
  0xc9   :  { %1066 = vmatprep.subr.bf16.mxu0 %v7424_v28  ;;  %v7483_v28 = vld [vmem:[%s11274_s4 + $0xf0] ss:$8 sps:$4 sm:$0xff]  }
  0xcb   :  { %2823 = vmatpush1.bf16.msra.mxu1 %v7298_v56  ;;  %v7453_v56 = vld [vmem:[%s11274_s4 + $0xa0] ss:$8 sps:$4 sm:$0xff]  }
  0xcc   :  { %2824 = vmatprep.subr.bf16.mxu1 %v7303_v5  ;;  %1067 = vmatpush1.bf16.msra.mxu0 %v7429_v29  ;;  %v7325_v5 = vld [vmem:[%s11293_s30 + $0x270] ss:$8 sps:$4 sm:$0xff]  }
  0xcd   :  { %1068 = vmatprep.subr.bf16.mxu0 %v7430_v31  ;;  %v7340_v31 = vld [vmem:[%s11293_s30 + $0x2c0] ss:$8 sps:$4 sm:$0xff]  }
  0xcf   :  { %2825 = vmatpush1.bf16.msra.mxu1 %v7301_v1  ;;  %v7331_v1 = vld [vmem:[%s11293_s30 + $0x290] ss:$8 sps:$4 sm:$0xff]  }
  0xd0   :  { %2837 = vmatprep.subr.bf16.mxu1 %v7306_v2  ;;  %1069 = vmatpush1.bf16.msra.mxu0 %v7435_v39  ;;  %v7466_v2 = vld [vmem:[%s11274_s4 + $0xd4] ss:$8 sps:$4 sm:$0xff]  }
  0xd1   :  { %1070 = vmatprep.subr.bf16.mxu0 %v7436_v45  ;;  %v8519_v39 = vld [vmem:[%s11272_s1 + $0x118] sm:$0xff] }
  0xd2   :  { %2827 = vmatmul.mubr.bf16.vlgmr.msra.gmra.mrb[0].mxu1 %v1189_v40  ;;  %v7477_v40 = vld [vmem:[%s11274_s4 + $0xe0] ss:$8 sps:$4 sm:$0xff]   ;;  %v7345_v45 = vld [vmem:[%s11293_s30 + $0x2d4] ss:$8 sps:$4 sm:$0xff]  }
  0xd3   :  { %2838 = vmatpush1.bf16.msra.mxu1 %v7304_v10  ;;  %2869 = vmatprep.mubr.bf16.mxu1 %v1192_v18  ;;  %v7472_v10 = vld [vmem:[%s11274_s4 + $0xe4] ss:$8 sps:$4 sm:$0xff]   ;;  %v8478_v18 = vld [vmem:[%s11272_s1 + $0xd8] sm:$0xff] }
  0xd4   :  { %2839 = vmatprep.subr.bf16.mxu1 %v7309_v41  ;;  %1071 = vmatpush1.bf16.msra.mxu0 %v7441_v61  ;;  %v8473_v41 = vld [vmem:[%s11272_s1 + $0x58] sm:$0xff]  ;;  %v178_v8 = vunpack.c.h.bf16 %v8478_v18  ;;  %v311_v61 = vadd.f32 %v175_v23, %v143_v22  ;;  %v7498_v22 = vld [vmem:[%s11274_s4 + $0x120] ss:$8 sps:$4 sm:$0xff]  }
  0xd5   :  { %1072 = vmatprep.subr.bf16.mxu0 %v7442_v50  ;;  %v146_v29 = vunpack.c.h.bf16 %v8473_v41 }
  0xd7   :  { %2840 = vmatpush1.bf16.msra.mxu1 %v7307_v21  ;;  %v8486_v21 = vld [vmem:[%s11272_s1 + $0x18] sm:$0xff] }
  0xd8   :  { %2841 = vmatprep.subr.bf16.mxu1 %v7312_v47  ;;  %1073 = vmatpush1.bf16.msra.mxu0 %v7447_v51  ;;  %v7478_v47 = vld [vmem:[%s11274_s4 + $0xf4] ss:$8 sps:$4 sm:$0xff]   ;;  %v320_v51 = vadd.f32 %v178_v8, %v146_v29 }
  0xd9   :  { %1074 = vmatprep.subr.bf16.mxu0 %v7448_v55  ;;  %v191_v55 = vunpack.c.l.bf16 %v8258_v46  ;;  %v239_v46 = vunpack.c.l.bf16 %v8266_v26  ;;  %v7492_v26 = vld [vmem:[%s11274_s4 + $0x110] ss:$8 sps:$4 sm:$0xff]   ;;  %v7506_v29 = vld [vmem:[%s11274_s4 + $0x134] ss:$8 sps:$4 sm:$0xff]  }
  0xdb   :  { %2842 = vmatpush1.bf16.msra.mxu1 %v7310_v24  ;;  %v7342_v24 = vld [vmem:[%s11293_s30 + $0x2c4] ss:$8 sps:$4 sm:$0xff]  }
  0xdc   :  { %2843 = vmatprep.subr.bf16.mxu1 %v7315_v27  ;;  %1075 = vmatpush1.bf16.msra.mxu0 %v7453_v56  ;;  %v8499_v27 = vld [vmem:[%s11272_s1 + $0x98] sm:$0xff] }
  0xdd   :  { %1076 = vmatprep.subr.bf16.mxu0 %v7454_v58  ;;  %v162_v15 = vunpack.c.h.bf16 %v8499_v27  ;;  %v194_v58 = vunpack.c.h.bf16 %v8519_v39 }
  0xdf   :  { %2844 = vmatpush1.bf16.msra.mxu1 %v7313_v30  ;;  %v159_v30 = vunpack.c.l.bf16 %v8238_v16  ;;  %v7487_v16 = vld [vmem:[%s11274_s4 + $0x104] ss:$8 sps:$4 sm:$0xff]  }
  0xe0   :  { %2845 = vmatprep.subr.bf16.mxu1 %v7318_v52  ;;  %1077 = vmatpush1.bf16.msra.mxu0 %v7459_v59  ;;  %v8511_v52 = vld [vmem:[%s11272_s1 + $0x158] sm:$0xff] }
  0xe1   :  { %1078 = vmatprep.subr.bf16.mxu0 %v7460_v60  ;;  %v210_v50 = vunpack.c.h.bf16 %v8511_v52  ;;  %v263_v56 = vadd.f32 %v159_v30, %v127_v9  ;;  %v7348_v60 = vld [vmem:[%s11293_s30 + $0x2e4] ss:$8 sps:$4 sm:$0xff]  }
  0xe2   :  { %v7354_v9 = vld [vmem:[%s11293_s30 + $0x304] ss:$8 sps:$4 sm:$0xff]  }
  0xe3   :  { %2846 = vmatpush1.bf16.msra.mxu1 %v7316_v42  ;;  %v130_v42 = vunpack.c.h.bf16 %v8486_v21 }
  0xe4   :  { %2847 = vmatprep.subr.bf16.mxu1 %v7321_v44  ;;  %1079 = vmatpush1.bf16.msra.mxu0 %v7465_v63  ;;  %v207_v44 = vunpack.c.l.bf16 %v8247_v19  ;;  %v7485_v19 = vld [vmem:[%s11274_s4 + $0x100] ss:$8 sps:$4 sm:$0xff]   ;;  %v8560_v63 = vld [vmem:[%s11272_s1 + $0x198] sm:$0xff] }
  0xe5   :  { %1080 = vmatprep.subr.bf16.mxu0 %v7466_v2  ;;  %v272_v59 = vadd.f32 %v162_v15, %v130_v42  ;;  %v321_v2 = vadd.f32 %v320_v51, %v210_v50  ;;  %v7352_v15 = vld [vmem:[%s11293_s30 + $0x300] ss:$8 sps:$4 sm:$0xff]   ;;  %v7355_v50 = vld [vmem:[%s11293_s30 + $0x310] ss:$8 sps:$4 sm:$0xff]   ;;  %v7518_v51 = vld [vmem:[%s11274_s4 + $0x154] ss:$8 sps:$4 sm:$0xff]  }
  0xe7   :  { %2848 = vmatpush1.bf16.msra.mxu1 %v7319_v48  ;;  %v430_v48 = vld [vmem:[%s11275_s0] sm:$0xff] }
  0xe8   :  { %2849 = vmatprep.subr.bf16.mxu1 %v7324_v49  ;;  %1081 = vmatpush1.bf16.msra.mxu0 %v7471_v4  ;;  %v433_v49 = vld [vmem:[%s11275_s0 + $0x18] sm:$0xff]  ;;  %v264_v4 = vadd.f32 %v263_v56, %v191_v55  ;;  %v7524_v55 = vld [vmem:[%s11274_s4 + $0x164] ss:$8 sps:$4 sm:$0xff]  }
  0xe9   :  { %1082 = vmatprep.subr.bf16.mxu0 %v7472_v10  ;;  %v226_v10 = vunpack.c.h.bf16 %v8560_v63  ;;  %v7363_v56 = vld [vmem:[%s11293_s30 + $0x334] ss:$8 sps:$4 sm:$0xff]  }
  0xeb   :  { %2850 = vmatpush1.bf16.msra.mxu1 %v7322_v53  ;;  %v5796_v53 = vcombine.high %v430_v48, %v433_v49 }
  0xec   :  { %2851 = vmatprep.subr.bf16.mxu1 %v7327_v54  ;;  %1083 = vmatpush1.bf16.msra.mxu0 %v7477_v40  ;;  %v5795_v54 = vcombine.low %v430_v48, %v433_v49  ;;  %v7500_v40 = vld [vmem:[%s11274_s4 + $0x124] ss:$8 sps:$4 sm:$0xff]   ;;  %v7510_v49 = vld [vmem:[%s11274_s4 + $0x140] ss:$8 sps:$4 sm:$0xff]  }
  0xed   :  { %1084 = vmatprep.subr.bf16.mxu0 %v7478_v47  ;;  %1086 = vmatprep.mubr.bf16.mxu0 %v5796_v53  ;;  %v7360_v53 = vld [vmem:[%s11293_s30 + $0x324] ss:$8 sps:$4 sm:$0xff]  }
  0xef   :  { %2852 = vmatpush1.bf16.msra.mxu1 %v7325_v5  ;;  %v8544_v5 = vld [vmem:[%s11272_s1 + $0x1d8] sm:$0xff] }
  0xf0   :  { %2853 = vmatprep.subr.bf16.mxu1 %v7330_v57  ;;  %1085 = vmatpush1.bf16.msra.mxu0 %v7483_v28  ;;  %v7343_v57 = vld [vmem:[%s11293_s30 + $0x2d0] ss:$8 sps:$4 sm:$0xff]  }
  0xf1   :  { %1097 = vmatprep.subr.bf16.mxu0 %v7487_v16 }
  0xf3   :  { %2854 = vmatpush1.bf16.msra.mxu1 %v7328_v12  ;;  %v7494_v12 = vld [vmem:[%s11274_s4 + $0x114] ss:$8 sps:$4 sm:$0xff]   ;;  %1087 = vmatmul.mubr.bf16.vlgmr.msra.gmra.mrb[0].mxu0 %v5795_v54  ;;  %v7358_v54 = vld [vmem:[%s11293_s30 + $0x320] ss:$8 sps:$4 sm:$0xff]  }
  0xf4   :  { %2855 = vmatprep.subr.bf16.mxu1 %v7333_v62  ;;  %v312_v62 = vadd.f32 %v311_v61, %v207_v44  ;;  %1098 = vmatpush1.bf16.msra.mxu0 %v7485_v19  ;;  %v7512_v44 = vld [vmem:[%s11274_s4 + $0x144] ss:$8 sps:$4 sm:$0xff]   ;;  %v7357_v61 = vld [vmem:[%s11293_s30 + $0x314] ss:$8 sps:$4 sm:$0xff]   ;;  %v7516_v19 = vld [vmem:[%s11274_s4 + $0x150] ss:$8 sps:$4 sm:$0xff]  }
  0xf5   :  { %1099 = vmatprep.subr.bf16.mxu0 %v7494_v12  ;;  %v7366_v12 = vld [vmem:[%s11293_s30 + $0x344] ss:$8 sps:$4 sm:$0xff]  }
  0xf7   :  { %2856 = vmatpush1.bf16.msra.mxu1 %v7331_v1  ;;  %v242_v1 = vunpack.c.h.bf16 %v8544_v5 }
  0xf8   :  { %2857 = vmatprep.subr.bf16.mxu1 %v7336_v3  ;;  %v223_v3 = vunpack.c.l.bf16 %v8279_v35  ;;  %v313_v35 = vadd.f32 %v312_v62, %v239_v46  ;;  %1100 = vmatpush1.bf16.msra.mxu0 %v7492_v26  ;;  %v7528_v46 = vld [vmem:[%s11274_s4 + $0x170] ss:$8 sps:$4 sm:$0xff]   ;;  %v7536_v62 = vld [vmem:[%s11274_s4 + $0x184] ss:$8 sps:$4 sm:$0xff]  }
  0xf9   :  { %v322_v47 = vadd.f32 %v321_v2, %v242_v1  ;;  %1101 = vmatprep.subr.bf16.mxu0 %v7500_v40  ;;  %v7369_v1 = vld [vmem:[%s11293_s30 + $0x354] ss:$8 sps:$4 sm:$0xff]   ;;  %v7534_v2 = vld [vmem:[%s11274_s4 + $0x180] ss:$8 sps:$4 sm:$0xff]   ;;  %v7367_v26 = vld [vmem:[%s11293_s30 + $0x350] ss:$8 sps:$4 sm:$0xff]  }
  0xfa   :  { %v265_v23 = vadd.f32 %v264_v4, %v223_v3  ;;  %v8587_v8 = vmul.f32 %v8120_v32, %v313_v35  ;;  %v7542_v3 = vld [vmem:[%s11274_s4 + $0x194] ss:$8 sps:$4 sm:$0xff]   ;;  %v7372_v4 = vld [vmem:[%s11293_s30 + $0x364] ss:$8 sps:$4 sm:$0xff]   ;;  %v7373_v35 = vld [vmem:[%s11293_s30 + $0x370] ss:$8 sps:$4 sm:$0xff]  }
  0xfb   :  { %2858 = vmatpush1.bf16.msra.mxu1 %v7334_v7  ;;  %v7346_v7 = vld [vmem:[%s11293_s30 + $0x2e0] ss:$8 sps:$4 sm:$0xff]   ;;  %v8593_v30 = vmul.f32 %v8120_v32, %v322_v47  ;;  %v7375_v40 = vld [vmem:[%s11293_s30 + $0x374] ss:$8 sps:$4 sm:$0xff]  }
  0xfc   :  { %2859 = vmatprep.subr.bf16.mxu1 %v7339_v17  ;;  %v273_v17 = vadd.f32 %v272_v59, %v194_v58  ;;  %1102 = vmatpush1.bf16.msra.mxu0 %v7498_v22  ;;  %v8599_v42 = vmul.f32 %v8118_v25, %v265_v23  ;;  %v7361_v58 = vld [vmem:[%s11293_s30 + $0x330] ss:$8 sps:$4 sm:$0xff]   ;;  %v7530_v59 = vld [vmem:[%s11274_s4 + $0x174] ss:$8 sps:$4 sm:$0xff]   ;;  %v7378_v22 = vld [vmem:[%s11293_s30 + $0x384] ss:$8 sps:$4 sm:$0xff]  }
  0xfd   :  { %1103 = vmatprep.subr.bf16.mxu0 %v7506_v29  ;;  %v7554_v47 = vld [vmem:[%s11274_s4 + $0x1b4] ss:$8 sps:$4 sm:$0xff]   ;;  %v7552_v23 = vld [vmem:[%s11274_s4 + $0x1b0] ss:$8 sps:$4 sm:$0xff]  }
  0xfe   :  { %v274_v28 = vadd.f32 %v273_v17, %v226_v10  ;;  %v7370_v10 = vld [vmem:[%s11293_s30 + $0x360] ss:$8 sps:$4 sm:$0xff]   ;;  %v7548_v17 = vld [vmem:[%s11274_s4 + $0x1a4] ss:$8 sps:$4 sm:$0xff]   ;;  %v7381_v29 = vld [vmem:[%s11293_s30 + $0x394] ss:$8 sps:$4 sm:$0xff]  }
  0xff   :  { %2860 = vmatpush1.bf16.msra.mxu1 %v7337_v20  ;;  %v7351_v20 = vld [vmem:[%s11293_s30 + $0x2f4] ss:$8 sps:$4 sm:$0xff]  }
 0x100   :  { %2861 = vmatprep.subr.bf16.mxu1 %v7342_v24  ;;  %v7349_v24 = vld [vmem:[%s11293_s30 + $0x2f0] ss:$8 sps:$4 sm:$0xff]   ;;  %v8605_v16 = vmul.f32 %v8118_v25, %v274_v28  ;;  %v7560_v28 = vld [vmem:[%s11274_s4 + $0x1c4] ss:$8 sps:$4 sm:$0xff]  }
 0x102   :  { %v1194_v48 = vpack.c.bf16 %v8593_v30, %v8605_v16 }
 0x103   :  { %2862 = vmatpush1.bf16.msra.mxu1 %v7340_v31  ;;  %v7504_v31 = vld [vmem:[%s11274_s4 + $0x130] ss:$8 sps:$4 sm:$0xff]  }
 0x104   :  { %2863 = vmatprep.subr.bf16.mxu1 %v7345_v45  ;;  %v1191_v45 = vpack.c.bf16 %v8587_v8, %v8599_v42  ;;  %1104 = vmatpush1.bf16.msra.mxu0 %v7504_v31  ;;  %v7379_v31 = vld [vmem:[%s11293_s30 + $0x390] ss:$8 sps:$4 sm:$0xff]  }
 0x105   :  { %1105 = vmatprep.subr.bf16.mxu0 %v7512_v44  ;;  %v7384_v44 = vld [vmem:[%s11293_s30 + $0x3a4] ss:$8 sps:$4 sm:$0xff]  }
 0x107   :  { %2864 = vmatpush1.bf16.msra.mxu1 %v7343_v57  ;;  %v7522_v57 = vld [vmem:[%s11274_s4 + $0x160] ss:$8 sps:$4 sm:$0xff]  }
 0x108   :  { %2865 = vmatprep.subr.bf16.mxu1 %v7348_v60  ;;  %1106 = vmatpush1.bf16.msra.mxu0 %v7510_v49  ;;  %v7364_v60 = vld [vmem:[%s11293_s30 + $0x340] ss:$8 sps:$4 sm:$0xff]   ;;  %v7387_v49 = vld [vmem:[%s11293_s30 + $0x3b4] ss:$8 sps:$4 sm:$0xff]  }
 0x109   :  { %1107 = vmatprep.subr.bf16.mxu0 %v7518_v51  ;;  %v8743_v51 = vld [vmem:[%s11272_s1 + $0x60] sm:$0xff] }
 0x10b   :  { %2866 = vmatpush1.bf16.msra.mxu1 %v7346_v7  ;;  %v7540_v7 = vld [vmem:[%s11274_s4 + $0x190] ss:$8 sps:$4 sm:$0xff]  }
 0x10c   :  { %2867 = vmatprep.subr.bf16.mxu1 %v7351_v20  ;;  %1108 = vmatpush1.bf16.msra.mxu0 %v7516_v19  ;;  %v7546_v20 = vld [vmem:[%s11274_s4 + $0x1a0] ss:$8 sps:$4 sm:$0xff]   ;;  %v7385_v19 = vld [vmem:[%s11293_s30 + $0x3b0] ss:$8 sps:$4 sm:$0xff]  }
 0x10d   :  { %1109 = vmatprep.subr.bf16.mxu0 %v7524_v55  ;;  %v145_v55 = vunpack.c.l.bf16 %v8473_v41 }
 0x10f   :  { %2868 = vmatpush1.bf16.msra.mxu1 %v7349_v24  ;;  %v7376_v24 = vld [vmem:[%s11293_s30 + $0x380] ss:$8 sps:$4 sm:$0xff]  }
 0x110   :  { %2880 = vmatprep.subr.bf16.mxu1 %v7354_v9  ;;  %1110 = vmatpush1.bf16.msra.mxu0 %v7522_v57  ;;  %v7558_v9 = vld [vmem:[%s11274_s4 + $0x1c0] ss:$8 sps:$4 sm:$0xff]   ;;  %v7392_v57 = vld [vmem:[%s11293_s30 + $0x3c4] ss:$8 sps:$4 sm:$0xff]  }
 0x111   :  { %1111 = vmatprep.subr.bf16.mxu0 %v7530_v59  ;;  %v8769_v59 = vld [vmem:[%s11272_s1 + $0xa0] sm:$0xff] }
 0x112   :  { %2870 = vmatmul.mubr.bf16.vlgmr.msra.gmra.mrb[0].mxu1 %v1191_v45  ;;  %v7564_v45 = vld [vmem:[%s11274_s4 + $0x1d0] ss:$8 sps:$4 sm:$0xff]  }
 0x113   :  { %2881 = vmatpush1.bf16.msra.mxu1 %v7352_v15  ;;  %2912 = vmatprep.mubr.bf16.mxu1 %v1194_v48  ;;  %v7566_v15 = vld [vmem:[%s11274_s4 + $0x1d4] ss:$8 sps:$4 sm:$0xff]   ;;  %v7572_v48 = vld [vmem:[%s11274_s4 + $0x1e4] ss:$8 sps:$4 sm:$0xff]  }
 0x114   :  { %2882 = vmatprep.subr.bf16.mxu1 %v7357_v61  ;;  %1112 = vmatpush1.bf16.msra.mxu0 %v7528_v46  ;;  %v7382_v61 = vld [vmem:[%s11293_s30 + $0x3a0] ss:$8 sps:$4 sm:$0xff]   ;;  %v129_v46 = vunpack.c.l.bf16 %v8486_v21 }
 0x115   :  { %1113 = vmatprep.subr.bf16.mxu0 %v7536_v62  ;;  %v8781_v62 = vld [vmem:[%s11272_s1 + $0x160] sm:$0xff]  ;;  %v431_v21 = vld [vmem:[%s11275_s0 + $0x8] sm:$0xff] }
 0x117   :  { %2883 = vmatpush1.bf16.msra.mxu1 %v7355_v50  ;;  %v7570_v50 = vld [vmem:[%s11274_s4 + $0x1e0] ss:$8 sps:$4 sm:$0xff]  }
 0x118   :  { %2884 = vmatprep.subr.bf16.mxu1 %v7360_v53  ;;  %1114 = vmatpush1.bf16.msra.mxu0 %v7534_v2  ;;  %v8748_v53 = vld [vmem:[%s11272_s1 + $0xe0] sm:$0xff] }
 0x119   :  { %1115 = vmatprep.subr.bf16.mxu0 %v7542_v3  ;;  %v180_v41 = vunpack.c.h.bf16 %v8748_v53  ;;  %v209_v3 = vunpack.c.l.bf16 %v8511_v52 }
 0x11b   :  { %2885 = vmatpush1.bf16.msra.mxu1 %v7358_v54  ;;  %v7578_v54 = vld [vmem:[%s11274_s4 + $0x1f4] ss:$8 sps:$4 sm:$0xff]  }
 0x11c   :  { %2886 = vmatprep.subr.bf16.mxu1 %v7363_v56  ;;  %1116 = vmatpush1.bf16.msra.mxu0 %v7540_v7  ;;  %v177_v56 = vunpack.c.l.bf16 %v8478_v18  ;;  %v7576_v18 = vld [vmem:[%s11274_s4 + $0x1f0] ss:$8 sps:$4 sm:$0xff]  }
 0x11d   :  { %1117 = vmatprep.subr.bf16.mxu0 %v7548_v17 }
 0x11e   :  { %v317_v7 = vadd.f32 %v177_v56, %v145_v55  ;;  %v7598_v56 = vld [vmem:[%s11274_s4 + $0x224] ss:$8 sps:$4 sm:$0xff]  }
 0x11f   :  { %2887 = vmatpush1.bf16.msra.mxu1 %v7361_v58  ;;  %v8764_v58 = vld [vmem:[%s11272_s1 + $0x20] sm:$0xff] }
 0x120   :  { %2888 = vmatprep.subr.bf16.mxu1 %v7366_v12  ;;  %1118 = vmatpush1.bf16.msra.mxu0 %v7546_v20  ;;  %v148_v12 = vunpack.c.h.bf16 %v8743_v51  ;;  %v132_v2 = vunpack.c.h.bf16 %v8764_v58 }
 0x121   :  { %1119 = vmatprep.subr.bf16.mxu0 %v7554_v47  ;;  %v7583_v47 = vld [vmem:[%s11274_s4 + $0x200] ss:$8 sps:$4 sm:$0xff]  }
 0x122   :  { %v326_v52 = vadd.f32 %v180_v41, %v148_v12  ;;  %v7596_v41 = vld [vmem:[%s11274_s4 + $0x220] ss:$8 sps:$4 sm:$0xff]  }
 0x123   :  { %2889 = vmatpush1.bf16.msra.mxu1 %v7364_v60  ;;  %v161_v60 = vunpack.c.l.bf16 %v8499_v27  ;;  %v434_v27 = vld [vmem:[%s11275_s0 + $0x20] sm:$0xff] }
 0x124   :  { %2890 = vmatprep.subr.bf16.mxu1 %v7369_v1  ;;  %1120 = vmatpush1.bf16.msra.mxu0 %v7552_v23  ;;  %v7390_v1 = vld [vmem:[%s11293_s30 + $0x3c0] ss:$8 sps:$4 sm:$0xff]   ;;  %v5798_v17 = vcombine.high %v431_v21, %v434_v27  ;;  %v5797_v20 = vcombine.low %v431_v21, %v434_v27  ;;  %v7602_v27 = vld [vmem:[%s11274_s4 + $0x230] ss:$8 sps:$4 sm:$0xff]  }
 0x125   :  { %1121 = vmatprep.subr.bf16.mxu0 %v7560_v28  ;;  %v269_v23 = vadd.f32 %v161_v60, %v129_v46  ;;  %v7396_v28 = vld [vmem:[%s11293_s30 + $0x3d0] ss:$8 sps:$4 sm:$0xff]  }
 0x126   :  { %1129 = vmatprep.mubr.bf16.mxu0 %v5798_v17  ;;  %v7408_v46 = vld [vmem:[%s11293_s30 + $0x3f0] ss:$8 sps:$4 sm:$0xff]   ;;  %v7610_v17 = vld [vmem:[%s11274_s4 + $0x244] ss:$8 sps:$4 sm:$0xff]  }
 0x127   :  { %2891 = vmatpush1.bf16.msra.mxu1 %v7367_v26  ;;  %v164_v26 = vunpack.c.h.bf16 %v8769_v59 }
 0x128   :  { %2892 = vmatprep.subr.bf16.mxu1 %v7372_v4  ;;  %1122 = vmatpush1.bf16.msra.mxu0 %v7558_v9  ;;  %v7398_v4 = vld [vmem:[%s11293_s30 + $0x3d4] ss:$8 sps:$4 sm:$0xff]  }
 0x129   :  { %1123 = vmatprep.subr.bf16.mxu0 %v7566_v15  ;;  %v278_v9 = vadd.f32 %v164_v26, %v132_v2  ;;  %v7404_v15 = vld [vmem:[%s11293_s30 + $0x3e4] ss:$8 sps:$4 sm:$0xff]  }
 0x12a   :  { %v7416_v26 = vld [vmem:[%s11293_s30 + $0x404] ss:$8 sps:$4 sm:$0xff]  }
 0x12b   :  { %2893 = vmatpush1.bf16.msra.mxu1 %v7370_v10  ;;  %v8801_v10 = vld [vmem:[%s11272_s1 + $0x120] sm:$0xff] }
 0x12c   :  { %2894 = vmatprep.subr.bf16.mxu1 %v7375_v40  ;;  %1124 = vmatpush1.bf16.msra.mxu0 %v7564_v45  ;;  %v7585_v40 = vld [vmem:[%s11274_s4 + $0x204] ss:$8 sps:$4 sm:$0xff]  }
 0x12d   :  { %1125 = vmatprep.subr.bf16.mxu0 %v7572_v48  ;;  %v8830_v45 = vld [vmem:[%s11272_s1 + $0x1a0] sm:$0xff] }
 0x12f   :  { %2895 = vmatpush1.bf16.msra.mxu1 %v7373_v35  ;;  %v212_v35 = vunpack.c.h.bf16 %v8781_v62 }
 0x130   :  { %2896 = vmatprep.subr.bf16.mxu1 %v7378_v22  ;;  %1126 = vmatpush1.bf16.msra.mxu0 %v7570_v50  ;;  %v193_v22 = vunpack.c.l.bf16 %v8519_v39  ;;  %v7592_v39 = vld [vmem:[%s11274_s4 + $0x214] ss:$8 sps:$4 sm:$0xff]  }
 0x131   :  { %1127 = vmatprep.subr.bf16.mxu0 %v7578_v54  ;;  %v327_v48 = vadd.f32 %v326_v52, %v212_v35  ;;  %v228_v54 = vunpack.c.h.bf16 %v8830_v45  ;;  %v7608_v52 = vld [vmem:[%s11274_s4 + $0x240] ss:$8 sps:$4 sm:$0xff]  }
 0x132   :  { %v270_v50 = vadd.f32 %v269_v23, %v193_v22  ;;  %v7616_v22 = vld [vmem:[%s11274_s4 + $0x254] ss:$8 sps:$4 sm:$0xff]   ;;  %v7428_v23 = vld [vmem:[%s11293_s30 + $0x424] ss:$8 sps:$4 sm:$0xff]  }
 0x133   :  { %2897 = vmatpush1.bf16.msra.mxu1 %v7376_v24  ;;  %v8814_v24 = vld [vmem:[%s11272_s1 + $0x1e0] sm:$0xff] }
 0x134   :  { %2898 = vmatprep.subr.bf16.mxu1 %v7381_v29  ;;  %1128 = vmatpush1.bf16.msra.mxu0 %v7576_v18  ;;  %v196_v29 = vunpack.c.h.bf16 %v8801_v10 }
 0x135   :  { %1140 = vmatprep.subr.bf16.mxu0 %v7585_v40 }
 0x136   :  { %v279_v55 = vadd.f32 %v278_v9, %v196_v29  ;;  %v7426_v29 = vld [vmem:[%s11293_s30 + $0x420] ss:$8 sps:$4 sm:$0xff]   ;;  %v7622_v9 = vld [vmem:[%s11274_s4 + $0x264] ss:$8 sps:$4 sm:$0xff]  }
 0x137   :  { %2899 = vmatpush1.bf16.msra.mxu1 %v7379_v31  ;;  %v241_v31 = vunpack.c.l.bf16 %v8544_v5  ;;  %1130 = vmatmul.mubr.bf16.vlgmr.msra.gmra.mrb[0].mxu0 %v5797_v20  ;;  %v7590_v5 = vld [vmem:[%s11274_s4 + $0x210] ss:$8 sps:$4 sm:$0xff]   ;;  %v7422_v20 = vld [vmem:[%s11293_s30 + $0x414] ss:$8 sps:$4 sm:$0xff]  }
 0x138   :  { %2900 = vmatprep.subr.bf16.mxu1 %v7384_v44  ;;  %v318_v44 = vadd.f32 %v317_v7, %v209_v3  ;;  %1141 = vmatpush1.bf16.msra.mxu0 %v7583_v47  ;;  %v280_v60 = vadd.f32 %v279_v55, %v228_v54  ;;  %v7420_v47 = vld [vmem:[%s11293_s30 + $0x410] ss:$8 sps:$4 sm:$0xff]   ;;  %v7640_v55 = vld [vmem:[%s11274_s4 + $0x294] ss:$8 sps:$4 sm:$0xff]  }
 0x139   :  { %1142 = vmatprep.subr.bf16.mxu0 %v7592_v39  ;;  %v7434_v39 = vld [vmem:[%s11293_s30 + $0x434] ss:$8 sps:$4 sm:$0xff]   ;;  %v7444_v54 = vld [vmem:[%s11293_s30 + $0x450] ss:$8 sps:$4 sm:$0xff]  }
 0x13a   :  { %v8875_v7 = vmul.f32 %v8118_v25, %v280_v60  ;;  %v7652_v60 = vld [vmem:[%s11274_s4 + $0x2b4] ss:$8 sps:$4 sm:$0xff]  }
 0x13b   :  { %2901 = vmatpush1.bf16.msra.mxu1 %v7382_v61  ;;  %v244_v61 = vunpack.c.h.bf16 %v8814_v24 }
 0x13c   :  { %2902 = vmatprep.subr.bf16.mxu1 %v7387_v49  ;;  %v225_v49 = vunpack.c.l.bf16 %v8560_v63  ;;  %v319_v63 = vadd.f32 %v318_v44, %v241_v31  ;;  %1143 = vmatpush1.bf16.msra.mxu0 %v7590_v5  ;;  %v7620_v31 = vld [vmem:[%s11274_s4 + $0x260] ss:$8 sps:$4 sm:$0xff]   ;;  %v7628_v44 = vld [vmem:[%s11274_s4 + $0x274] ss:$8 sps:$4 sm:$0xff]  }
 0x13d   :  { %v328_v12 = vadd.f32 %v327_v48, %v244_v61  ;;  %1144 = vmatprep.subr.bf16.mxu0 %v7598_v56  ;;  %v7440_v61 = vld [vmem:[%s11293_s30 + $0x444] ss:$8 sps:$4 sm:$0xff]   ;;  %v7626_v48 = vld [vmem:[%s11274_s4 + $0x270] ss:$8 sps:$4 sm:$0xff]   ;;  %v7438_v5 = vld [vmem:[%s11293_s30 + $0x440] ss:$8 sps:$4 sm:$0xff]  }
 0x13e   :  { %v271_v18 = vadd.f32 %v270_v50, %v225_v49  ;;  %v8857_v2 = vmul.f32 %v8120_v32, %v319_v63  ;;  %v7634_v49 = vld [vmem:[%s11274_s4 + $0x284] ss:$8 sps:$4 sm:$0xff]   ;;  %v7446_v50 = vld [vmem:[%s11293_s30 + $0x454] ss:$8 sps:$4 sm:$0xff]   ;;  %v7450_v63 = vld [vmem:[%s11293_s30 + $0x460] ss:$8 sps:$4 sm:$0xff]  }
 0x13f   :  { %2903 = vmatpush1.bf16.msra.mxu1 %v7385_v19  ;;  %v7402_v19 = vld [vmem:[%s11293_s30 + $0x3e0] ss:$8 sps:$4 sm:$0xff]   ;;  %v8863_v21 = vmul.f32 %v8120_v32, %v328_v12  ;;  %v7452_v56 = vld [vmem:[%s11293_s30 + $0x464] ss:$8 sps:$4 sm:$0xff]  }
 0x140   :  { %2904 = vmatprep.subr.bf16.mxu1 %v7392_v57  ;;  %v7410_v57 = vld [vmem:[%s11293_s30 + $0x3f4] ss:$8 sps:$4 sm:$0xff]   ;;  %1145 = vmatpush1.bf16.msra.mxu0 %v7596_v41  ;;  %v8869_v3 = vmul.f32 %v8118_v25, %v271_v18  ;;  %v7646_v12 = vld [vmem:[%s11274_s4 + $0x2a4] ss:$8 sps:$4 sm:$0xff]   ;;  %v7644_v18 = vld [vmem:[%s11274_s4 + $0x2a0] ss:$8 sps:$4 sm:$0xff]  }
 0x141   :  { %v1196_v35 = vpack.c.bf16 %v8863_v21, %v8875_v7  ;;  %v7458_v41 = vld [vmem:[%s11293_s30 + $0x474] ss:$8 sps:$4 sm:$0xff]  }
 0x142   :  { %v1193_v40 = vpack.c.bf16 %v8857_v2, %v8869_v3 }
 0x143   :  { %2905 = vmatpush1.bf16.msra.mxu1 %v7390_v1  ;;  %v7604_v1 = vld [vmem:[%s11274_s4 + $0x234] ss:$8 sps:$4 sm:$0xff]  }
 0x144   :  { %2906 = vmatprep.subr.bf16.mxu1 %v7398_v4  ;;  %1146 = vmatprep.subr.bf16.mxu0 %v7604_v1  ;;  %v7414_v4 = vld [vmem:[%s11293_s30 + $0x400] ss:$8 sps:$4 sm:$0xff]   ;;  %v7464_v1 = vld [vmem:[%s11293_s30 + $0x484] ss:$8 sps:$4 sm:$0xff]  }
 0x145   :  { %1147 = vmatpush1.bf16.msra.mxu0 %v7602_v27  ;;  %v7462_v27 = vld [vmem:[%s11293_s30 + $0x480] ss:$8 sps:$4 sm:$0xff]  }
 0x146   :  { %1148 = vmatprep.subr.bf16.mxu0 %v7610_v17  ;;  %v7470_v17 = vld [vmem:[%s11293_s30 + $0x494] ss:$8 sps:$4 sm:$0xff]  }
 0x147   :  { %2907 = vmatpush1.bf16.msra.mxu1 %v7396_v28  ;;  %v7614_v28 = vld [vmem:[%s11274_s4 + $0x250] ss:$8 sps:$4 sm:$0xff]  }
 0x148   :  { %2908 = vmatprep.subr.bf16.mxu1 %v7404_v15  ;;  %v7432_v15 = vld [vmem:[%s11293_s30 + $0x430] ss:$8 sps:$4 sm:$0xff]  }
 0x149   :  { %1149 = vmatpush1.bf16.msra.mxu0 %v7608_v52  ;;  %v7476_v52 = vld [vmem:[%s11293_s30 + $0x4a4] ss:$8 sps:$4 sm:$0xff]  }
 0x14a   :  { %1150 = vmatprep.subr.bf16.mxu0 %v7616_v22  ;;  %v7474_v22 = vld [vmem:[%s11293_s30 + $0x4a0] ss:$8 sps:$4 sm:$0xff]  }
 0x14b   :  { %2909 = vmatpush1.bf16.msra.mxu1 %v7402_v19  ;;  %v7632_v19 = vld [vmem:[%s11274_s4 + $0x280] ss:$8 sps:$4 sm:$0xff]  }
 0x14c   :  { %2910 = vmatprep.subr.bf16.mxu1 %v7410_v57  ;;  %v7638_v57 = vld [vmem:[%s11274_s4 + $0x290] ss:$8 sps:$4 sm:$0xff]  }
 0x14d   :  { %1151 = vmatpush1.bf16.msra.mxu0 %v7614_v28  ;;  %v7482_v28 = vld [vmem:[%s11293_s30 + $0x4b4] ss:$8 sps:$4 sm:$0xff]  }
 0x14e   :  { %1152 = vmatprep.subr.bf16.mxu0 %v7622_v9  ;;  %v9013_v9 = vld [vmem:[%s11272_s1 + $0x68] sm:$0xff] }
 0x14f   :  { %2911 = vmatpush1.bf16.msra.mxu1 %v7408_v46  ;;  %v7456_v46 = vld [vmem:[%s11293_s30 + $0x470] ss:$8 sps:$4 sm:$0xff]  }
 0x150   :  { %2923 = vmatprep.subr.bf16.mxu1 %v7416_v26  ;;  %v7650_v26 = vld [vmem:[%s11274_s4 + $0x2b0] ss:$8 sps:$4 sm:$0xff]  }
 0x151   :  { %1153 = vmatpush1.bf16.msra.mxu0 %v7620_v31  ;;  %v7480_v31 = vld [vmem:[%s11293_s30 + $0x4b0] ss:$8 sps:$4 sm:$0xff]  }
 0x152   :  { %2913 = vmatmul.mubr.bf16.vlgmr.msra.gmra.mrb[0].mxu1 %v1193_v40  ;;  %1154 = vmatprep.subr.bf16.mxu0 %v7628_v44  ;;  %v7656_v40 = vld [vmem:[%s11274_s4 + $0x2c0] ss:$8 sps:$4 sm:$0xff]   ;;  %v147_v44 = vunpack.c.l.bf16 %v8743_v51 }
 0x153   :  { %2924 = vmatpush1.bf16.msra.mxu1 %v7414_v4  ;;  %2955 = vmatprep.mubr.bf16.mxu1 %v1196_v35  ;;  %v7658_v4 = vld [vmem:[%s11274_s4 + $0x2c4] ss:$8 sps:$4 sm:$0xff]   ;;  %v7664_v35 = vld [vmem:[%s11274_s4 + $0x2d4] ss:$8 sps:$4 sm:$0xff]  }
 0x154   :  { %2925 = vmatprep.subr.bf16.mxu1 %v7422_v20  ;;  %v7468_v20 = vld [vmem:[%s11293_s30 + $0x490] ss:$8 sps:$4 sm:$0xff]  }
 0x155   :  { %1155 = vmatpush1.bf16.msra.mxu0 %v7626_v48  ;;  %v7490_v48 = vld [vmem:[%s11293_s30 + $0x4c4] ss:$8 sps:$4 sm:$0xff]  }
 0x156   :  { %1156 = vmatprep.subr.bf16.mxu0 %v7634_v49  ;;  %v9039_v49 = vld [vmem:[%s11272_s1 + $0xa8] sm:$0xff] }
 0x157   :  { %2926 = vmatpush1.bf16.msra.mxu1 %v7420_v47  ;;  %v7662_v47 = vld [vmem:[%s11274_s4 + $0x2d0] ss:$8 sps:$4 sm:$0xff]  }
 0x158   :  { %2927 = vmatprep.subr.bf16.mxu1 %v7428_v23  ;;  %v7670_v23 = vld [vmem:[%s11274_s4 + $0x2e4] ss:$8 sps:$4 sm:$0xff]  }
 0x159   :  { %1157 = vmatpush1.bf16.msra.mxu0 %v7632_v19  ;;  %v131_v19 = vunpack.c.l.bf16 %v8764_v58  ;;  %v432_v58 = vld [vmem:[%s11275_s0 + $0x10] sm:$0xff] }
 0x15a   :  { %1158 = vmatprep.subr.bf16.mxu0 %v7640_v55  ;;  %v9051_v55 = vld [vmem:[%s11272_s1 + $0x168] sm:$0xff] }
 0x15b   :  { %2928 = vmatpush1.bf16.msra.mxu1 %v7426_v29  ;;  %v7668_v29 = vld [vmem:[%s11274_s4 + $0x2e0] ss:$8 sps:$4 sm:$0xff]  }
 0x15c   :  { %2929 = vmatprep.subr.bf16.mxu1 %v7434_v39  ;;  %v9018_v39 = vld [vmem:[%s11272_s1 + $0xe8] sm:$0xff] }
 0x15d   :  { %1159 = vmatpush1.bf16.msra.mxu0 %v7638_v57  ;;  %v182_v51 = vunpack.c.h.bf16 %v9018_v39 }
 0x15e   :  { %1160 = vmatprep.subr.bf16.mxu0 %v7646_v12  ;;  %v211_v12 = vunpack.c.l.bf16 %v8781_v62 }
 0x15f   :  { %2930 = vmatpush1.bf16.msra.mxu1 %v7432_v15  ;;  %v7676_v15 = vld [vmem:[%s11274_s4 + $0x2f4] ss:$8 sps:$4 sm:$0xff]  }
 0x160   :  { %2931 = vmatprep.subr.bf16.mxu1 %v7440_v61  ;;  %v179_v61 = vunpack.c.l.bf16 %v8748_v53  ;;  %v7674_v53 = vld [vmem:[%s11274_s4 + $0x2f0] ss:$8 sps:$4 sm:$0xff]   ;;  %s7847_s4 = smov 1  }
 0x161   :  { %1161 = vmatpush1.bf16.msra.mxu0 %v7644_v18 }
 0x162   :  { %1162 = vmatprep.subr.bf16.mxu0 %v7652_v60  ;;  %v323_v18 = vadd.f32 %v179_v61, %v147_v44  ;;  %v7509_v61 = vld [vmem:[%s11293_s30 + $0x4f4] ss:$8 sps:$4 sm:$0xff]  }
 0x163   :  { %2932 = vmatpush1.bf16.msra.mxu1 %v7438_v5  ;;  %v9034_v5 = vld [vmem:[%s11272_s1 + $0x28] sm:$0xff] }
 0x164   :  { %2933 = vmatprep.subr.bf16.mxu1 %v7446_v50  ;;  %v150_v50 = vunpack.c.h.bf16 %v9013_v9  ;;  %v134_v57 = vunpack.c.h.bf16 %v9034_v5 }
 0x165   :  { %1163 = vmatpush1.bf16.msra.mxu0 %v7650_v26  ;;  %v214_v26 = vunpack.c.h.bf16 %v9051_v55 }
 0x166   :  { %1164 = vmatprep.subr.bf16.mxu0 %v7658_v4  ;;  %v195_v4 = vunpack.c.l.bf16 %v8801_v10  ;;  %v7503_v10 = vld [vmem:[%s11293_s30 + $0x4e4] ss:$8 sps:$4 sm:$0xff]  }
 0x167   :  { %2934 = vmatpush1.bf16.msra.mxu1 %v7444_v54  ;;  %v163_v54 = vunpack.c.l.bf16 %v8769_v59  ;;  %v435_v59 = vld [vmem:[%s11275_s0 + $0x28] sm:$0xff] }
 0x168   :  { %2935 = vmatprep.subr.bf16.mxu1 %v7452_v56  ;;  %v7488_v56 = vld [vmem:[%s11293_s30 + $0x4c0] ss:$8 sps:$4 sm:$0xff]   ;;  %v5800_v60 = vcombine.high %v432_v58, %v435_v59 }
 0x169   :  { %1165 = vmatpush1.bf16.msra.mxu0 %v7656_v40  ;;  %v275_v62 = vadd.f32 %v163_v54, %v131_v19  ;;  %v7495_v40 = vld [vmem:[%s11293_s30 + $0x4d0] ss:$8 sps:$4 sm:$0xff]   ;;  %v7515_v54 = vld [vmem:[%s11293_s30 + $0x504] ss:$8 sps:$4 sm:$0xff]  }
 0x16a   :  { %1166 = vmatprep.subr.bf16.mxu0 %v7664_v35  ;;  %1172 = vmatprep.mubr.bf16.mxu0 %v5800_v60  ;;  %v7527_v60 = vld [vmem:[%s11293_s30 + $0x524] ss:$8 sps:$4 sm:$0xff]  }
 0x16b   :  { %2936 = vmatpush1.bf16.msra.mxu1 %v7450_v63  ;;  %v166_v63 = vunpack.c.h.bf16 %v9039_v49 }
 0x16c   :  { %2937 = vmatprep.subr.bf16.mxu1 %v7458_v41  ;;  %v7497_v41 = vld [vmem:[%s11293_s30 + $0x4d4] ss:$8 sps:$4 sm:$0xff]  }
 0x16d   :  { %1167 = vmatpush1.bf16.msra.mxu0 %v7662_v47  ;;  %v284_v35 = vadd.f32 %v166_v63, %v134_v57  ;;  %v324_v47 = vadd.f32 %v323_v18, %v211_v12  ;;  %v7513_v63 = vld [vmem:[%s11293_s30 + $0x500] ss:$8 sps:$4 sm:$0xff]   ;;  %v7521_v12 = vld [vmem:[%s11293_s30 + $0x514] ss:$8 sps:$4 sm:$0xff]   ;;  %v7519_v18 = vld [vmem:[%s11293_s30 + $0x510] ss:$8 sps:$4 sm:$0xff]  }
 0x16e   :  { %1168 = vmatprep.subr.bf16.mxu0 %v7670_v23 }
 0x16f   :  { %2938 = vmatpush1.bf16.msra.mxu1 %v7456_v46  ;;  %v9071_v46 = vld [vmem:[%s11272_s1 + $0x128] sm:$0xff] }
 0x170   :  { %2939 = vmatprep.subr.bf16.mxu1 %v7464_v1  ;;  %v5799_v1 = vcombine.low %v432_v58, %v435_v59 }
 0x171   :  { %1169 = vmatpush1.bf16.msra.mxu0 %v7668_v29  ;;  %v227_v29 = vunpack.c.l.bf16 %v8830_v45  ;;  %v7507_v45 = vld [vmem:[%s11293_s30 + $0x4f0] ss:$8 sps:$4 sm:$0xff]  }
 0x172   :  { %1170 = vmatprep.subr.bf16.mxu0 %v7676_v15 }
 0x173   :  { %2940 = vmatpush1.bf16.msra.mxu1 %v7462_v27  ;;  %v332_v27 = vadd.f32 %v182_v51, %v150_v50 }
 0x174   :  { %2941 = vmatprep.subr.bf16.mxu1 %v7470_v17  ;;  %v9078_v17 = vld [vmem:[%s11272_s1 + $0x1e8] sm:$0xff] }
 0x175   :  { %1171 = vmatpush1.bf16.msra.mxu0 %v7674_v53  ;;  %v246_v23 = vunpack.c.h.bf16 %v9078_v17 }
 0x177   :  { %2942 = vmatpush1.bf16.msra.mxu1 %v7468_v20  ;;  %v198_v20 = vunpack.c.h.bf16 %v9071_v46 }
 0x178   :  { %2943 = vmatprep.subr.bf16.mxu1 %v7476_v52  ;;  %v243_v52 = vunpack.c.l.bf16 %v8814_v24  ;;  %1173 = vmatmul.mubr.bf16.vlgmr.msra.gmra.mrb[0].mxu0 %v5799_v1  ;;  %v276_v24 = vadd.f32 %v275_v62, %v195_v4  ;;  %v7525_v1 = vld [vmem:[%s11293_s30 + $0x520] ss:$8 sps:$4 sm:$0xff]   ;;  %v7539_v4 = vld [vmem:[%s11293_s30 + $0x544] ss:$8 sps:$4 sm:$0xff]  }
 0x179   :  { %3210 = vmatprep.mubr.bf16.mxu0 %v7841_v0  ;;  %v285_v44 = vadd.f32 %v284_v35, %v198_v20  ;;  %v7537_v62 = vld [vmem:[%s11293_s30 + $0x540] ss:$8 sps:$4 sm:$0xff]   ;;  %v7543_v20 = vld [vmem:[%s11293_s30 + $0x550] ss:$8 sps:$4 sm:$0xff]   ;;  %v7551_v35 = vld [vmem:[%s11293_s30 + $0x564] ss:$8 sps:$4 sm:$0xff]  }
 0x17a   :  { %v277_v51 = vadd.f32 %v276_v24, %v227_v29  ;;  %v7555_v29 = vld [vmem:[%s11293_s30 + $0x570] ss:$8 sps:$4 sm:$0xff]   ;;  %v7563_v24 = vld [vmem:[%s11293_s30 + $0x584] ss:$8 sps:$4 sm:$0xff]  }
 0x17b   :  { %2944 = vmatpush1.bf16.msra.mxu1 %v7474_v22  ;;  %v9091_v22 = vld [vmem:[%s11272_s1 + $0x1a8] sm:$0xff] }
 0x17c   :  { %2945 = vmatprep.subr.bf16.mxu1 %v7482_v28  ;;  %v333_v28 = vadd.f32 %v332_v27, %v214_v26  ;;  %v230_v15 = vunpack.c.h.bf16 %v9091_v22  ;;  %v9116_v57 = vmul.f32 %v8118_v25, %v277_v51  ;;  %v7533_v26 = vld [vmem:[%s11293_s30 + $0x534] ss:$8 sps:$4 sm:$0xff]   ;;  %v7531_v27 = vld [vmem:[%s11293_s30 + $0x530] ss:$8 sps:$4 sm:$0xff]  }
 0x17d   :  { %v9206_v51 = vld [vmem:[%s11272_s1 + $0x70] sm:$0xff] }
 0x17e   :  { %v334_v50 = vadd.f32 %v333_v28, %v246_v23  ;;  %v286_v53 = vadd.f32 %v285_v44, %v230_v15  ;;  %v7557_v23 = vld [vmem:[%s11293_s30 + $0x574] ss:$8 sps:$4 sm:$0xff]   ;;  %v9176_v28 = vld [vmem:[%s11292_s26 + $0x8] sm:$0xff]  ;;  %v7567_v44 = vld [vmem:[%s11293_s30 + $0x590] ss:$8 sps:$4 sm:$0xff]  }
 0x17f   :  { %2946 = vmatpush1.bf16.msra.mxu1 %v7480_v31  ;;  %v7501_v31 = vld [vmem:[%s11293_s30 + $0x4e0] ss:$8 sps:$4 sm:$0xff]   ;;  %v7569_v15 = vld [vmem:[%s11293_s30 + $0x594] ss:$8 sps:$4 sm:$0xff]  }
 0x180   :  { %2947 = vmatprep.subr.bf16.mxu1 %v7490_v48  ;;  %v325_v48 = vadd.f32 %v324_v47, %v243_v52  ;;  %v9122_v58 = vmul.f32 %v8118_v25, %v286_v53  ;;  %v7842_v52 = vmov 1   ;;  %v7549_v47 = vld [vmem:[%s11293_s30 + $0x560] ss:$8 sps:$4 sm:$0xff]   ;;  %v7579_v53 = vld [vmem:[%s11293_s30 + $0x5b0] ss:$8 sps:$4 sm:$0xff]  }
 0x181   :  { %7204 = vset.pattern.permute.xlu1 %v7842_v52  ;;  %v197_v52 = vunpack.c.l.bf16 %v9071_v46  ;;  %v7601_v46 = vld [vmem:[%s11293_s30 + $0x5e4] ss:$8 sps:$4 sm:$0xff]  }
 0x182   :  { %v9107_v19 = vmul.f32 %v8120_v32, %v325_v48  ;;  %v7573_v48 = vld [vmem:[%s11293_s30 + $0x5a0] ss:$8 sps:$4 sm:$0xff]  }
 0x183   :  { %2948 = vmatpush1.bf16.msra.mxu1 %v7488_v56  ;;  %v9113_v56 = vmul.f32 %v8120_v32, %v334_v50  ;;  %v7581_v50 = vld [vmem:[%s11293_s30 + $0x5b4] ss:$8 sps:$4 sm:$0xff]  }
 0x184   :  { %2949 = vmatprep.subr.bf16.mxu1 %v7497_v41  ;;  %v1195_v59 = vpack.c.bf16 %v9107_v19, %v9116_v57 }
 0x185   :  { %v1198_v41 = vpack.c.bf16 %v9113_v56, %v9122_v58 }
 0x187   :  { %2950 = vmatpush1.bf16.msra.mxu1 %v7495_v40  ;;  %v7545_v40 = vld [vmem:[%s11293_s30 + $0x554] ss:$8 sps:$4 sm:$0xff]  }
 0x188   :  { %2951 = vmatprep.subr.bf16.mxu1 %v7503_v10  ;;  %v9164_v10 = vld [vmem:[%s11292_s26] sm:$0xff] }
 0x189   :  { %421 = vperm.xlu1 %7204, %v9164_v10   ;;  %3557 = vrot.lane.b32.xlu0 %v9164_v10, %s7845_s6  ;;  %v9765_v10 = vld [vmem:[%s11279_s5] sm:$0x3] }
 0x18b   :  { %2952 = vmatpush1.bf16.msra.mxu1 %v7501_v31  ;;  %v7561_v31 = vld [vmem:[%s11293_s30 + $0x580] ss:$8 sps:$4 sm:$0xff]  }
 0x18c   :  { %2953 = vmatprep.subr.bf16.mxu1 %v7509_v61  ;;  %v7575_v61 = vld [vmem:[%s11293_s30 + $0x5a4] ss:$8 sps:$4 sm:$0xff]  }
 0x18d   :  { %425 = vperm.xlu1 %7204, %v9176_v28  }
 0x18f   :  { %2954 = vmatpush1.bf16.msra.mxu1 %v7507_v45  ;;  %v9211_v45 = vld [vmem:[%s11272_s1 + $0xf0] sm:$0xff] }
 0x190   :  { %2966 = vmatprep.subr.bf16.mxu1 %v7515_v54  ;;  %v149_v54 = vunpack.c.l.bf16 %v9013_v9  ;;  %v184_v9 = vunpack.c.h.bf16 %v9211_v45 }
 0x191   :  { %3559 = vrot.lane.b32.xlu1 %v9176_v28, %s7845_s6 }
 0x192   :  { %2956 = vmatmul.mubr.bf16.vlgmr.msra.gmra.mrb[0].mxu1 %v1195_v59  ;;  %v7588_v59 = vld [vmem:[%s11293_s30 + $0x5c4] ss:$8 sps:$4 sm:$0xff]  }
 0x193   :  { %2967 = vmatpush1.bf16.msra.mxu1 %v7513_v63  ;;  %2998 = vmatprep.mubr.bf16.mxu1 %v1198_v41  ;;  %v181_v63 = vunpack.c.l.bf16 %v9018_v39  ;;  %v9229_v41 = vld [vmem:[%s11272_s1 + $0xb0] sm:$0xff]  ;;  %v133_v39 = vunpack.c.l.bf16 %v9034_v5 }
 0x194   :  { %2968 = vmatprep.subr.bf16.mxu1 %v7521_v12  ;;  %v9224_v12 = vld [vmem:[%s11272_s1 + $0x30] sm:$0xff] }
 0x195   :  { %v7595_v5 = vld [vmem:[%s11293_s30 + $0x5d4] ss:$8 sps:$4 sm:$0xff]  }
 0x197   :  { %2969 = vmatpush1.bf16.msra.mxu1 %v7519_v18  ;;  %v152_v18 = vunpack.c.h.bf16 %v9206_v51 }
 0x198   :  { %2970 = vmatprep.subr.bf16.mxu1 %v7527_v60  ;;  %v165_v60 = vunpack.c.l.bf16 %v9039_v49  ;;  %v329_v49 = vadd.f32 %v181_v63, %v149_v54 }
 0x19b   :  { %2971 = vmatpush1.bf16.msra.mxu1 %v7525_v1  ;;  %v9238_v1 = vld [vmem:[%s11272_s1 + $0x170] sm:$0xff] }
 0x19c   :  { %2972 = vmatprep.subr.bf16.mxu1 %v7533_v26  ;;  %v7586_v26 = vld [vmem:[%s11293_s30 + $0x5c0] ss:$8 sps:$4 sm:$0xff]  }
 0x19f   :  { %2973 = vmatpush1.bf16.msra.mxu1 %v7531_v27  ;;  %v136_v27 = vunpack.c.h.bf16 %v9224_v12 }
 0x1a0   :  { %2974 = vmatprep.subr.bf16.mxu1 %v7539_v4  ;;  %v168_v4 = vunpack.c.h.bf16 %v9229_v41 }
 0x1a3   :  { %2975 = vmatpush1.bf16.msra.mxu1 %v7537_v62  ;;  %v213_v62 = vunpack.c.l.bf16 %v9051_v55  ;;  %v9259_v55 = vld [vmem:[%s11272_s1 + $0x1f0] sm:$0xff] }
 0x1a4   :  { %2976 = vmatprep.subr.bf16.mxu1 %v7545_v40  ;;  %v9252_v40 = vld [vmem:[%s11272_s1 + $0x130] sm:$0xff] }
 0x1a7   :  { %2977 = vmatpush1.bf16.msra.mxu1 %v7543_v20  ;;  %v216_v20 = vunpack.c.h.bf16 %v9238_v1 }
 0x1a8   :  { %2978 = vmatprep.subr.bf16.mxu1 %v7551_v35  ;;  %v338_v35 = vadd.f32 %v184_v9, %v152_v18 }
 0x1ab   :  { %2979 = vmatpush1.bf16.msra.mxu1 %v7549_v47  ;;  %v281_v47 = vadd.f32 %v165_v60, %v133_v39 }
 0x1ac   :  { %2980 = vmatprep.subr.bf16.mxu1 %v7557_v23  ;;  %v7593_v23 = vld [vmem:[%s11293_s30 + $0x5d0] ss:$8 sps:$4 sm:$0xff]  }
 0x1af   :  { %2981 = vmatpush1.bf16.msra.mxu1 %v7555_v29  ;;  %v200_v29 = vunpack.c.h.bf16 %v9252_v40 }
 0x1b0   :  { %2982 = vmatprep.subr.bf16.mxu1 %v7563_v24  ;;  %v290_v24 = vadd.f32 %v168_v4, %v136_v27  ;;  %v7613_v27 = vld [vmem:[%s11293_s30 + $0x604] ss:$8 sps:$4 sm:$0xff]  }
 0x1b2   :  { %v291_v63 = vadd.f32 %v290_v24, %v200_v29  ;;  %v7617_v29 = vld [vmem:[%s11293_s30 + $0x610] ss:$8 sps:$4 sm:$0xff]   ;;  %v7747_v24 = vld [vmem:[%s11273_s8 + $0x14] ss:$8 sps:$4 sm:$0xff]  }
 0x1b3   :  { %2983 = vmatpush1.bf16.msra.mxu1 %v7561_v31  ;;  %v245_v31 = vunpack.c.l.bf16 %v9078_v17  ;;  %v7599_v17 = vld [vmem:[%s11293_s30 + $0x5e0] ss:$8 sps:$4 sm:$0xff]  }
 0x1b4   :  { %2984 = vmatprep.subr.bf16.mxu1 %v7569_v15  ;;  %v330_v15 = vadd.f32 %v329_v49, %v213_v62 }
 0x1b6   :  { %v331_v18 = vadd.f32 %v330_v15, %v245_v31  ;;  %v7625_v31 = vld [vmem:[%s11293_s30 + $0x624] ss:$8 sps:$4 sm:$0xff]   ;;  %v7745_v15 = vld [vmem:[%s11273_s8 + $0x10] ss:$8 sps:$4 sm:$0xff]  }
 0x1b7   :  { %2985 = vmatpush1.bf16.msra.mxu1 %v7567_v44  ;;  %v9272_v44 = vld [vmem:[%s11272_s1 + $0x1b0] sm:$0xff] }
 0x1b8   :  { %2986 = vmatprep.subr.bf16.mxu1 %v7575_v61  ;;  %v248_v61 = vunpack.c.h.bf16 %v9259_v55  ;;  %v232_v54 = vunpack.c.h.bf16 %v9272_v44 }
 0x1ba   :  { %v292_v60 = vadd.f32 %v291_v63, %v232_v54  ;;  %v7748_v54 = vld [vmem:[%s11273_s8 + $0x20] ss:$8 sps:$4 sm:$0xff]   ;;  %v7753_v63 = vld [vmem:[%s11273_s8 + $0x34] ss:$8 sps:$4 sm:$0xff]  }
 0x1bb   :  { %2987 = vmatpush1.bf16.msra.mxu1 %v7573_v48  ;;  %v339_v48 = vadd.f32 %v338_v35, %v216_v20  ;;  %v7619_v35 = vld [vmem:[%s11293_s30 + $0x614] ss:$8 sps:$4 sm:$0xff]  }
 0x1bc   :  { %2988 = vmatprep.subr.bf16.mxu1 %v7581_v50  ;;  %v229_v50 = vunpack.c.l.bf16 %v9091_v22  ;;  %v7605_v22 = vld [vmem:[%s11293_s30 + $0x5f0] ss:$8 sps:$4 sm:$0xff]   ;;  %v9302_v49 = vmul.f32 %v8118_v25, %v292_v60  ;;  %v7637_v60 = vld [vmem:[%s11293_s30 + $0x644] ss:$8 sps:$4 sm:$0xff]  }
 0x1bd   :  { %v340_v9 = vadd.f32 %v339_v48, %v248_v61  ;;  %v7750_v61 = vld [vmem:[%s11273_s8 + $0x24] ss:$8 sps:$4 sm:$0xff]  }
 0x1be   :  { %v3108_v48 = vld [vmem:[%s11273_s8 + $0x40] sm:$0x11] }
 0x1bf   :  { %2989 = vmatpush1.bf16.msra.mxu1 %v7579_v53  ;;  %v282_v53 = vadd.f32 %v281_v47, %v197_v52  ;;  %v9293_v4 = vmul.f32 %v8120_v32, %v340_v9  ;;  %v7742_v47 = vld [vmem:[%s11273_s8] ss:$8 sps:$4 sm:$0xff]  }
 0x1c0   :  { %2990 = vmatprep.subr.bf16.mxu1 %v7588_v59  ;;  %v7607_v59 = vld [vmem:[%s11293_s30 + $0x5f4] ss:$8 sps:$4 sm:$0xff]  }
 0x1c1   :  { %v283_v39 = vadd.f32 %v282_v53, %v229_v50  ;;  %v1200_v52 = vpack.c.bf16 %v9293_v4, %v9302_v49  ;;  %v7623_v50 = vld [vmem:[%s11293_s30 + $0x620] ss:$8 sps:$4 sm:$0xff]   ;;  %v7631_v53 = vld [vmem:[%s11293_s30 + $0x634] ss:$8 sps:$4 sm:$0xff]  }
 0x1c3   :  { %2991 = vmatpush1.bf16.msra.mxu1 %v7586_v26  ;;  %v9287_v26 = vmul.f32 %v8120_v32, %v331_v18  ;;  %v9296_v62 = vmul.f32 %v8118_v25, %v283_v39  ;;  %v3171_v39 = vsel %vm3169_vm0, 65535, %v7841_v0 }
 0x1c4   :  { %2992 = vmatprep.subr.bf16.mxu1 %v7595_v5  ;;  %v7611_v5 = vld [vmem:[%s11293_s30 + $0x600] ss:$8 sps:$4 sm:$0xff]  }
 0x1c5   :  { %v1197_v20 = vpack.c.bf16 %v9287_v26, %v9296_v62 }
 0x1c7   :  { %2993 = vmatpush1.bf16.msra.mxu1 %v7593_v23  ;;  %v7744_v23 = vld [vmem:[%s11273_s8 + $0x4] ss:$8 sps:$4 sm:$0xff]  }
 0x1c8   :  { %2994 = vmatprep.subr.bf16.mxu1 %v7601_v46  ;;  %3178 = vmatprep.subr.bf16.mxu0 %v7744_v23  ;;  %v534_v46 = vlaneseq }
 0x1c9   :  { %3179 = vmatpush1.bf16.msra.mxu0 %v7742_v47  ;;  %v7643_v47 = vld [vmem:[%s11293_s30 + $0x654] ss:$8 sps:$4 sm:$0xff]  }
 0x1ca   :  { %3180 = vmatprep.subr.bf16.mxu0 %v7747_v24  ;;  %v3625_v18 = vand.u32 127, %v534_v46  ;;  %v7649_v24 = vld [vmem:[%s11293_s30 + $0x664] ss:$8 sps:$4 sm:$0xff]  }
 0x1cb   :  { %2995 = vmatpush1.bf16.msra.mxu1 %v7599_v17  ;;  %v9341_v17 = vshrl.u32 %v534_v46, 7  ;;  %v7647_v46 = vld [vmem:[%s11293_s30 + $0x660] ss:$8 sps:$4 sm:$0xff]  }
 0x1cc   :  { %2996 = vmatprep.subr.bf16.mxu1 %v7607_v59  ;;  %v6162_v59 = vcombine.high %v3108_v48, %v3108_v48 }
 0x1cd   :  { %3181 = vmatpush1.bf16.msra.mxu0 %v7745_v15  ;;  %v3628_v9 = vmul.u32 8, %v9341_v17  ;;  %v7655_v15 = vld [vmem:[%s11293_s30 + $0x674] ss:$8 sps:$4 sm:$0xff]  }
 0x1ce   :  { %3182 = vmatprep.subr.bf16.mxu0 %v7750_v61  ;;  %v3176_v0 = vand.u32 %v6162_v59, %v3171_v39  ;;  %v7653_v61 = vld [vmem:[%s11293_s30 + $0x670] ss:$8 sps:$4 sm:$0xff]   ;;  %v7671_v59 = vld [vmem:[%s11293_s30 + $0x6a0] ss:$8 sps:$4 sm:$0xff]  }
 0x1cf   :  { %2997 = vmatpush1.bf16.msra.mxu1 %v7605_v22  ;;  %v7629_v22 = vld [vmem:[%s11293_s30 + $0x630] ss:$8 sps:$4 sm:$0xff]   ;;  %vm3629_vm1 = vcmp.ge.s32.totalorder %v3625_v18, %v3628_v9 }
 0x1d0   :  { %3009 = vmatprep.subr.bf16.mxu1 %v7613_v27  ;;  %v3630_v27 = vadd.s32 8, %v3628_v9  ;;  %v9411_v9 = vld [vmem:[%s11272_s1 + $0x78] sm:$0xff] }
 0x1d1   :  { %3183 = vmatpush1.bf16.msra.mxu0 %v7748_v54  ;;  %v7665_v54 = vld [vmem:[%s11293_s30 + $0x690] ss:$8 sps:$4 sm:$0xff]  }
 0x1d2   :  { %2999 = vmatmul.mubr.bf16.vlgmr.msra.gmra.mrb[0].mxu1 %v1197_v20  ;;  %v7751_v20 = vld [vmem:[%s11273_s8 + $0x30] ss:$8 sps:$4 sm:$0xff]   ;;  %3184 = vmatprep.subr.bf16.mxu0 %v7753_v63  ;;  %vm3631_vm2 = vcmp.lt.s32.totalorder %v3625_v18, %v3630_v27  ;;  %v7673_v63 = vld [vmem:[%s11293_s30 + $0x6a4] ss:$8 sps:$4 sm:$0xff]   ;;  %v7679_v18 = vld [vmem:[%s11293_s30 + $0x6b4] ss:$8 sps:$4 sm:$0xff]   ;;  %v183_v27 = vunpack.c.l.bf16 %v9211_v45  ;;  %v135_v45 = vunpack.c.l.bf16 %v9224_v12 }
 0x1d3   :  { %3010 = vmatpush1.bf16.msra.mxu1 %v7611_v5  ;;  %3041 = vmatprep.mubr.bf16.mxu1 %v1200_v52  ;;  %v6161_v5 = vcombine.low %v3108_v48, %v3108_v48  ;;  %vm9364_vm3 = vmand %vm3629_vm1, %vm3631_vm2  ;;  %v7661_v48 = vld [vmem:[%s11293_s30 + $0x684] ss:$8 sps:$4 sm:$0xff]   ;;  %v7687_v12 = vld [vmem:[%s11293_s30 + $0x6d4] ss:$8 sps:$4 sm:$0xff]   ;;  %s7846_s8 = smov 2  }
 0x1d4   :  { %3011 = vmatprep.subr.bf16.mxu1 %v7619_v35  ;;  %v7635_v35 = vld [vmem:[%s11293_s30 + $0x640] ss:$8 sps:$4 sm:$0xff]  }
 0x1d5   :  { %v3173_v23 = vand.u32 %v6161_v5, %v3171_v39  ;;  %3185 = vmatpush1.bf16.msra.mxu0 %v7751_v20  ;;  %v9416_v39 = vld [vmem:[%s11272_s1 + $0xf8] sm:$0xff]  ;;  %v7684_v5 = vld [vmem:[%s11293_s30 + $0x6c4] ss:$8 sps:$4 sm:$0xff]  }
 0x1d6   :  { %3186 = vmatprep.subr.bf16.mxu0 %v3176_v0  ;;  %v9429_v20 = vld [vmem:[%s11272_s1 + $0x38] sm:$0xff] }
 0x1d7   :  { %3012 = vmatpush1.bf16.msra.mxu1 %v7617_v29  ;;  %v7641_v29 = vld [vmem:[%s11293_s30 + $0x650] ss:$8 sps:$4 sm:$0xff]  }
 0x1d8   :  { %3013 = vmatprep.subr.bf16.mxu1 %v7625_v31  ;;  %v7843_v31 = vmov 0.0|0.0   ;;  %v9434_v0 = vld [vmem:[%s11272_s1 + $0xb8] sm:$0xff] }
 0x1d9   :  { %3187 = vmatpush1.bf16.msra.mxu0 %v3173_v23  ;;  %v9443_v23 = vld [vmem:[%s11272_s1 + $0x178] sm:$0xff] }
 0x1da   :  { %6631 = vmatprep.subr.bf16.mxu0 %v7843_v31 }
 0x1db   :  { %3014 = vmatpush1.bf16.msra.mxu1 %v7623_v50  ;;  %v7659_v50 = vld [vmem:[%s11293_s30 + $0x680] ss:$8 sps:$4 sm:$0xff]  }
 0x1dc   :  { %3015 = vmatprep.subr.bf16.mxu1 %v7631_v53  ;;  %v7667_v53 = vld [vmem:[%s11293_s30 + $0x694] ss:$8 sps:$4 sm:$0xff]  }
 0x1df   :  { %3016 = vmatpush1.bf16.msra.mxu1 %v7629_v22  ;;  %v7677_v22 = vld [vmem:[%s11293_s30 + $0x6b0] ss:$8 sps:$4 sm:$0xff]  }
 0x1e0   :  { %3017 = vmatprep.subr.bf16.mxu1 %v7637_v60  ;;  %v151_v60 = vunpack.c.l.bf16 %v9206_v51  ;;  %v186_v51 = vunpack.c.h.bf16 %v9416_v39 }
 0x1e3   :  { %3018 = vmatpush1.bf16.msra.mxu1 %v7635_v35  ;;  %v154_v35 = vunpack.c.h.bf16 %v9411_v9 }
 0x1e4   :  { %3019 = vmatprep.subr.bf16.mxu1 %v7643_v47  ;;  %v167_v47 = vunpack.c.l.bf16 %v9229_v41  ;;  %v335_v41 = vadd.f32 %v183_v27, %v151_v60  ;;  %v9477_v27 = vld [vmem:[%s11272_s1 + $0x1b8] sm:$0xff] }
 0x1e7   :  { %3020 = vmatpush1.bf16.msra.mxu1 %v7641_v29  ;;  %v7682_v29 = vld [vmem:[%s11293_s30 + $0x6c0] ss:$8 sps:$4 sm:$0xff]  }
 0x1e8   :  { %3021 = vmatprep.subr.bf16.mxu1 %v7649_v24  ;;  %v138_v24 = vunpack.c.h.bf16 %v9429_v20 }
 0x1eb   :  { %3022 = vmatpush1.bf16.msra.mxu1 %v7647_v46  ;;  %v170_v46 = vunpack.c.h.bf16 %v9434_v0 }
 0x1ec   :  { %3023 = vmatprep.subr.bf16.mxu1 %v7655_v15  ;;  %v215_v15 = vunpack.c.l.bf16 %v9238_v1  ;;  %v9464_v1 = vld [vmem:[%s11272_s1 + $0x1f8] sm:$0xff] }
 0x1ee   :  { %v336_v60 = vadd.f32 %v335_v41, %v215_v15 }
 0x1ef   :  { %3024 = vmatpush1.bf16.msra.mxu1 %v7653_v61  ;;  %v9457_v61 = vld [vmem:[%s11272_s1 + $0x138] sm:$0xff] }
 0x1f0   :  { %3025 = vmatprep.subr.bf16.mxu1 %v7661_v48  ;;  %v218_v48 = vunpack.c.h.bf16 %v9443_v23 }
 0x1f3   :  { %3026 = vmatpush1.bf16.msra.mxu1 %v7659_v50  ;;  %v344_v50 = vadd.f32 %v186_v51, %v154_v35  ;;  %v231_v51 = vunpack.c.l.bf16 %v9272_v44  ;;  %v7691_v44 = vld [vmem:[%s11293_s30 + $0x6f0] ss:$8 sps:$4 sm:$0xff]  }
 0x1f4   :  { %3027 = vmatprep.subr.bf16.mxu1 %v7667_v53  ;;  %v199_v53 = vunpack.c.l.bf16 %v9252_v40  ;;  %v7690_v40 = vld [vmem:[%s11293_s30 + $0x6e4] ss:$8 sps:$4 sm:$0xff]  }
 0x1f5   :  { %v345_v35 = vadd.f32 %v344_v50, %v218_v48  ;;  %v7696_v50 = vld [vmem:[%s11293_s30 + $0x704] ss:$8 sps:$4 sm:$0xff]  }
 0x1f7   :  { %3028 = vmatpush1.bf16.msra.mxu1 %v7665_v54  ;;  %v287_v54 = vadd.f32 %v167_v47, %v135_v45  ;;  %v234_v47 = vunpack.c.h.bf16 %v9477_v27 }
 0x1f8   :  { %3029 = vmatprep.subr.bf16.mxu1 %v7673_v63  ;;  %v7685_v63 = vld [vmem:[%s11293_s30 + $0x6d0] ss:$8 sps:$4 sm:$0xff]  }
 0x1f9   :  { %v288_v45 = vadd.f32 %v287_v54, %v199_v53 }
 0x1fb   :  { %3030 = vmatpush1.bf16.msra.mxu1 %v7671_v59  ;;  %v202_v59 = vunpack.c.h.bf16 %v9457_v61 }
 0x1fc   :  { %3031 = vmatprep.subr.bf16.mxu1 %v7679_v18  ;;  %v296_v18 = vadd.f32 %v170_v46, %v138_v24  ;;  %v7693_v24 = vld [vmem:[%s11293_s30 + $0x6f4] ss:$8 sps:$4 sm:$0xff]  }
 0x1ff   :  { %3032 = vmatpush1.bf16.msra.mxu1 %v7677_v22  ;;  %v247_v22 = vunpack.c.l.bf16 %v9259_v55  ;;  %v7688_v55 = vld [vmem:[%s11293_s30 + $0x6e0] ss:$8 sps:$4 sm:$0xff]  }
 0x200   :  { %3033 = vmatprep.subr.bf16.mxu1 %v7684_v5  ;;  %v250_v5 = vunpack.c.h.bf16 %v9464_v1 }
 0x201   :  { %v337_v46 = vadd.f32 %v336_v60, %v247_v22  ;;  %v7699_v22 = vld [vmem:[%s11293_s30 + $0x714] ss:$8 sps:$4 sm:$0xff]   ;;  %v6187_v60 = vld [vmem:[%s11276_s2] sm:$0xff]  }
 0x202   :  { %v346_v15 = vadd.f32 %v345_v35, %v250_v5  ;;  %v6202_v5 = vld [vmem:[%s11276_s2 + $0x8] sm:$0xff]   ;;  %v7697_v35 = vld [vmem:[%s11293_s30 + $0x710] ss:$8 sps:$4 sm:$0xff]  }
 0x203   :  { %3034 = vmatpush1.bf16.msra.mxu1 %v7682_v29  ;;  %v297_v29 = vadd.f32 %v296_v18, %v202_v59  ;;  %v9492_v48 = vmul.f32 %v8120_v32, %v337_v46  ;;  %v7700_v46 = vld [vmem:[%s11293_s30 + $0x720] ss:$8 sps:$4 sm:$0xff]  }
 0x204   :  { %3035 = vmatprep.subr.bf16.mxu1 %v7687_v12  ;;  %v289_v12 = vadd.f32 %v288_v45, %v231_v51  ;;  %v9498_v53 = vmul.f32 %v8120_v32, %v346_v15  ;;  %v7702_v51 = vld [vmem:[%s11293_s30 + $0x724] ss:$8 sps:$4 sm:$0xff]   ;;  %v6188_v45 = vunpack.c.l.bf16 %v6187_v60  ;;  %v7705_v15 = vld [vmem:[%s11293_s30 + $0x734] ss:$8 sps:$4 sm:$0xff]  }
 0x205   :  { %v298_v41 = vadd.f32 %v297_v29, %v234_v47  ;;  %v6203_v47 = vld [vmem:[%s11276_s2 + $0x10] sm:$0xff]   ;;  %v6189_v29 = vunpack.c.h.bf16 %v6187_v60 }
 0x206   :  { %v9501_v54 = vmul.f32 %v8118_v25, %v289_v12  ;;  %v6196_v12 = vunpack.c.l.bf16 %v6203_v47 }
 0x207   :  { %3036 = vmatpush1.bf16.msra.mxu1 %v7685_v63  ;;  %v7694_v63 = vld [vmem:[%s11293_s30 + $0x700] ss:$8 sps:$4 sm:$0xff]   ;;  %v9507_v59 = vmul.f32 %v8118_v25, %v298_v41 }
 0x208   :  { %3037 = vmatprep.subr.bf16.mxu1 %v7690_v40  ;;  %v1199_v18 = vpack.c.bf16 %v9492_v48, %v9501_v54 }
 0x209   :  { %v1202_v40 = vpack.c.bf16 %v9498_v53, %v9507_v59 }
 0x20b   :  { %3038 = vmatpush1.bf16.msra.mxu1 %v7688_v55  ;;  %v6192_v55 = vunpack.c.l.bf16 %v6202_v5 }
 0x20c   :  { %3039 = vmatprep.subr.bf16.mxu1 %v7693_v24  ;;  %v6193_v24 = vunpack.c.h.bf16 %v6202_v5  ;;  %v7708_v5 = vld [vmem:[%s11293_s30 + $0x744] ss:$8 sps:$4 sm:$0xff]  }
 0x20d   :  { %v407_v41 = vsel %vm405_vm4, %v6192_v55, 0.0 }
 0x20f   :  { %3040 = vmatpush1.bf16.msra.mxu1 %v7691_v44  ;;  %v406_v44 = vsel %vm405_vm4, %v6188_v45, 0.0 }
 0x210   :  { %3052 = vmatprep.subr.bf16.mxu1 %v7696_v50  ;;  %v6204_v50 = vld [vmem:[%s11276_s2 + $0x18] sm:$0xff]   ;;  %v408_v60 = vadd.f32 %v407_v41, %v406_v44 }
 0x211   :  { %v6201_v55 = vunpack.c.h.bf16 %v6204_v50  ;;  %v7709_v41 = vld [vmem:[%s11293_s30 + $0x750] ss:$8 sps:$4 sm:$0xff]  }
 0x212   :  { %3042 = vmatmul.mubr.bf16.vlgmr.msra.gmra.mrb[0].mxu1 %v1199_v18  ;;  %v413_v18 = vsel %vm405_vm4, %v6189_v29, 0.0  ;;  %v7706_v29 = vld [vmem:[%s11293_s30 + $0x740] ss:$8 sps:$4 sm:$0xff]  }
 0x213   :  { %3053 = vmatpush1.bf16.msra.mxu1 %v7694_v63  ;;  %3084 = vmatprep.mubr.bf16.mxu1 %v1202_v40  ;;  %v6197_v63 = vunpack.c.h.bf16 %v6203_v47  ;;  %v7703_v40 = vld [vmem:[%s11293_s30 + $0x730] ss:$8 sps:$4 sm:$0xff]  }
 0x214   :  { %3054 = vmatprep.subr.bf16.mxu1 %v7699_v22  ;;  %v414_v22 = vsel %vm405_vm4, %v6193_v24, 0.0 }
 0x215   :  { %v415_v45 = vadd.f32 %v414_v22, %v413_v18  ;;  %v416_v47 = vsel %vm405_vm4, %v6197_v63, 0.0  ;;  %v7714_v63 = vld [vmem:[%s11293_s30 + $0x764] ss:$8 sps:$4 sm:$0xff]   ;;  %v422_v18 = vpop.permute.xlu1 %421 }
 0x217   :  { %3055 = vmatpush1.bf16.msra.mxu1 %v7697_v35  ;;  %v6200_v35 = vunpack.c.l.bf16 %v6204_v50  ;;  %v417_v44 = vadd.f32 %v416_v47, %v415_v45 }
 0x218   :  { %3056 = vmatprep.subr.bf16.mxu1 %v7702_v51  ;;  %v409_v51 = vsel %vm405_vm4, %v6196_v12, 0.0  ;;  %v418_v12 = vsel %vm405_vm4, %v6201_v55, 0.0 }
 0x219   :  { %v410_v24 = vadd.f32 %v409_v51, %v408_v60  ;;  %v419_v22 = vadd.f32 %v418_v12, %v417_v44  ;;  %v7717_v51 = vld [vmem:[%s11293_s30 + $0x774] ss:$8 sps:$4 sm:$0xff]   ;;  %v426_v45 = vpop.permute.xlu1 %425  ;;  %v7720_v44 = vld [vmem:[%s11293_s30 + $0x784] ss:$8 sps:$4 sm:$0xff]  }
 0x21b   :  { %3057 = vmatpush1.bf16.msra.mxu1 %v7700_v46  ;;  %v7711_v46 = vld [vmem:[%s11293_s30 + $0x754] ss:$8 sps:$4 sm:$0xff]   ;;  %v9580_v55 = vmul.f32 %v426_v45, %v419_v22 }
 0x21c   :  { %3058 = vmatprep.subr.bf16.mxu1 %v7705_v15  ;;  %v411_v15 = vsel %vm405_vm4, %v6200_v35, 0.0  ;;  %v3251_v35 = vld [vmem:[%s11277_s11 + $0x8] sm:$0xff] }
 0x21d   :  { %v412_v50 = vadd.f32 %v411_v15, %v410_v24  ;;  %v3253_v15 = vld [vmem:[%s11277_s11 + $0x18] sm:$0xff] }
 0x21f   :  { %3059 = vmatpush1.bf16.msra.mxu1 %v7703_v40  ;;  %v7712_v40 = vld [vmem:[%s11293_s30 + $0x760] ss:$8 sps:$4 sm:$0xff]   ;;  %v9569_v60 = vmul.f32 %v422_v18, %v412_v50  ;;  %v7723_v18 = vld [vmem:[%s11293_s30 + $0x794] ss:$8 sps:$4 sm:$0xff]  }
 0x220   :  { %3060 = vmatprep.subr.bf16.mxu1 %v7708_v5  ;;  %v3250_v5 = vld [vmem:[%s11277_s11] sm:$0xff] }
 0x221   :  { %v6632_v47 = vpack.c.bf16 %v3251_v35, %v3250_v5  ;;  %v3099_v24 = vpack.c.bf16 %v9580_v55, %v9569_v60  ;;  %v3254_v50 = vld [vmem:[%s11277_s11 + $0x20] sm:$0xff]  ;;  %v3256_v5 = vld [vmem:[%s11277_s11 + $0x30] sm:$0xff]  ;;  %v3257_v35 = vld [vmem:[%s11277_s11 + $0x38] sm:$0xff] }
 0x222   :  { %v6641_v45 = vpack.c.bf16 %v3257_v35, %v3256_v5  ;;  %v7730_v35 = vld [vmem:[%s11293_s30 + $0x7c0] ss:$8 sps:$4 sm:$0xff]  }
 0x223   :  { %3061 = vmatpush1.bf16.msra.mxu1 %v7706_v29  ;;  %v7715_v29 = vld [vmem:[%s11293_s30 + $0x770] ss:$8 sps:$4 sm:$0xff]   ;;  %6163 = vmatmul.mubr.msk.bf16.vlgmr.msra.gmra.mrb[4].mxu0 %vm405_vm4, %v3099_v24  ;;  %v3259_v24 = vld [vmem:[%s11277_s11 + $0x48] sm:$0xff] }
 0x224   :  { %3062 = vmatprep.subr.bf16.mxu1 %v7711_v46  ;;  %v3252_v46 = vld [vmem:[%s11277_s11 + $0x10] sm:$0xff]  ;;  %6633 = vmatpush1.bf16.msra.mxu0 %v6632_v47  ;;  %v7724_v47 = vld [vmem:[%s11293_s30 + $0x7a0] ss:$8 sps:$4 sm:$0xff]  }
 0x225   :  { %v6635_v12 = vpack.c.bf16 %v3253_v15, %v3252_v46  ;;  %6634 = vmatprep.subr.bf16.mxu0 %v7843_v31  ;;  %v7729_v46 = vld [vmem:[%s11293_s30 + $0x7b4] ss:$8 sps:$4 sm:$0xff]  }
 0x227   :  { %3063 = vmatpush1.bf16.msra.mxu1 %v7709_v41  ;;  %v7718_v41 = vld [vmem:[%s11293_s30 + $0x780] ss:$8 sps:$4 sm:$0xff]  }
 0x228   :  { %3064 = vmatprep.subr.bf16.mxu1 %v7714_v63  ;;  %v3255_v63 = vld [vmem:[%s11277_s11 + $0x28] sm:$0xff]  ;;  %6636 = vmatpush1.bf16.msra.mxu0 %v6635_v12  ;;  %v3260_v12 = vld [vmem:[%s11277_s11 + $0x50] sm:$0xff] }
 0x229   :  { %v6638_v22 = vpack.c.bf16 %v3255_v63, %v3254_v50  ;;  %6637 = vmatprep.subr.bf16.mxu0 %v7843_v31  ;;  %v153_v50 = vunpack.c.l.bf16 %v9411_v9  ;;  %v185_v63 = vunpack.c.l.bf16 %v9416_v39  ;;  %v3262_v9 = vld [vmem:[%s11277_s11 + $0x60] sm:$0xff]  ;;  %v3263_v39 = vld [vmem:[%s11277_s11 + $0x68] sm:$0xff] }
 0x22b   :  { %3065 = vmatpush1.bf16.msra.mxu1 %v7712_v40  ;;  %v7721_v40 = vld [vmem:[%s11293_s30 + $0x790] ss:$8 sps:$4 sm:$0xff]  }
 0x22c   :  { %3066 = vmatprep.subr.bf16.mxu1 %v7717_v51  ;;  %v7726_v51 = vld [vmem:[%s11293_s30 + $0x7a4] ss:$8 sps:$4 sm:$0xff]   ;;  %6639 = vmatpush1.bf16.msra.mxu0 %v6638_v22  ;;  %v137_v22 = vunpack.c.l.bf16 %v9429_v20  ;;  %v217_v20 = vunpack.c.l.bf16 %v9443_v23  ;;  %v3264_v23 = vld [vmem:[%s11277_s11 + $0x70] sm:$0xff] }
 0x22d   :  { %6640 = vmatprep.subr.bf16.mxu0 %v7843_v31 }
 0x22f   :  { %3067 = vmatpush1.bf16.msra.mxu1 %v7715_v29  ;;  %v3258_v29 = vld [vmem:[%s11277_s11 + $0x40] sm:$0xff] }
 0x230   :  { %3068 = vmatprep.subr.bf16.mxu1 %v7720_v44  ;;  %6642 = vmatpush1.bf16.msra.mxu0 %v6641_v45  ;;  %v6644_v15 = vpack.c.bf16 %v3259_v24, %v3258_v29  ;;  %v7727_v44 = vld [vmem:[%s11293_s30 + $0x7b0] ss:$8 sps:$4 sm:$0xff]   ;;  %v201_v45 = vunpack.c.l.bf16 %v9457_v61  ;;  %v6650_v29 = vpack.c.bf16 %v3263_v39, %v3262_v9  ;;  %v249_v61 = vunpack.c.l.bf16 %v9464_v1  ;;  %v3266_v1 = vld [vmem:[%s11277_s11 + $0x80] sm:$0xff] }
 0x231   :  { %6643 = vmatprep.subr.bf16.mxu0 %v7843_v31  ;;  %v7733_v24 = vld [vmem:[%s11293_s30 + $0x7d0] ss:$8 sps:$4 sm:$0xff]  }
 0x233   :  { %3069 = vmatpush1.bf16.msra.mxu1 %v7718_v41  ;;  %v3261_v41 = vld [vmem:[%s11277_s11 + $0x58] sm:$0xff] }
 0x234   :  { %3070 = vmatprep.subr.bf16.mxu1 %v7723_v18  ;;  %v7732_v18 = vld [vmem:[%s11293_s30 + $0x7c4] ss:$8 sps:$4 sm:$0xff]   ;;  %6645 = vmatpush1.bf16.msra.mxu0 %v6644_v15  ;;  %v6647_v5 = vpack.c.bf16 %v3261_v41, %v3260_v12  ;;  %v233_v12 = vunpack.c.l.bf16 %v9477_v27  ;;  %v7741_v27 = vld [vmem:[%s11293_s30 + $0x7f4] ss:$8 sps:$4 sm:$0xff]  }
 0x235   :  { %6646 = vmatprep.subr.bf16.mxu0 %v7843_v31  ;;  %v7738_v15 = vld [vmem:[%s11293_s30 + $0x7e4] ss:$8 sps:$4 sm:$0xff]  }
 0x237   :  { %3071 = vmatpush1.bf16.msra.mxu1 %v7721_v40  ;;  %v169_v40 = vunpack.c.l.bf16 %v9434_v0  ;;  %v7735_v0 = vld [vmem:[%s11293_s30 + $0x7d4] ss:$8 sps:$4 sm:$0xff]  }
 0x238   :  { %3072 = vmatprep.subr.bf16.mxu1 %v7726_v51  ;;  %v341_v51 = vadd.f32 %v185_v63, %v153_v50  ;;  %6648 = vmatpush1.bf16.msra.mxu0 %v6647_v5  ;;  %v7736_v63 = vld [vmem:[%s11293_s30 + $0x7e0] ss:$8 sps:$4 sm:$0xff]  }
 0x239   :  { %6649 = vmatprep.subr.bf16.mxu0 %v7843_v31 }
 0x23b   :  { %3073 = vmatpush1.bf16.msra.mxu1 %v7724_v47  ;;  %v293_v47 = vadd.f32 %v169_v40, %v137_v22 }
 0x23c   :  { %3074 = vmatprep.subr.bf16.mxu1 %v7729_v46  ;;  %v3265_v46 = vld [vmem:[%s11277_s11 + $0x78] sm:$0xff]  ;;  %6651 = vmatpush1.bf16.msra.mxu0 %v6650_v29 }
 0x23d   :  { %v294_v41 = vadd.f32 %v293_v47, %v201_v45  ;;  %v6653_v50 = vpack.c.bf16 %v3265_v46, %v3264_v23  ;;  %6652 = vmatprep.subr.bf16.mxu0 %v7843_v31  ;;  %v3269_v29 = vld [vmem:[%s11277_s11 + $0x98] sm:$0xff]  ;;  %v3270_v23 = vld [vmem:[%s11277_s11 + $0xa0] sm:$0xff]  ;;  %v3271_v46 = vld [vmem:[%s11277_s11 + $0xa8] sm:$0xff] }
 0x23f   :  { %3075 = vmatpush1.bf16.msra.mxu1 %v7727_v44  ;;  %v342_v44 = vadd.f32 %v341_v51, %v217_v20  ;;  %v295_v40 = vadd.f32 %v294_v41, %v233_v12  ;;  %v3274_v41 = vld [vmem:[%s11277_s11 + $0xc0] sm:$0xff] }
 0x240   :  { %3076 = vmatprep.subr.bf16.mxu1 %v7732_v18  ;;  %v3267_v18 = vld [vmem:[%s11277_s11 + $0x88] sm:$0xff]  ;;  %6654 = vmatpush1.bf16.msra.mxu0 %v6653_v50 }
 0x241   :  { %v343_v22 = vadd.f32 %v342_v44, %v249_v61  ;;  %v6656_v5 = vpack.c.bf16 %v3267_v18, %v3266_v1  ;;  %6655 = vmatprep.subr.bf16.mxu0 %v7843_v31  ;;  %v9704_v39 = vmul.f32 %v8118_v25, %v295_v40  ;;  %v3268_v25 = vld [vmem:[%s11277_s11 + $0x90] sm:$0xff]  ;;  %v6662_v61 = vpack.c.bf16 %v3271_v46, %v3270_v23  ;;  %v3273_v44 = vld [vmem:[%s11277_s11 + $0xb8] sm:$0xff] }
 0x242   :  { %v9758_v40 = vsub.s32 1, %v9341_v17 }
 0x243   :  { %3077 = vmatpush1.bf16.msra.mxu1 %v7730_v35  ;;  %v7739_v35 = vld [vmem:[%s11293_s30 + $0x7f0] ss:$8 sps:$4 sm:$0xff]   ;;  %v9701_v9 = vmul.f32 %v8120_v32, %v343_v22  ;;  %v9755_v22 = vsub.s32 0, %v9341_v17 }
 0x244   :  { %3078 = vmatprep.subr.bf16.mxu1 %v7735_v0  ;;  %6657 = vmatpush1.bf16.msra.mxu0 %v6656_v5  ;;  %v7844_v0 = vmov 0.0  }
 0x245   :  { %6658 = vmatprep.subr.bf16.mxu0 %v7843_v31  ;;  %v1201_v20 = vpack.c.bf16 %v9701_v9, %v9704_v39 }
 0x247   :  { %3079 = vmatpush1.bf16.msra.mxu1 %v7733_v24  ;;  %v6659_v24 = vpack.c.bf16 %v3269_v29, %v3268_v25  ;;  %v9769_v29 = vrot.slane %v9765_v10, %v9758_v40 }
 0x248   :  { %3080 = vmatprep.subr.bf16.mxu1 %v7738_v15  ;;  %v3272_v15 = vld [vmem:[%s11277_s11 + $0xb0] sm:$0xff] }
 0x249   :  { %6660 = vmatpush1.bf16.msra.mxu0 %v6659_v24  ;;  %v6665_v12 = vpack.c.bf16 %v3273_v44, %v3272_v15  ;;  %v3225_v44 = vld [vmem:[%s11280_s10] sm:$0xff] }
 0x24a   :  { %6661 = vmatprep.subr.bf16.mxu0 %v7843_v31 }
 0x24b   :  { %3081 = vmatpush1.bf16.msra.mxu1 %v7736_v63  ;;  %v9710_v51 = vpop.f32.mrb[0].mxu0 }
 0x24c   :  { %3082 = vmatprep.subr.bf16.mxu1 %v7741_v27  ;;  %v1176_v45 = vpop.f32.mrb[1].mxu0  ;;  %v1459_v27 = vld [vmem:[%s11278_s7] sm:$0x3] }
 0x24d   :  { %v9712_v47 = vpop.f32.mrb[2].mxu0  ;;  %6663 = vmatpush1.bf16.msra.mxu0 %v6662_v61  ;;  %v1464_v5 = vrot.slane %v1459_v27, %v9755_v22  ;;  %v7151_v15 = vadd.f32 %v1176_v45, %v9769_v29  ;;  %v3228_v45 = vld [vmem:[%s11280_s10 + $0x18] sm:$0xff] }
 0x24e   :  { %v9714_v32 = vpop.f32.mrb[3].mxu0  ;;  %6664 = vmatprep.subr.bf16.mxu0 %v7843_v31 }
 0x24f   :  { %3083 = vmatpush1.bf16.msra.mxu1 %v7739_v35  ;;  %v1468_v35 = vrot.slane %v1459_v27, %v9758_v40 }
 0x251   :  { %6666 = vmatpush1.bf16.msra.mxu0 %v6665_v12  ;;  %v3226_v12 = vld [vmem:[%s11280_s10 + $0x8] sm:$0xff] }
 0x252   :  { %3085 = vmatmul.mubr.bf16.vlgmr.msra.gmra.mrb[0].mxu1 %v1201_v20  ;;  %3330 = vmatprep.subr.mxu0 %v7844_v0 }
 0x253   :  { %3737 = vmatprep.mubr.f32.mxu1 %v7844_v0 }
 0x255   :  { %3331 = vmatpush1.msra.mxu0 %v3274_v41  ;;  %v6668_v41 = vpack.c.bf16 %v3226_v12, %v3225_v44  ;;  %v3233_v12 = vld [vmem:[%s11280_s10 + $0x40] sm:$0xff] }
 0x256   :  { %6667 = vmatprep.subr.bf16.mxu0 %v7843_v31 }
 0x2f6   :  { %v9741_v50 = vpop.f32.mrb[4].mxu0 }
 0x2f7   :  { %v9743_v63 = vpop.f32.mrb[5].mxu0 }
 0x2f8   :  { %v9745_v1 = vpop.f32.mrb[6].mxu0 }
 0x2f9   :  { %v9747_v18 = vpop.f32.mrb[7].mxu0 }
 0x325   :  { %v3086_v28 = vpop.f32.mrb[0].mxu1 }
 0x326   :  { %v7154_v20 = vadd.f32 %v3086_v28, %v1464_v5  ;;  %v3088_v25 = vpop.f32.mrb[1].mxu1 }
 0x327   :  { %v7155_v24 = vadd.f32 %v3088_v25, %v1468_v35  ;;  %v3090_v23 = vpop.f32.mrb[2].mxu1  ;;  %v3229_v25 = vld [vmem:[%s11280_s10 + $0x20] sm:$0xff] }
 0x328   :  { %v3092_v17 = vpop.f32.mrb[3].mxu1  ;;  %v7156_v61 = vadd.f32 %v3090_v23, %v1464_v5  ;;  %v3227_v5 = vld [vmem:[%s11280_s10 + $0x10] sm:$0xff] }
 0x329   :  { %7755 = vtanh.f32 %v7155_v24  ;;  %v7157_v46 = vadd.f32 %v3092_v17, %v1468_v35  ;;  %v3230_v24 = vld [vmem:[%s11280_s10 + $0x28] sm:$0xff] }
 0x32a   :  { %7757 = vtanh.f32 %v7154_v20  ;;  %v6671_v20 = vpack.c.bf16 %v3228_v45, %v3227_v5  ;;  %v3235_v5 = vld [vmem:[%s11280_s10 + $0x50] sm:$0xff]  ;;  %v3236_v45 = vld [vmem:[%s11280_s10 + $0x58] sm:$0xff] }
 0x32b   :  { %7759 = vtanh.f32 %v7157_v46  ;;  %v6674_v46 = vpack.c.bf16 %v3230_v24, %v3229_v25  ;;  %v3239_v24 = vld [vmem:[%s11280_s10 + $0x70] sm:$0xff] }
 0x32c   :  { %7761 = vtanh.f32 %v7156_v61  ;;  %v3231_v61 = vld [vmem:[%s11280_s10 + $0x30] sm:$0xff] }
 0x32d   :  { %7763 = vtanh.f32 %v7151_v15  ;;  %v3232_v15 = vld [vmem:[%s11280_s10 + $0x38] sm:$0xff] }
 0x32e   :  { %v6677_v44 = vpack.c.bf16 %v3232_v15, %v3231_v61  ;;  %v3242_v61 = vld [vmem:[%s11280_s10 + $0x88] sm:$0xff] }
 0x333   :  { %v7756_v27 = vpop.eup %7755 }
 0x334   :  { %v7758_v35 = vpop.eup %7757  ;;  %6164 = vmatprep.mubr.msk.f32.mxu0 %vm3275_vm5, %v7756_v27 }
 0x335   :  { %v7760_v28 = vpop.eup %7759  ;;  %3347 = vmatmul.mubr.f32.vlgmr.msra.gmra.mrb[8].mxu0 %v7758_v35  ;;  %v6683_v35 = vpack.c.bf16 %v3236_v45, %v3235_v5  ;;  %v3245_v45 = vld [vmem:[%s11280_s10 + $0xa0] sm:$0xff] }
 0x336   :  { %6669 = vmatpush1.bf16.msra.mxu0 %v6668_v41  ;;  %6165 = vmatprep.mubr.msk.f32.mxu0 %vm3275_vm5, %v7760_v28  ;;  %v7762_v23 = vpop.eup %7761  ;;  %v3234_v41 = vld [vmem:[%s11280_s10 + $0x48] sm:$0xff]  ;;  %v3237_v28 = vld [vmem:[%s11280_s10 + $0x60] sm:$0xff] }
 0x337   :  { %6670 = vmatprep.subr.bf16.mxu0 %v7843_v31  ;;  %v7764_v17 = vpop.eup %7763  ;;  %v6680_v27 = vpack.c.bf16 %v3234_v41, %v3233_v12  ;;  %v3244_v12 = vld [vmem:[%s11280_s10 + $0x98] sm:$0xff]  ;;  %v537_v41 = vrot.slane %v9765_v10, %v9755_v22 }
 0x339   :  { %3352 = vmatmul.mubr.f32.gmra.mrb[10].mxu0 %v7762_v23  ;;  %v3240_v23 = vld [vmem:[%s11280_s10 + $0x78] sm:$0xff] }
 0x33a   :  { %6672 = vmatpush1.bf16.msra.mxu0 %v6671_v20  ;;  %6166 = vmatprep.mubr.msk.f32.mxu0 %vm3275_vm5, %v7764_v17  ;;  %v3238_v20 = vld [vmem:[%s11280_s10 + $0x68] sm:$0xff]  ;;  %v6689_v17 = vpack.c.bf16 %v3240_v23, %v3239_v24  ;;  %v3247_v24 = vld [vmem:[%s11280_s10 + $0xb0] sm:$0xff]  ;;  %v3248_v23 = vld [vmem:[%s11280_s10 + $0xb8] sm:$0xff] }
 0x33b   :  { %6673 = vmatprep.subr.bf16.mxu0 %v7843_v31  ;;  %v6686_v25 = vpack.c.bf16 %v3238_v20, %v3237_v28  ;;  %v7150_v28 = vadd.f32 %v9710_v51, %v537_v41  ;;  %v7153_v20 = vadd.f32 %v9714_v32, %v9769_v29  ;;  %v7152_v51 = vadd.f32 %v9712_v47, %v537_v41  ;;  %v3438_v29 = vld [vmem:[%s11282_s12] sm:$0xff] }
 0x33c   :  { %v6701_v32 = vpack.c.bf16 %v3248_v23, %v3247_v24  ;;  %v3249_v47 = vld [vmem:[%s11280_s10 + $0xc0] sm:$0xff] }
 0x33d   :  { %7765 = vtanh.f32 %v7150_v28  ;;  %v3446_v23 = vld [vmem:[%s11282_s12 + $0x40] sm:$0xff] }
 0x33e   :  { %6675 = vmatpush1.bf16.msra.mxu0 %v6674_v46  ;;  %v3241_v46 = vld [vmem:[%s11280_s10 + $0x80] sm:$0xff]  ;;  %7767 = vtanh.f32 %v7153_v20  ;;  %v3444_v20 = vld [vmem:[%s11282_s12 + $0x30] sm:$0xff] }
 0x33f   :  { %6676 = vmatprep.subr.bf16.mxu0 %v7843_v31  ;;  %v6692_v15 = vpack.c.bf16 %v3242_v61, %v3241_v46  ;;  %v3440_v46 = vld [vmem:[%s11282_s12 + $0x10] sm:$0xff]  ;;  %v3441_v61 = vld [vmem:[%s11282_s12 + $0x18] sm:$0xff] }
 0x342   :  { %6678 = vmatpush1.bf16.msra.mxu0 %v6677_v44  ;;  %v3243_v44 = vld [vmem:[%s11280_s10 + $0x90] sm:$0xff] }
 0x343   :  { %6679 = vmatprep.subr.bf16.mxu0 %v7843_v31  ;;  %v6695_v5 = vpack.c.bf16 %v3244_v12, %v3243_v44  ;;  %v6707_v12 = vpack.c.bf16 %v3441_v61, %v3440_v46  ;;  %v3452_v61 = vld [vmem:[%s11282_s12 + $0x70] sm:$0xff] }
 0x346   :  { %6681 = vmatpush1.bf16.msra.mxu0 %v6680_v27  ;;  %v9848_v27 = vld [vmem:[%s11281_s9] sm:$0x3] }
 0x347   :  { %6682 = vmatprep.subr.bf16.mxu0 %v7843_v31  ;;  %v9859_v10 = vrot.slane %v9848_v27, %v9758_v40 }
 0x349   :  { %v3215_v40 = vadd.f32 %v9743_v63, %v9859_v10 }
 0x34a   :  { %6684 = vmatpush1.bf16.msra.mxu0 %v6683_v35  ;;  %v3246_v35 = vld [vmem:[%s11280_s10 + $0xa8] sm:$0xff] }
 0x34b   :  { %6685 = vmatprep.subr.bf16.mxu0 %v7843_v31  ;;  %7769 = vtanh.f32 %v3215_v40  ;;  %v3447_v40 = vld [vmem:[%s11282_s12 + $0x48] sm:$0xff] }
 0x34c   :  { %7771 = vtanh.f32 %v7152_v51  ;;  %v6716_v51 = vpack.c.bf16 %v3447_v40, %v3446_v23  ;;  %v3219_v40 = vadd.f32 %v9747_v18, %v9859_v10  ;;  %v3462_v18 = vld [vmem:[%s11282_s12 + $0xc0] sm:$0xff] }
 0x34e   :  { %6687 = vmatpush1.bf16.msra.mxu0 %v6686_v25  ;;  %v6698_v25 = vpack.c.bf16 %v3246_v35, %v3245_v45  ;;  %v3443_v45 = vld [vmem:[%s11282_s12 + $0x28] sm:$0xff] }
 0x34f   :  { %6688 = vmatprep.subr.bf16.mxu0 %v7843_v31 }
 0x352   :  { %6690 = vmatpush1.bf16.msra.mxu0 %v6689_v17  ;;  %v3439_v17 = vld [vmem:[%s11282_s12 + $0x8] sm:$0xff] }
 0x353   :  { %6691 = vmatprep.subr.bf16.mxu0 %v7843_v31  ;;  %v6704_v63 = vpack.c.bf16 %v3439_v17, %v3438_v29  ;;  %v3449_v29 = vld [vmem:[%s11282_s12 + $0x58] sm:$0xff] }
 0x356   :  { %6693 = vmatpush1.bf16.msra.mxu0 %v6692_v15  ;;  %v7766_v15 = vpop.eup %7765 }
 0x357   :  { %6694 = vmatprep.subr.bf16.mxu0 %v7843_v31  ;;  %v7768_v44 = vpop.eup %7767 }
 0x358   :  { %v7770_v41 = vpop.eup %7769 }
 0x359   :  { %v7772_v35 = vpop.eup %7771 }
 0x35a   :  { %6696 = vmatpush1.bf16.msra.mxu0 %v6695_v5  ;;  %v3442_v5 = vld [vmem:[%s11282_s12 + $0x20] sm:$0xff] }
 0x35b   :  { %6697 = vmatprep.subr.bf16.mxu0 %v7843_v31  ;;  %v6710_v28 = vpack.c.bf16 %v3443_v45, %v3442_v5  ;;  %v3456_v45 = vld [vmem:[%s11282_s12 + $0x90] sm:$0xff] }
 0x35e   :  { %6699 = vmatpush1.bf16.msra.mxu0 %v6698_v25  ;;  %v3445_v25 = vld [vmem:[%s11282_s12 + $0x38] sm:$0xff] }
 0x35f   :  { %6700 = vmatprep.subr.bf16.mxu0 %v7843_v31  ;;  %v6713_v24 = vpack.c.bf16 %v3445_v25, %v3444_v20  ;;  %v3458_v25 = vld [vmem:[%s11282_s12 + $0xa0] sm:$0xff] }
 0x362   :  { %6702 = vmatpush1.bf16.msra.mxu0 %v6701_v32  ;;  %v3448_v32 = vld [vmem:[%s11282_s12 + $0x50] sm:$0xff] }
 0x363   :  { %3411 = vmatprep.subr.mxu0 %v7844_v0  ;;  %v6719_v17 = vpack.c.bf16 %v3449_v29, %v3448_v32 }
 0x366   :  { %3412 = vmatpush1.msra.mxu0 %v3249_v47  ;;  %v3450_v47 = vld [vmem:[%s11282_s12 + $0x60] sm:$0xff] }
 0x367   :  { %3428 = vmatmul.mubr.f32.vlgmr.msra.gmra.mrb[12].mxu0 %v7766_v15  ;;  %6703 = vmatprep.subr.bf16.mxu0 %v7843_v31  ;;  %v3453_v15 = vld [vmem:[%s11282_s12 + $0x78] sm:$0xff] }
 0x368   :  { %6167 = vmatprep.mubr.msk.f32.mxu0 %vm3275_vm5, %v7768_v44  ;;  %6705 = vmatpush1.bf16.msra.mxu0 %v6704_v63  ;;  %v3451_v63 = vld [vmem:[%s11282_s12 + $0x68] sm:$0xff]  ;;  %v6725_v44 = vpack.c.bf16 %v3453_v15, %v3452_v61 }
 0x369   :  { %6706 = vmatprep.subr.bf16.mxu0 %v7843_v31  ;;  %v6722_v46 = vpack.c.bf16 %v3451_v63, %v3450_v47 }
 0x36b   :  { %3433 = vmatmul.mubr.f32.gmra.mrb[14].mxu0 %v7772_v35  ;;  %v3457_v35 = vld [vmem:[%s11282_s12 + $0x98] sm:$0xff] }
 0x36c   :  { %6708 = vmatpush1.bf16.msra.mxu0 %v6707_v12  ;;  %6168 = vmatprep.mubr.msk.f32.mxu0 %vm3275_vm5, %v7770_v41  ;;  %v3454_v12 = vld [vmem:[%s11282_s12 + $0x80] sm:$0xff]  ;;  %v3455_v41 = vld [vmem:[%s11282_s12 + $0x88] sm:$0xff]  ;;  %v6731_v20 = vpack.c.bf16 %v3457_v35, %v3456_v45 }
 0x36d   :  { %6709 = vmatprep.subr.bf16.mxu0 %v7843_v31  ;;  %v6728_v5 = vpack.c.bf16 %v3455_v41, %v3454_v12  ;;  %v6170_v35 = vld [vmem:[%s11283_s13] ss:$0 sm:$0xff] }
 0x370   :  { %6711 = vmatpush1.bf16.msra.mxu0 %v6710_v28  ;;  %v3114_v28 = vrot.slane %v9848_v27, %v9755_v22  ;;  %v3460_v22 = vld [vmem:[%s11282_s12 + $0xb0] sm:$0xff]  ;;  %v3461_v27 = vld [vmem:[%s11282_s12 + $0xb8] sm:$0xff] }
 0x371   :  { %6712 = vmatprep.subr.bf16.mxu0 %v7843_v31 }
 0x372   :  { %v3213_v23 = vadd.f32 %v9741_v50, %v3114_v28  ;;  %v3217_v32 = vadd.f32 %v9745_v1, %v3114_v28  ;;  %v6737_v50 = vpack.c.bf16 %v3461_v27, %v3460_v22 }
 0x374   :  { %6714 = vmatpush1.bf16.msra.mxu0 %v6713_v24  ;;  %v3459_v24 = vld [vmem:[%s11282_s12 + $0xa8] sm:$0xff]  ;;  %7773 = vtanh.f32 %v3213_v23  ;;  %v3558_v23 = vpop.permute.xlu0 %3557 }
 0x375   :  { %6715 = vmatprep.subr.bf16.mxu0 %v7843_v31  ;;  %7775 = vtanh.f32 %v3219_v40 }
 0x376   :  { %7777 = vtanh.f32 %v3217_v32 }
 0x378   :  { %6717 = vmatpush1.bf16.msra.mxu0 %v6716_v51  ;;  %v6734_v51 = vpack.c.bf16 %v3459_v24, %v3458_v25 }
 0x379   :  { %6718 = vmatprep.subr.bf16.mxu0 %v7843_v31 }
 0x37c   :  { %6720 = vmatpush1.bf16.msra.mxu0 %v6719_v17 }
 0x37d   :  { %6721 = vmatprep.subr.bf16.mxu0 %v7843_v31 }
 0x37e   :  { %v7774_v10 = vpop.eup %7773 }
 0x37f   :  { %v7776_v29 = vpop.eup %7775 }
 0x380   :  { %6723 = vmatpush1.bf16.msra.mxu0 %v6722_v46  ;;  %v7778_v1 = vpop.eup %7777 }
 0x381   :  { %6724 = vmatprep.subr.bf16.mxu0 %v7843_v31 }
 0x384   :  { %6726 = vmatpush1.bf16.msra.mxu0 %v6725_v44 }
 0x385   :  { %6727 = vmatprep.subr.bf16.mxu0 %v7843_v31 }
 0x388   :  { %6729 = vmatpush1.bf16.msra.mxu0 %v6728_v5 }
 0x389   :  { %6730 = vmatprep.subr.bf16.mxu0 %v7843_v31 }
 0x38c   :  { %6732 = vmatpush1.bf16.msra.mxu0 %v6731_v20 }
 0x38d   :  { %6733 = vmatprep.subr.bf16.mxu0 %v7843_v31 }
 0x390   :  { %6735 = vmatpush1.bf16.msra.mxu0 %v6734_v51 }
 0x391   :  { %6736 = vmatprep.subr.bf16.mxu0 %v7843_v31 }
 0x394   :  { %6738 = vmatpush1.bf16.msra.mxu0 %v6737_v50  ;;  %v3560_v50 = vpop.permute.xlu1 %3559 }
 0x395   :  { %3517 = vmatprep.subr.mxu0 %v7844_v0 }
 0x398   :  { %3518 = vmatpush1.msra.mxu0 %v3462_v18 }
 0x399   :  { %3534 = vmatmul.mubr.f32.vlgmr.msra.gmra.mrb[16].mxu0 %v7774_v10 }
 0x39a   :  { %6169 = vmatprep.mubr.msk.f32.mxu0 %vm3275_vm5, %v7776_v29  ;;  %v7848_v29 = vmov 2  }
 0x39b   :  { %7205 = vset.pattern.permute.xlu0 %v7848_v29  ;;  %7206 = vset.pattern.permute.xlu1 %v7848_v29 }
 0x39d   :  { %3539 = vmatmul.mubr.f32.gmra.mrb[18].mxu0 %v7778_v1 }
 0x39e   :  { %3808 = vmatprep.mubr.f32.mxu0 %v7844_v0 }
 0x408   :  { %v3348_v17 = vpop.f32.mrb[8].mxu0 }
 0x409   :  { %v3350_v47 = vpop.f32.mrb[9].mxu0 }
 0x40c   :  { %v3353_v63 = vpop.f32.mrb[10].mxu0 }
 0x40d   :  { %v3355_v46 = vpop.f32.mrb[11].mxu0 }
 0x43a   :  { %v3429_v61 = vpop.f32.mrb[12].mxu0 }
 0x43b   :  { %v3430_v15 = vadd.f32 %v3429_v61, %v3348_v17  ;;  %v3431_v44 = vpop.f32.mrb[13].mxu0 }
 0x43e   :  { %v3434_v12 = vpop.f32.mrb[14].mxu0 }
 0x43f   :  { %v3435_v41 = vadd.f32 %v3434_v12, %v3353_v63  ;;  %v3436_v5 = vpop.f32.mrb[15].mxu0 }
 0x46c   :  { %v3535_v45 = vpop.f32.mrb[16].mxu0 }
 0x46d   :  { %v3544_v28 = vadd.f32 %v3535_v45, %v3430_v15  ;;  %v3537_v20 = vpop.f32.mrb[17].mxu0 }
 0x46f   :  { %v3553_v25 = vadd.f32 %v6170_v35, %v3544_v28 }
 0x470   :  { %v3540_v24 = vpop.f32.mrb[18].mxu0 }
 0x471   :  { %v3545_v40 = vadd.f32 %v3540_v24, %v3435_v41  ;;  %v3542_v51 = vpop.f32.mrb[19].mxu0  ;;  %v3555_v22 = vmax.f32 %v3553_v25, 0.0 }
 0x473   :  { %v3554_v27 = vadd.f32 %v6170_v35, %v3545_v40  ;;  %v3563_v32 = vmul.f32 %v3558_v23, %v3555_v22 }
 0x475   :  { %3567 = vrot.lane.b32.xlu0 %v3563_v32, %s7846_s8  ;;  %v3556_v18 = vmax.f32 %v3554_v27, 0.0 }
 0x477   :  { %v3564_v10 = vmul.f32 %v3560_v50, %v3556_v18 }
 0x479   :  { %3569 = vrot.lane.b32.xlu1 %v3564_v10, %s7846_s8  ;;  %3575 = vrot.lane.b32.xlu0 %v3563_v32, %s7847_s4 }
 0x47d   :  { %3577 = vrot.lane.b32.xlu1 %v3564_v10, %s7847_s4 }
 0x4e7   :  { %v3568_v1 = vpop.permute.xlu0 %3567 }
 0x4e8   :  { %v3573_v17 = vadd.f32 %v3568_v1, %v3553_v25 }
 0x4eb   :  { %v3570_v47 = vpop.permute.xlu1 %3569  ;;  %v3576_v63 = vpop.permute.xlu0 %3575 }
 0x4ec   :  { %v3581_v46 = vadd.f32 %v3576_v63, %v3573_v17  ;;  %v3574_v61 = vadd.f32 %v3570_v47, %v3554_v27 }
 0x4ee   :  { %v3583_v15 = vadd.f32 %v3581_v46, %v3558_v23 }
 0x4ef   :  { %v3578_v44 = vpop.permute.xlu1 %3577 }
 0x4f0   :  { %v3586_v12 = vsel %vm3585_vm6, %v3583_v15, -inf  ;;  %v3582_v41 = vadd.f32 %v3578_v44, %v3574_v61 }
 0x4f1   :  { %v3587_v5 = vrot.slane %v3586_v12, 4 }
 0x4f2   :  { %v3584_v45 = vadd.f32 %v3582_v41, %v3560_v50 }
 0x4f3   :  { %v3588_v35 = vmax.f32 %v3586_v12, %v3587_v5 }
 0x4f4   :  { %v3593_v28 = vsel %vm3585_vm6, %v3584_v45, -inf }
 0x4f5   :  { %v3589_v20 = vrot.slane %v3588_v35, 2  ;;  %v3594_v24 = vrot.slane %v3593_v28, 4 }
 0x4f7   :  { %v3590_v40 = vmax.f32 %v3588_v35, %v3589_v20  ;;  %v3595_v51 = vmax.f32 %v3593_v28, %v3594_v24 }
 0x4f9   :  { %v3591_v25 = vrot.slane %v3590_v40, 1  ;;  %v3596_v22 = vrot.slane %v3595_v51, 2 }
 0x4fb   :  { %v3592_v32 = vmax.f32 %v3590_v40, %v3591_v25  ;;  %v3597_v18 = vmax.f32 %v3595_v51, %v3596_v22 }
 0x4fd   :  { %v3600_v10 = vsub.f32 %v3583_v15, %v3592_v32  ;;  %v3598_v27 = vrot.slane %v3597_v18, 1 }
 0x4ff   :  { %v3602_v23 = vmul.f32 1.442695, %v3600_v10  ;;  %v3599_v29 = vmax.f32 %v3597_v18, %v3598_v27  ;;  %v7835_v18 = vld [vmem:[%s11275_s0] sm:$0xff] }
 0x500   :  { %v3635_v10 = vunpack.c.l.bf16 %v7835_v18  ;;  %v3636_v27 = vunpack.c.h.bf16 %v7835_v18 }
 0x501   :  { %7779 = vpow2.f32 %v3602_v23  ;;  %v3601_v1 = vsub.f32 %v3584_v45, %v3599_v29  ;;  %v7836_v23 = vld [vmem:[%s11275_s0 + $0x8] sm:$0xff] }
 0x502   :  { %v3638_v29 = vunpack.c.h.bf16 %v7836_v23 }
 0x503   :  { %v3604_v17 = vmul.f32 1.442695, %v3601_v1  ;;  %v3637_v1 = vunpack.c.l.bf16 %v7836_v23 }
 0x505   :  { %7781 = vpow2.f32 %v3604_v17  ;;  %v7837_v17 = vld [vmem:[%s11275_s0 + $0x18] sm:$0xff] }
 0x50b   :  { %v7780_v50 = vpop.eup %7779 }
 0x50c   :  { %v3606_v47 = vsel %vm3585_vm6, %v7780_v50, 0.0 }
 0x50d   :  { %v3607_v63 = vrot.slane %v3606_v47, 4 }
 0x50f   :  { %v7782_v46 = vpop.eup %7781  ;;  %v3608_v61 = vadd.f32 %v3607_v63, %v3606_v47  ;;  %v3642_v63 = vunpack.c.h.bf16 %v7837_v17 }
 0x510   :  { %v3613_v44 = vsel %vm3585_vm6, %v7782_v46, 0.0 }
 0x511   :  { %v3609_v12 = vrot.slane %v3608_v61, 2  ;;  %v3614_v41 = vrot.slane %v3613_v44, 4 }
 0x513   :  { %v3610_v5 = vadd.f32 %v3609_v12, %v3608_v61  ;;  %v3615_v35 = vadd.f32 %v3614_v41, %v3613_v44  ;;  %v7839_v12 = vld [vmem:[%s11275_s0 + $0x10] sm:$0xff] }
 0x514   :  { %v3640_v41 = vunpack.c.h.bf16 %v7839_v12 }
 0x515   :  { %v3611_v15 = vrot.slane %v3610_v5, 1  ;;  %v3616_v28 = vrot.slane %v3615_v35, 2 }
 0x517   :  { %v3612_v20 = vadd.f32 %v3611_v15, %v3610_v5  ;;  %v3617_v24 = vadd.f32 %v3616_v28, %v3615_v35  ;;  %v7840_v5 = vld [vmem:[%s11275_s0 + $0x28] sm:$0xff] }
 0x518   :  { %v3646_v35 = vunpack.c.h.bf16 %v7840_v5  ;;  %v3645_v15 = vunpack.c.l.bf16 %v7840_v5 }
 0x519   :  { %7783 = vrcp.f32 %v3612_v20  ;;  %v3618_v45 = vrot.slane %v3617_v24, 1 }
 0x51b   :  { %v3619_v40 = vadd.f32 %v3618_v45, %v3617_v24 }
 0x51d   :  { %7785 = vrcp.f32 %v3619_v40 }
 0x523   :  { %v7784_v51 = vpop.eup %7783 }
 0x524   :  { %v3621_v25 = vmul.f32 %v7784_v51, %v7780_v50  ;;  %v3641_v50 = vunpack.c.l.bf16 %v7837_v17  ;;  %v3639_v17 = vunpack.c.l.bf16 %v7839_v12 }
 0x526   :  { %3649 = vperm.xlu0 %7205, %v3621_v25  }
 0x527   :  { %v7786_v22 = vpop.eup %7785 }
 0x528   :  { %v3623_v32 = vmul.f32 %v7786_v22, %v7782_v46  ;;  %v7838_v46 = vld [vmem:[%s11275_s0 + $0x20] sm:$0xff] }
 0x529   :  { %v3644_v61 = vunpack.c.h.bf16 %v7838_v46  ;;  %v3643_v44 = vunpack.c.l.bf16 %v7838_v46 }
 0x52a   :  { %3654 = vperm.xlu1 %7206, %v3623_v32  }
 0x5a5   :  { %v9993_v47 = vpop.permute.xlu0 %3649 }
 0x5a6   :  { %v3658_v20 = vmul.f32 %v9993_v47, %v3636_v27  ;;  %v3660_v24 = vmul.f32 %v9993_v47, %v3638_v29  ;;  %v3657_v45 = vmul.f32 %v9993_v47, %v3635_v10  ;;  %v3659_v40 = vmul.f32 %v9993_v47, %v3637_v1 }
 0x5a7   :  { %v3662_v18 = vmul.f32 %v9993_v47, %v3640_v41  ;;  %v3886_v52 = vmul.f32 %v9993_v47, %v9569_v60  ;;  %v3959_v41 = vmul.f32 %v9993_v47, %v8123_v33  ;;  %v3958_v33 = vmul.f32 %v9993_v47, %v8132_v36 }
 0x5a8   :  { %v3960_v36 = vmul.f32 %v9993_v47, %v8332_v13  ;;  %v3962_v13 = vmul.f32 %v9993_v47, %v8599_v42  ;;  %v3964_v42 = vmul.f32 %v9993_v47, %v8869_v3  ;;  %v3966_v3 = vmul.f32 %v9993_v47, %v9116_v57 }
 0x5a9   :  { %v10004_v28 = vpop.permute.xlu1 %3654  ;;  %v3968_v57 = vmul.f32 %v9993_v47, %v9296_v62  ;;  %v3970_v62 = vmul.f32 %v9993_v47, %v9501_v54  ;;  %v4661_v54 = vld [vmem:[%s11284_s15] sm:$0xff] }
 0x5aa   :  { %v3664_v51 = vmul.f32 %v10004_v28, %v3642_v63  ;;  %v3666_v25 = vmul.f32 %v10004_v28, %v3644_v61  ;;  %v3663_v22 = vmul.f32 %v10004_v28, %v3641_v50  ;;  %v3665_v32 = vmul.f32 %v10004_v28, %v3643_v44 }
 0x5ab   :  { %v3668_v23 = vmul.f32 %v10004_v28, %v3646_v35  ;;  %v3667_v10 = vmul.f32 %v10004_v28, %v3645_v15  ;;  %v10020_v50 = vsel %vm9364_vm3, 1.0, %v7844_v0  ;;  %v3661_v63 = vmul.f32 %v9993_v47, %v3639_v17 }
 0x5ac   :  { %v6739_v27 = vpack.c.bf16 %v3664_v51, %v3658_v20  ;;  %v6743_v46 = vpack.c.bf16 %v3666_v25, %v3660_v24  ;;  %v6741_v29 = vpack.c.bf16 %v3663_v22, %v3657_v45  ;;  %v6745_v5 = vpack.c.bf16 %v3665_v32, %v3659_v40 }
 0x5ad   :  { %v6747_v1 = vpack.c.bf16 %v3668_v23, %v3662_v18  ;;  %v6749_v61 = vpack.c.bf16 %v3667_v10, %v3661_v63  ;;  %v3887_v44 = vmul.f32 %v10004_v28, %v9580_v55  ;;  %v3975_v12 = vmul.f32 %v10004_v28, %v8126_v34  ;;  %v4665_v10 = vld [vmem:[%s11284_s15 + $0x20] sm:$0xff] }
 0x5ae   :  { %6740 = vmatprep.subr.bf16.mxu1 %v6739_v27  ;;  %6744 = vmatprep.subr.bf16.mxu0 %v6743_v46  ;;  %v3974_v55 = vmul.f32 %v10004_v28, %v8135_v37  ;;  %v3977_v15 = vmul.f32 %v10004_v28, %v8138_v38  ;;  %v3961_v37 = vmul.f32 %v9993_v47, %v8145_v43 }
 0x5af   :  { %6742 = vmatpush1.bf16.msra.mxu1 %v6741_v29  ;;  %6746 = vmatpush1.bf16.msra.mxu0 %v6745_v5  ;;  %v6752_v35 = vpack.c.bf16 %v3887_v44, %v3886_v52  ;;  %v6754_v34 = vpack.c.bf16 %v3975_v12, %v3959_v41  ;;  %v3976_v20 = vmul.f32 %v10004_v28, %v8320_v6  ;;  %v4580_v12 = vld [vmem:[%s11285_s14 + $0x80] sm:$0xff]  ;;  %v4581_v52 = vld [vmem:[%s11285_s14 + $0x88] sm:$0xff] }
 0x5b0   :  { %6748 = vmatprep.subr.bf16.mxu0 %v6747_v1  ;;  %v6756_v60 = vpack.c.bf16 %v3974_v55, %v3958_v33  ;;  %v6758_v38 = vpack.c.bf16 %v3977_v15, %v3961_v37  ;;  %v3979_v24 = vmul.f32 %v10004_v28, %v8329_v11  ;;  %v3963_v43 = vmul.f32 %v9993_v47, %v8335_v14  ;;  %v4666_v1 = vld [vmem:[%s11284_s15 + $0x28] sm:$0xff]  ;;  %v4669_v41 = vld [vmem:[%s11284_s15 + $0x40] sm:$0x1]  ;;  %v4990_v37 = vld [vmem:[%s11286_s16 + $0x90] sm:$0xff] }
 0x5b1   :  { %v6760_v45 = vpack.c.bf16 %v3976_v20, %v3960_v36  ;;  %v3978_v6 = vmul.f32 %v10004_v28, %v8587_v8  ;;  %v3981_v11 = vmul.f32 %v10004_v28, %v8593_v30  ;;  %v3965_v14 = vmul.f32 %v9993_v47, %v8605_v16  ;;  %v4989_v55 = vld [vmem:[%s11286_s16 + $0x88] sm:$0xff]  ;;  %v4974_v20 = vld [vmem:[%s11286_s16 + $0x10] sm:$0xff] }
 0x5b2   :  { %6173 = vmatmul.mubr.msk.f32.vlgmr.msra.gmra.mrb[20].mxu0 %vm3669_vm7, %v10020_v50  ;;  %6172 = vmatmul.mubr.msk.f32.vlgmr.msra.gmra.mrb[4].mxu1 %vm3669_vm7, %v10020_v50  ;;  %v6762_v40 = vpack.c.bf16 %v3979_v24, %v3963_v43  ;;  %v3980_v8 = vmul.f32 %v10004_v28, %v8857_v2  ;;  %v3983_v30 = vmul.f32 %v10004_v28, %v8863_v21  ;;  %v4973_v15 = vld [vmem:[%s11286_s16 + $0x8] sm:$0xff]  ;;  %v4975_v24 = vld [vmem:[%s11286_s16 + $0x18] sm:$0xff]  ;;  %v4992_v43 = vld [vmem:[%s11286_s16 + $0xa0] sm:$0xff] }
 0x5b3   :  { %6750 = vmatpush1.bf16.msra.mxu0 %v6749_v61  ;;  %3879 = vmatprep.mubr.f32.mxu0 %v7844_v0  ;;  %v6764_v51 = vpack.c.bf16 %v3978_v6, %v3962_v13  ;;  %v6766_v25 = vpack.c.bf16 %v3981_v11, %v3965_v14  ;;  %v3967_v16 = vmul.f32 %v9993_v47, %v8875_v7  ;;  %v4668_v61 = vld [vmem:[%s11284_s15 + $0x38] sm:$0xff]  ;;  %v4976_v6 = vld [vmem:[%s11286_s16 + $0x20] sm:$0xff]  ;;  %v4977_v11 = vld [vmem:[%s11286_s16 + $0x28] sm:$0xff] }
 0x5b4   :  { %6751 = vmatprep.subr.bf16.mxu0 %v7843_v31  ;;  %v6768_v22 = vpack.c.bf16 %v3980_v8, %v3964_v42  ;;  %v3982_v2 = vmul.f32 %v10004_v28, %v9107_v19  ;;  %v3985_v21 = vmul.f32 %v10004_v28, %v9113_v56  ;;  %v3969_v7 = vmul.f32 %v9993_v47, %v9122_v58  ;;  %v4994_v14 = vld [vmem:[%s11286_s16 + $0xb0] sm:$0xff] }
 0x5b5   :  { %v6770_v32 = vpack.c.bf16 %v3983_v30, %v3967_v16  ;;  %v3984_v19 = vmul.f32 %v10004_v28, %v9287_v26  ;;  %v3987_v56 = vmul.f32 %v10004_v28, %v9293_v4  ;;  %v3971_v58 = vmul.f32 %v9993_v47, %v9302_v49  ;;  %v4978_v8 = vld [vmem:[%s11286_s16 + $0x30] sm:$0xff]  ;;  %v4979_v30 = vld [vmem:[%s11286_s16 + $0x38] sm:$0xff]  ;;  %v4996_v16 = vld [vmem:[%s11286_s16 + $0xc0] sm:$0xff] }
 0x5b6   :  { %6174 = vmatmul.mubr.msk.f32.vlgmr.msra.gmra.mrb[22].mxu0 %vm3669_vm7, %v10020_v50  ;;  %v6772_v18 = vpack.c.bf16 %v3982_v2, %v3966_v3  ;;  %v6774_v23 = vpack.c.bf16 %v3985_v21, %v3969_v7  ;;  %v3986_v26 = vmul.f32 %v10004_v28, %v9492_v48  ;;  %v3989_v4 = vmul.f32 %v10004_v28, %v9498_v53  ;;  %v4980_v2 = vld [vmem:[%s11286_s16 + $0x40] sm:$0xff]  ;;  %v4981_v21 = vld [vmem:[%s11286_s16 + $0x48] sm:$0xff]  ;;  %v4998_v7 = vld [vmem:[%s11286_s16 + $0xd0] sm:$0xff] }
 0x5b7   :  { %6753 = vmatpush3.bf16.msra.mxu0 %v6752_v35  ;;  %6607 = vmatprep.mubr.msk.f32.mxu0 %vm7849_vm8, %v7844_v0  ;;  %v6776_v17 = vpack.c.bf16 %v3984_v19, %v3968_v57  ;;  %v6778_v27 = vpack.c.bf16 %v3987_v56, %v3971_v58  ;;  %v3973_v49 = vmul.f32 %v9993_v47, %v9507_v59  ;;  %v4662_v59 = vld [vmem:[%s11284_s15 + $0x8] sm:$0xff]  ;;  %v4982_v19 = vld [vmem:[%s11286_s16 + $0x50] sm:$0xff]  ;;  %v4983_v56 = vld [vmem:[%s11286_s16 + $0x58] sm:$0xff] }
 0x5b8   :  { %6755 = vmatprep.subr.bf16.mxu0 %v6754_v34  ;;  %v6780_v46 = vpack.c.bf16 %v3986_v26, %v3970_v62  ;;  %v3988_v48 = vmul.f32 %v10004_v28, %v9701_v9  ;;  %v3972_v53 = vmul.f32 %v9993_v47, %v9704_v39  ;;  %v6787_v28 = vpack.c.bf16 %v4662_v59, %v4661_v54  ;;  %v4663_v39 = vld [vmem:[%s11284_s15 + $0x10] sm:$0xff]  ;;  %v4664_v47 = vld [vmem:[%s11284_s15 + $0x18] sm:$0xff]  ;;  %v5000_v58 = vld [vmem:[%s11286_s16 + $0xe0] sm:$0xff] }
 0x5b9   :  { %v6782_v29 = vpack.c.bf16 %v3989_v4, %v3973_v49  ;;  %v6790_v5 = vpack.c.bf16 %v4664_v47, %v4663_v39  ;;  %v6793_v63 = vpack.c.bf16 %v4666_v1, %v4665_v10  ;;  %v6798_v35 = vpack.c.bf16 %v4581_v52, %v4580_v12  ;;  %v4984_v26 = vld [vmem:[%s11286_s16 + $0x60] sm:$0xff]  ;;  %v4985_v4 = vld [vmem:[%s11286_s16 + $0x68] sm:$0xff]  ;;  %v5002_v49 = vld [vmem:[%s11286_s16 + $0xf0] sm:$0xff] }
 0x5ba   :  { %6608 = vmatmul.mubr.msk.f32.vlgmr.msra.gmra.mrb[24].mxu0 %vm3669_vm7, %v10020_v50  ;;  %v6784_v9 = vpack.c.bf16 %v3988_v48, %v3972_v53  ;;  %v6900_v36 = vpack.c.bf16 %v4975_v24, %v4974_v20  ;;  %v6904_v13 = vpack.c.bf16 %v4977_v11, %v4976_v6  ;;  %v6908_v42 = vpack.c.bf16 %v4979_v30, %v4978_v8  ;;  %v4986_v48 = vld [vmem:[%s11286_s16 + $0x70] sm:$0xff]  ;;  %v4987_v53 = vld [vmem:[%s11286_s16 + $0x78] sm:$0xff]  ;;  %v5052_v59 = vld [vmem:[%s11286_s16 + $0x280] sm:$0xff] }
 0x5bb   :  { %6757 = vmatpush1.bf16.msra.mxu0 %v6756_v60  ;;  %4054 = vmatprep.mubr.f32.mxu0 %v7844_v0  ;;  %v4991_v60 = vld [vmem:[%s11286_s16 + $0x98] sm:$0xff]  ;;  %v6912_v3 = vpack.c.bf16 %v4981_v21, %v4980_v2  ;;  %v6916_v57 = vpack.c.bf16 %v4983_v56, %v4982_v19  ;;  %v6920_v62 = vpack.c.bf16 %v4985_v4, %v4984_v26  ;;  %v4564_v52 = vld [vmem:[%s11285_s14] sm:$0xff]  ;;  %v4585_v24 = vld [vmem:[%s11285_s14 + $0xa8] sm:$0xff] }
 0x5bc   :  { %6759 = vmatprep.subr.bf16.mxu0 %v6758_v38  ;;  %v6898_v38 = vpack.c.bf16 %v4991_v60, %v4990_v37  ;;  %v6924_v54 = vpack.c.bf16 %v4987_v53, %v4986_v48  ;;  %v4566_v37 = vld [vmem:[%s11285_s14 + $0x10] sm:$0xff]  ;;  %v4567_v60 = vld [vmem:[%s11285_s14 + $0x18] sm:$0xff]  ;;  %v4569_v8 = vld [vmem:[%s11285_s14 + $0x28] sm:$0xff] }
 0x5bd   :  { %v6804_v6 = vpack.c.bf16 %v4567_v60, %v4566_v37  ;;  %v5055_v11 = vld [vmem:[%s11286_s16 + $0x298] sm:$0xff]  ;;  %v4586_v30 = vld [vmem:[%s11285_s14 + $0xb0] sm:$0xff]  ;;  %v5041_v4 = vld [vmem:[%s11286_s16 + $0x228] sm:$0xff] }
 0x5be   :  { %6176 = vmatmul.mubr.msk.f32.vlgmr.msra.gmra.mrb[26].mxu0 %vm3669_vm7, %v10020_v50  ;;  %v5039_v21 = vld [vmem:[%s11286_s16 + $0x218] sm:$0xff]  ;;  %v4573_v53 = vld [vmem:[%s11285_s14 + $0x48] sm:$0xff]  ;;  %v5044_v60 = vld [vmem:[%s11286_s16 + $0x240] sm:$0xff] }
 0x5bf   :  { %6761 = vmatpush1.bf16.msra.mxu0 %v6760_v45  ;;  %4125 = vmatprep.mubr.f32.mxu0 %v7844_v0  ;;  %v4993_v45 = vld [vmem:[%s11286_s16 + $0xa8] sm:$0xff]  ;;  %v4571_v56 = vld [vmem:[%s11285_s14 + $0x38] sm:$0xff] }
 0x5c0   :  { %6763 = vmatprep.subr.bf16.mxu0 %v6762_v40  ;;  %v6902_v40 = vpack.c.bf16 %v4993_v45, %v4992_v43  ;;  %v5037_v43 = vld [vmem:[%s11286_s16 + $0x208] sm:$0xff] }
 0x5c2   :  { %6177 = vmatmul.mubr.msk.f32.vlgmr.msra.gmra.mrb[28].mxu0 %vm3669_vm7, %v10020_v50 }
 0x5c3   :  { %6765 = vmatpush1.bf16.msra.mxu0 %v6764_v51  ;;  %4196 = vmatprep.mubr.f32.mxu0 %v7844_v0  ;;  %v4995_v51 = vld [vmem:[%s11286_s16 + $0xb8] sm:$0xff] }
 0x5c4   :  { %6767 = vmatprep.subr.bf16.mxu0 %v6766_v25  ;;  %v6906_v25 = vpack.c.bf16 %v4995_v51, %v4994_v14  ;;  %v4568_v51 = vld [vmem:[%s11285_s14 + $0x20] sm:$0xff] }
 0x5c6   :  { %6178 = vmatmul.mubr.msk.f32.vlgmr.msra.gmra.mrb[30].mxu0 %vm3669_vm7, %v10020_v50 }
 0x5c7   :  { %6769 = vmatpush1.bf16.msra.mxu0 %v6768_v22  ;;  %4267 = vmatprep.mubr.f32.mxu0 %v7844_v0  ;;  %v4997_v22 = vld [vmem:[%s11286_s16 + $0xc8] sm:$0xff] }
 0x5c8   :  { %6771 = vmatprep.subr.bf16.mxu0 %v6770_v32  ;;  %v6910_v32 = vpack.c.bf16 %v4997_v22, %v4996_v16 }
 0x5ca   :  { %6179 = vmatmul.mubr.msk.f32.vlgmr.msra.gmra.mrb[32].mxu0 %vm3669_vm7, %v10020_v50 }
 0x5cb   :  { %6773 = vmatpush1.bf16.msra.mxu0 %v6772_v18  ;;  %4338 = vmatprep.mubr.f32.mxu0 %v7844_v0  ;;  %v4999_v18 = vld [vmem:[%s11286_s16 + $0xd8] sm:$0xff] }
 0x5cc   :  { %6775 = vmatprep.subr.bf16.mxu0 %v6774_v23  ;;  %v6914_v23 = vpack.c.bf16 %v4999_v18, %v4998_v7  ;;  %v5056_v7 = vld [vmem:[%s11286_s16 + $0x2a0] sm:$0xff]  ;;  %v5057_v18 = vld [vmem:[%s11286_s16 + $0x2a8] sm:$0xff] }
 0x5cd   :  { %v6966_v26 = vpack.c.bf16 %v5057_v18, %v5056_v7  ;;  %v4579_v7 = vld [vmem:[%s11285_s14 + $0x78] sm:$0xff]  ;;  %v4612_v18 = vld [vmem:[%s11285_s14 + $0x180] sm:$0xff] }
 0x5ce   :  { %6180 = vmatmul.mubr.msk.f32.vlgmr.msra.gmra.mrb[34].mxu0 %vm3669_vm7, %v10020_v50 }
 0x5cf   :  { %6777 = vmatpush1.bf16.msra.mxu0 %v6776_v17  ;;  %4409 = vmatprep.mubr.f32.mxu0 %v7844_v0  ;;  %v5001_v17 = vld [vmem:[%s11286_s16 + $0xe8] sm:$0xff] }
 0x5d0   :  { %6779 = vmatprep.subr.bf16.mxu0 %v6778_v27  ;;  %v6918_v27 = vpack.c.bf16 %v5001_v17, %v5000_v58  ;;  %v4589_v58 = vld [vmem:[%s11285_s14 + $0xc8] sm:$0xff] }
 0x5d2   :  { %6181 = vmatmul.mubr.msk.f32.vlgmr.msra.gmra.mrb[36].mxu0 %vm3669_vm7, %v10020_v50 }
 0x5d3   :  { %6781 = vmatpush1.bf16.msra.mxu0 %v6780_v46  ;;  %4480 = vmatprep.mubr.f32.mxu0 %v7844_v0  ;;  %v5003_v46 = vld [vmem:[%s11286_s16 + $0xf8] sm:$0xff] }
 0x5d4   :  { %6783 = vmatprep.subr.bf16.mxu0 %v6782_v29  ;;  %v6922_v29 = vpack.c.bf16 %v5003_v46, %v5002_v49  ;;  %v5058_v49 = vld [vmem:[%s11286_s16 + $0x2b0] sm:$0xff]  ;;  %v5059_v46 = vld [vmem:[%s11286_s16 + $0x2b8] sm:$0xff] }
 0x5d6   :  { %6182 = vmatmul.mubr.msk.f32.vlgmr.msra.gmra.mrb[38].mxu0 %vm3669_vm7, %v10020_v50 }
 0x5d7   :  { %6785 = vmatpush1.bf16.msra.mxu0 %v6784_v9  ;;  %4551 = vmatprep.mubr.f32.mxu0 %v7844_v0  ;;  %v5053_v9 = vld [vmem:[%s11286_s16 + $0x288] sm:$0xff] }
 0x5d8   :  { %6786 = vmatprep.subr.bf16.mxu0 %v7843_v31 }
 0x5da   :  { %6183 = vmatmul.mubr.msk.f32.vlgmr.msra.gmra.mrb[40].mxu0 %vm3669_vm7, %v10020_v50  ;;  %v4667_v50 = vld [vmem:[%s11284_s15 + $0x30] sm:$0xff] }
 0x5db   :  { %6788 = vmatpush3.bf16.msra.mxu0 %v6787_v28  ;;  %6628 = vmatprep.mubr.msk.f32.mxu0 %vm7849_vm8, %v7844_v0  ;;  %v6796_v44 = vpack.c.bf16 %v4668_v61, %v4667_v50  ;;  %v6958_v28 = vpack.c.bf16 %v5053_v9, %v5052_v59  ;;  %v4591_v59 = vld [vmem:[%s11285_s14 + $0xd8] sm:$0xff] }
 0x5dc   :  { %6789 = vmatprep.subr.bf16.mxu0 %v7843_v31 }
 0x5df   :  { %6791 = vmatpush3.bf16.msra.mxu0 %v6790_v5 }
 0x5e0   :  { %6792 = vmatprep.subr.bf16.mxu0 %v7843_v31 }
 0x5e3   :  { %6794 = vmatpush3.bf16.msra.mxu0 %v6793_v63 }
 0x5e4   :  { %6795 = vmatprep.subr.bf16.mxu0 %v7843_v31  ;;  %v4988_v31 = vld [vmem:[%s11286_s16 + $0x80] sm:$0xff] }
 0x5e5   :  { %v6894_v34 = vpack.c.bf16 %v4989_v55, %v4988_v31  ;;  %v4583_v31 = vld [vmem:[%s11285_s14 + $0x98] sm:$0xff] }
 0x5e7   :  { %6797 = vmatpush3.bf16.msra.mxu0 %v6796_v44  ;;  %6895 = vmatprep.subr.bf16.mxu1 %v6894_v34 }
 0x5e8   :  { %6626 = vmatprep.subr.mxu0 %v7844_v0  ;;  %v4972_v0 = vld [vmem:[%s11286_s16] sm:$0xff] }
 0x5e9   :  { %v6896_v33 = vpack.c.bf16 %v4973_v15, %v4972_v0 }
 0x5eb   :  { %6627 = vmatpush3.msk.msra.mxu0 %vm3169_vm0, %v4669_v41  ;;  %6897 = vmatpush3.bf16.msra.mxu1 %v6896_v33  ;;  %v4565_v41 = vld [vmem:[%s11285_s14 + $0x8] sm:$0xff] }
 0x5ec   :  { %6799 = vmatprep.subr.bf16.mxu0 %v6798_v35  ;;  %6899 = vmatprep.subr.bf16.mxu1 %v6898_v38  ;;  %v4582_v35 = vld [vmem:[%s11285_s14 + $0x90] sm:$0xff]  ;;  %v6800_v0 = vpack.c.bf16 %v4565_v41, %v4564_v52  ;;  %v4584_v38 = vld [vmem:[%s11285_s14 + $0xa0] sm:$0xff]  ;;  %v5061_v52 = vld [vmem:[%s11286_s16 + $0x2c8] sm:$0xff] }
 0x5ed   :  { %v6802_v33 = vpack.c.bf16 %v4583_v31, %v4582_v35  ;;  %v6806_v14 = vpack.c.bf16 %v4585_v24, %v4584_v38  ;;  %v4574_v35 = vld [vmem:[%s11285_s14 + $0x50] sm:$0xff]  ;;  %v4575_v31 = vld [vmem:[%s11285_s14 + $0x58] sm:$0xff] }
 0x5ee   :  { %v6820_v38 = vpack.c.bf16 %v4575_v31, %v4574_v35  ;;  %v5062_v24 = vld [vmem:[%s11286_s16 + $0x2d0] sm:$0xff]  ;;  %v5100_v31 = vld [vmem:[%s11286_s16 + $0x400] sm:$0xff] }
 0x5ef   :  { %6901 = vmatpush3.bf16.msra.mxu1 %v6900_v36  ;;  %v5036_v36 = vld [vmem:[%s11286_s16 + $0x200] sm:$0xff] }
 0x5f0   :  { %6903 = vmatprep.subr.bf16.mxu1 %v6902_v40  ;;  %v5054_v40 = vld [vmem:[%s11286_s16 + $0x290] sm:$0xff]  ;;  %v6960_v16 = vpack.c.bf16 %v5037_v43, %v5036_v36  ;;  %v5063_v36 = vld [vmem:[%s11286_s16 + $0x2d8] sm:$0xff] }
 0x5f1   :  { %v6962_v2 = vpack.c.bf16 %v5055_v11, %v5054_v40  ;;  %v4576_v40 = vld [vmem:[%s11285_s14 + $0x60] sm:$0xff]  ;;  %v4577_v11 = vld [vmem:[%s11285_s14 + $0x68] sm:$0xff] }
 0x5f3   :  { %6905 = vmatpush3.bf16.msra.mxu1 %v6904_v13 }
 0x5f4   :  { %6907 = vmatprep.subr.bf16.mxu1 %v6906_v25 }
 0x5f7   :  { %6909 = vmatpush3.bf16.msra.mxu1 %v6908_v42  ;;  %v4587_v42 = vld [vmem:[%s11285_s14 + $0xb8] sm:$0xff] }
 0x5f8   :  { %6911 = vmatprep.subr.bf16.mxu1 %v6910_v32  ;;  %v5038_v32 = vld [vmem:[%s11286_s16 + $0x210] sm:$0xff]  ;;  %v6810_v19 = vpack.c.bf16 %v4587_v42, %v4586_v30  ;;  %v6978_v30 = vpack.c.bf16 %v5063_v36, %v5062_v24 }
 0x5f9   :  { %v6964_v17 = vpack.c.bf16 %v5039_v21, %v5038_v32  ;;  %v5046_v42 = vld [vmem:[%s11286_s16 + $0x250] sm:$0xff]  ;;  %v5065_v32 = vld [vmem:[%s11286_s16 + $0x2e8] sm:$0xff] }
 0x5fa   :  { %v4618_v36 = vld [vmem:[%s11285_s14 + $0x1b0] sm:$0xff] }
 0x5fb   :  { %6913 = vmatpush3.bf16.msra.mxu1 %v6912_v3  ;;  %v6808_v3 = vpack.c.bf16 %v4569_v8, %v4568_v51  ;;  %v4595_v51 = vld [vmem:[%s11285_s14 + $0xf8] sm:$0xff] }
 0x5fc   :  { %6915 = vmatprep.subr.bf16.mxu1 %v6914_v23  ;;  %v4570_v23 = vld [vmem:[%s11285_s14 + $0x30] sm:$0xff] }
 0x5ff   :  { %6917 = vmatpush3.bf16.msra.mxu1 %v6916_v57  ;;  %v4588_v57 = vld [vmem:[%s11285_s14 + $0xc0] sm:$0xff] }
 0x600   :  { %6919 = vmatprep.subr.bf16.mxu1 %v6918_v27  ;;  %v5040_v27 = vld [vmem:[%s11286_s16 + $0x220] sm:$0xff]  ;;  %v6814_v48 = vpack.c.bf16 %v4589_v58, %v4588_v57  ;;  %v5049_v57 = vld [vmem:[%s11286_s16 + $0x268] sm:$0xff] }
 0x601   :  { %v6968_v9 = vpack.c.bf16 %v5041_v4, %v5040_v27  ;;  %v4596_v4 = vld [vmem:[%s11285_s14 + $0x100] sm:$0xff] }
 0x603   :  { %6921 = vmatpush3.bf16.msra.mxu1 %v6920_v62  ;;  %v6812_v62 = vpack.c.bf16 %v4571_v56, %v4570_v23  ;;  %v5048_v56 = vld [vmem:[%s11286_s16 + $0x260] sm:$0xff] }
 0x604   :  { %6923 = vmatprep.subr.bf16.mxu1 %v6922_v29  ;;  %v4572_v29 = vld [vmem:[%s11285_s14 + $0x40] sm:$0xff] }
 0x607   :  { %6925 = vmatpush3.bf16.msra.mxu1 %v6924_v54  ;;  %v4590_v54 = vld [vmem:[%s11285_s14 + $0xd0] sm:$0xff] }
 0x608   :  { %6959 = vmatprep.subr.bf16.mxu1 %v6958_v28  ;;  %v6818_v41 = vpack.c.bf16 %v4591_v59, %v4590_v54 }
 0x685   :  { %v10270_v39 = vpop.f32.mrb[20].mxu0  ;;  %v10274_v5 = vpop.f32.mrb[4].mxu1 }
 0x686   :  { %v10272_v47 = vpop.f32.mrb[21].mxu0  ;;  %v3741_v1 = vpop.f32.mrb[5].mxu1 }
 0x687   :  { %7787 = vtanh.f32 %v3741_v1  ;;  %v6970_v1 = vpack.c.bf16 %v5059_v46, %v5058_v49  ;;  %v4615_v49 = vld [vmem:[%s11285_s14 + $0x198] sm:$0xff]  ;;  %v6984_v46 = vpack.c.bf16 %v5049_v57, %v5048_v56 }
 0x688   :  { %v5123_v56 = vld [vmem:[%s11286_s16 + $0x4b8] sm:$0xff] }
 0x689   :  { %v10276_v10 = vpop.f32.mrb[22].mxu0 }
 0x68a   :  { %v10278_v50 = vpop.f32.mrb[23].mxu0 }
 0x68d   :  { %v3954_v63 = vpop.f32.mrb[24].mxu0 }
 0x68e   :  { %7789 = vtanh.f32 %v3954_v63  ;;  %v6609_v61 = vpop.f32.mrb[25].mxu0  ;;  %v5042_v63 = vld [vmem:[%s11286_s16 + $0x230] sm:$0xff] }
 0x68f   :  { %v5043_v61 = vld [vmem:[%s11286_s16 + $0x238] sm:$0xff] }
 0x691   :  { %v4056_v44 = vpop.f32.mrb[26].mxu0  ;;  %v7788_v15 = vpop.eup %7787 }
 0x692   :  { %7791 = vtanh.f32 %v4056_v44  ;;  %v4058_v12 = vpop.f32.mrb[27].mxu0  ;;  %v6816_v44 = vpack.c.bf16 %v4573_v53, %v4572_v29  ;;  %v5050_v29 = vld [vmem:[%s11286_s16 + $0x270] sm:$0xff]  ;;  %v5051_v53 = vld [vmem:[%s11286_s16 + $0x278] sm:$0xff] }
 0x693   :  { %7793 = vtanh.f32 %v4058_v12  ;;  %v5060_v12 = vld [vmem:[%s11286_s16 + $0x2c0] sm:$0xff] }
 0x694   :  { %v6974_v37 = vpack.c.bf16 %v5061_v52, %v5060_v12  ;;  %v4617_v12 = vld [vmem:[%s11285_s14 + $0x1a8] sm:$0xff]  ;;  %v6988_v52 = vpack.c.bf16 %v5051_v53, %v5050_v29 }
 0x695   :  { %v10292_v55 = vpop.f32.mrb[28].mxu0  ;;  %v5125_v29 = vld [vmem:[%s11286_s16 + $0x4c8] sm:$0xff] }
 0x696   :  { %v10294_v34 = vpop.f32.mrb[29].mxu0 }
 0x698   :  { %v7790_v20 = vpop.eup %7789 }
 0x699   :  { %6629 = vmatmul.mubr.msk.f32.vlgmr.msra.gmra.mrb[42].mxu0 %vm405_vm4, %v7790_v20  ;;  %v10315_v45 = vpop.f32.mrb[30].mxu0  ;;  %v5045_v20 = vld [vmem:[%s11286_s16 + $0x248] sm:$0xff] }
 0x69a   :  { %6801 = vmatpush3.bf16.msra.mxu0 %v6800_v0  ;;  %4810 = vmatprep.mubr.f32.mxu0 %v7788_v15  ;;  %v4200_v13 = vpop.f32.mrb[31].mxu0  ;;  %v4592_v0 = vld [vmem:[%s11285_s14 + $0xe0] sm:$0xff]  ;;  %v4593_v15 = vld [vmem:[%s11285_s14 + $0xe8] sm:$0xff]  ;;  %v6976_v8 = vpack.c.bf16 %v5045_v20, %v5044_v60 }
 0x69b   :  { %6803 = vmatprep.subr.bf16.mxu0 %v6802_v33  ;;  %7795 = vtanh.f32 %v4200_v13  ;;  %v6972_v33 = vpack.c.bf16 %v5043_v61, %v5042_v63  ;;  %v4598_v63 = vld [vmem:[%s11285_s14 + $0x110] sm:$0xff]  ;;  %v4599_v61 = vld [vmem:[%s11285_s14 + $0x118] sm:$0xff]  ;;  %v4600_v20 = vld [vmem:[%s11285_s14 + $0x120] sm:$0xff] }
 0x69c   :  { %v7792_v25 = vpop.eup %7791  ;;  %7797 = vtanh.f32 %v10274_v5  ;;  %v5047_v5 = vld [vmem:[%s11286_s16 + $0x258] sm:$0xff] }
 0x69d   :  { %v7794_v22 = vpop.eup %7793  ;;  %v10419_v43 = vpop.f32.mrb[32].mxu0  ;;  %7799 = vtanh.f32 %v10272_v47  ;;  %v6980_v47 = vpack.c.bf16 %v5047_v5, %v5046_v42  ;;  %v5120_v42 = vld [vmem:[%s11286_s16 + $0x4a0] sm:$0xff]  ;;  %v5121_v5 = vld [vmem:[%s11286_s16 + $0x4a8] sm:$0xff] }
 0x69e   :  { %6805 = vmatpush3.bf16.msra.mxu0 %v6804_v6  ;;  %5292 = vmatprep.mubr.f32.mxu1 %v7794_v22  ;;  %v6822_v6 = vpack.c.bf16 %v4593_v15, %v4592_v0  ;;  %v10427_v13 = vpop.f32.mrb[33].mxu0  ;;  %v6824_v22 = vpack.c.bf16 %v4577_v11, %v4576_v40  ;;  %7801 = vtanh.f32 %v10315_v45  ;;  %v4614_v45 = vld [vmem:[%s11285_s14 + $0x190] sm:$0xff]  ;;  %v5101_v0 = vld [vmem:[%s11286_s16 + $0x408] sm:$0xff]  ;;  %v6836_v15 = vpack.c.bf16 %v4599_v61, %v4598_v63  ;;  %v5108_v61 = vld [vmem:[%s11286_s16 + $0x440] sm:$0xff] }
 0x69f   :  { %6807 = vmatprep.subr.bf16.mxu0 %v6806_v14  ;;  %5293 = vmatmul.mubr.f32.vlgmr.msra.gmra.mrb[6].mxu1 %v7792_v25  ;;  %v4594_v14 = vld [vmem:[%s11285_s14 + $0xf0] sm:$0xff]  ;;  %v7024_v40 = vpack.c.bf16 %v5101_v0, %v5100_v31  ;;  %v4608_v0 = vld [vmem:[%s11285_s14 + $0x160] sm:$0xff] }
 0x6a0   :  { %6961 = vmatpush3.bf16.msra.mxu1 %v6960_v16  ;;  %v6826_v21 = vpack.c.bf16 %v4595_v51, %v4594_v14  ;;  %v5102_v51 = vld [vmem:[%s11286_s16 + $0x410] sm:$0xff] }
 0x6a1   :  { %6963 = vmatprep.subr.bf16.mxu1 %v6962_v2  ;;  %v10436_v25 = vpop.f32.mrb[34].mxu0  ;;  %v5064_v2 = vld [vmem:[%s11286_s16 + $0x2e0] sm:$0xff] }
 0x6a2   :  { %6809 = vmatpush3.bf16.msra.mxu0 %v6808_v3  ;;  %v4342_v16 = vpop.f32.mrb[35].mxu0  ;;  %v4578_v3 = vld [vmem:[%s11285_s14 + $0x70] sm:$0xff]  ;;  %v6982_v23 = vpack.c.bf16 %v5065_v32, %v5064_v2  ;;  %v4603_v2 = vld [vmem:[%s11285_s14 + $0x138] sm:$0xff]  ;;  %v4620_v32 = vld [vmem:[%s11285_s14 + $0x1c0] sm:$0xff] }
 0x6a3   :  { %6811 = vmatprep.subr.bf16.mxu0 %v6810_v19  ;;  %v4613_v19 = vld [vmem:[%s11285_s14 + $0x188] sm:$0xff]  ;;  %v6828_v58 = vpack.c.bf16 %v4579_v7, %v4578_v3  ;;  %7803 = vtanh.f32 %v4342_v16  ;;  %v7030_v7 = vpack.c.bf16 %v5121_v5, %v5120_v42  ;;  %v4644_v42 = vld [vmem:[%s11285_s14 + $0x280] sm:$0xff] }
 0x6a4   :  { %6965 = vmatpush3.bf16.msra.mxu1 %v6964_v17  ;;  %v5066_v17 = vld [vmem:[%s11286_s16 + $0x2f0] sm:$0xff]  ;;  %v6830_v27 = vpack.c.bf16 %v4613_v19, %v4612_v18  ;;  %v5104_v18 = vld [vmem:[%s11286_s16 + $0x420] sm:$0xff]  ;;  %v5105_v19 = vld [vmem:[%s11286_s16 + $0x428] sm:$0xff]  ;;  %7805 = vtanh.f32 %v10270_v39 }
 0x6a5   :  { %v7796_v28 = vpop.eup %7795  ;;  %6967 = vmatprep.subr.bf16.mxu1 %v6966_v26  ;;  %v5067_v26 = vld [vmem:[%s11286_s16 + $0x2f8] sm:$0xff]  ;;  %7807 = vtanh.f32 %v10278_v50  ;;  %v4645_v5 = vld [vmem:[%s11285_s14 + $0x288] sm:$0xff] }
 0x6a6   :  { %6813 = vmatpush3.bf16.msra.mxu0 %v6812_v62  ;;  %5432 = vmatprep.mubr.f32.mxu1 %v7796_v28  ;;  %v4597_v62 = vld [vmem:[%s11285_s14 + $0x108] sm:$0xff]  ;;  %v7798_v54 = vpop.eup %7797  ;;  %v4611_v39 = vld [vmem:[%s11285_s14 + $0x178] sm:$0xff]  ;;  %7809 = vtanh.f32 %v10436_v25  ;;  %v4646_v25 = vld [vmem:[%s11285_s14 + $0x290] sm:$0xff] }
 0x6a7   :  { %6815 = vmatprep.subr.bf16.mxu0 %v6814_v48  ;;  %v6986_v48 = vpack.c.bf16 %v5067_v26, %v5066_v17  ;;  %v6832_v59 = vpack.c.bf16 %v4597_v62, %v4596_v4  ;;  %v5117_v28 = vld [vmem:[%s11286_s16 + $0x488] sm:$0xff]  ;;  %v4622_v26 = vld [vmem:[%s11285_s14 + $0x1d0] sm:$0xff]  ;;  %v7032_v4 = vpack.c.bf16 %v5105_v19, %v5104_v18  ;;  %v4628_v18 = vld [vmem:[%s11285_s14 + $0x200] sm:$0xff] }
 0x6a8   :  { %6969 = vmatpush3.bf16.msra.mxu1 %v6968_v9  ;;  %v5116_v9 = vld [vmem:[%s11286_s16 + $0x480] sm:$0xff]  ;;  %v4605_v17 = vld [vmem:[%s11285_s14 + $0x148] sm:$0xff] }
 0x6a9   :  { %6971 = vmatprep.subr.bf16.mxu1 %v6970_v1  ;;  %v6834_v1 = vpack.c.bf16 %v4615_v49, %v4614_v45  ;;  %v7022_v35 = vpack.c.bf16 %v5117_v28, %v5116_v9  ;;  %v5106_v45 = vld [vmem:[%s11286_s16 + $0x430] sm:$0xff]  ;;  %v5107_v49 = vld [vmem:[%s11286_s16 + $0x438] sm:$0xff]  ;;  %v4624_v9 = vld [vmem:[%s11285_s14 + $0x1e0] sm:$0xff] }
 0x6aa   :  { %6817 = vmatpush3.bf16.msra.mxu0 %v6816_v44  ;;  %v4616_v44 = vld [vmem:[%s11285_s14 + $0x1a0] sm:$0xff]  ;;  %v4625_v28 = vld [vmem:[%s11285_s14 + $0x1e8] sm:$0xff] }
 0x6ab   :  { %6819 = vmatprep.subr.bf16.mxu0 %v6818_v41  ;;  %v7800_v41 = vpop.eup %7799  ;;  %v6838_v60 = vpack.c.bf16 %v4617_v12, %v4616_v44  ;;  %v5109_v44 = vld [vmem:[%s11286_s16 + $0x448] sm:$0xff]  ;;  %v6854_v31 = vpack.c.bf16 %v4625_v28, %v4624_v9 }
 0x6ac   :  { %6973 = vmatpush3.bf16.msra.mxu1 %v6972_v33  ;;  %v5118_v33 = vld [vmem:[%s11286_s16 + $0x490] sm:$0xff]  ;;  %v7802_v24 = vpop.eup %7801  ;;  %v4629_v19 = vld [vmem:[%s11285_s14 + $0x208] sm:$0xff] }
 0x6ad   :  { %6975 = vmatprep.subr.bf16.mxu1 %v6974_v37  ;;  %v5119_v37 = vld [vmem:[%s11286_s16 + $0x498] sm:$0xff]  ;;  %v7804_v11 = vpop.eup %7803  ;;  %v5165_v9 = vld [vmem:[%s11286_s16 + $0x608] sm:$0xff] }
 0x6ae   :  { %6821 = vmatpush3.bf16.msra.mxu0 %v6820_v38  ;;  %v4601_v38 = vld [vmem:[%s11285_s14 + $0x128] sm:$0xff]  ;;  %v7026_v14 = vpack.c.bf16 %v5119_v37, %v5118_v33  ;;  %v4626_v37 = vld [vmem:[%s11285_s14 + $0x1f0] sm:$0xff] }
 0x6af   :  { %6823 = vmatprep.subr.bf16.mxu0 %v6822_v6  ;;  %v4619_v6 = vld [vmem:[%s11285_s14 + $0x1b8] sm:$0xff] }
 0x6b0   :  { %6977 = vmatpush3.bf16.msra.mxu1 %v6976_v8  ;;  %v5103_v8 = vld [vmem:[%s11286_s16 + $0x418] sm:$0xff]  ;;  %v6842_v16 = vpack.c.bf16 %v4619_v6, %v4618_v36  ;;  %v5110_v36 = vld [vmem:[%s11286_s16 + $0x450] sm:$0xff] }
 0x6b1   :  { %6979 = vmatprep.subr.bf16.mxu1 %v6978_v30  ;;  %v6840_v30 = vpack.c.bf16 %v4601_v38, %v4600_v20  ;;  %v7028_v3 = vpack.c.bf16 %v5103_v8, %v5102_v51  ;;  %v7040_v20 = vpack.c.bf16 %v5109_v44, %v5108_v61  ;;  %v5111_v6 = vld [vmem:[%s11286_s16 + $0x458] sm:$0xff]  ;;  %v5129_v51 = vld [vmem:[%s11286_s16 + $0x4e8] sm:$0xff]  ;;  %v4632_v44 = vld [vmem:[%s11285_s14 + $0x220] sm:$0xff] }
 0x6b2   :  { %6825 = vmatpush3.bf16.msra.mxu0 %v6824_v22  ;;  %v4602_v22 = vld [vmem:[%s11285_s14 + $0x130] sm:$0xff]  ;;  %v7044_v50 = vpack.c.bf16 %v5111_v6, %v5110_v36  ;;  %v5184_v36 = vld [vmem:[%s11286_s16 + $0x6a0] sm:$0xff]  ;;  %v5185_v6 = vld [vmem:[%s11286_s16 + $0x6a8] sm:$0xff] }
 0x6b3   :  { %6827 = vmatprep.subr.bf16.mxu0 %v6826_v21  ;;  %v4621_v21 = vld [vmem:[%s11285_s14 + $0x1c8] sm:$0xff] }
 0x6b4   :  { %6981 = vmatpush3.bf16.msra.mxu1 %v6980_v47  ;;  %v6844_v47 = vpack.c.bf16 %v4603_v2, %v4602_v22  ;;  %v6846_v57 = vpack.c.bf16 %v4621_v21, %v4620_v32  ;;  %v5112_v22 = vld [vmem:[%s11286_s16 + $0x460] sm:$0xff]  ;;  %v5113_v2 = vld [vmem:[%s11286_s16 + $0x468] sm:$0xff]  ;;  %v5130_v21 = vld [vmem:[%s11286_s16 + $0x4f0] sm:$0xff] }
 0x6b5   :  { %6983 = vmatprep.subr.bf16.mxu1 %v6982_v23  ;;  %v5122_v23 = vld [vmem:[%s11286_s16 + $0x4b0] sm:$0xff] }
 0x6b6   :  { %6829 = vmatpush3.bf16.msra.mxu0 %v6828_v58  ;;  %v4604_v58 = vld [vmem:[%s11285_s14 + $0x140] sm:$0xff]  ;;  %v7034_v62 = vpack.c.bf16 %v5123_v56, %v5122_v23  ;;  %v7048_v23 = vpack.c.bf16 %v5113_v2, %v5112_v22  ;;  %v5186_v2 = vld [vmem:[%s11286_s16 + $0x6b0] sm:$0xff] }
 0x6b7   :  { %6831 = vmatprep.subr.bf16.mxu0 %v6830_v27  ;;  %v4623_v27 = vld [vmem:[%s11285_s14 + $0x1d8] sm:$0xff] }
 0x6b8   :  { %6985 = vmatpush3.bf16.msra.mxu1 %v6984_v46  ;;  %v6848_v46 = vpack.c.bf16 %v4605_v17, %v4604_v58  ;;  %v6850_v53 = vpack.c.bf16 %v4623_v27, %v4622_v26  ;;  %v5115_v58 = vld [vmem:[%s11286_s16 + $0x478] sm:$0xff]  ;;  %v6864_v17 = vpack.c.bf16 %v4629_v19, %v4628_v18  ;;  %v5180_v26 = vld [vmem:[%s11286_s16 + $0x680] sm:$0xff]  ;;  %v5181_v27 = vld [vmem:[%s11286_s16 + $0x688] sm:$0xff] }
 0x6b9   :  { %4811 = vmatmul.mubr.f32.vlgmr.msra.gmra.mrb[44].mxu0 %v7798_v54  ;;  %6987 = vmatprep.subr.bf16.mxu1 %v6986_v48  ;;  %v5124_v48 = vld [vmem:[%s11286_s16 + $0x4c0] sm:$0xff]  ;;  %v4606_v54 = vld [vmem:[%s11285_s14 + $0x150] sm:$0xff]  ;;  %v4655_v19 = vld [vmem:[%s11285_s14 + $0x2d8] sm:$0xff] }
 0x6ba   :  { %6833 = vmatpush3.bf16.msra.mxu0 %v6832_v59  ;;  %4880 = vmatprep.mubr.f32.mxu0 %v7800_v41  ;;  %v4607_v59 = vld [vmem:[%s11285_s14 + $0x158] sm:$0xff]  ;;  %v7038_v63 = vpack.c.bf16 %v5125_v29, %v5124_v48  ;;  %v4649_v48 = vld [vmem:[%s11285_s14 + $0x2a8] sm:$0xff]  ;;  %v4654_v18 = vld [vmem:[%s11285_s14 + $0x2d0] sm:$0xff] }
 0x6bb   :  { %6835 = vmatprep.subr.bf16.mxu0 %v6834_v1  ;;  %v7036_v1 = vpack.c.bf16 %v5107_v49, %v5106_v45  ;;  %v6852_v12 = vpack.c.bf16 %v4607_v59, %v4606_v54  ;;  %v5127_v41 = vld [vmem:[%s11286_s16 + $0x4d8] sm:$0xff]  ;;  %v7806_v49 = vpop.eup %7805  ;;  %v7086_v54 = vpack.c.bf16 %v5181_v27, %v5180_v26  ;;  %v5164_v59 = vld [vmem:[%s11286_s16 + $0x600] sm:$0xff]  ;;  %v6882_v26 = vpack.c.bf16 %v4655_v19, %v4654_v18  ;;  %v4638_v27 = vld [vmem:[%s11285_s14 + $0x250] sm:$0xff] }
 0x6bc   :  { %6989 = vmatpush3.bf16.msra.mxu1 %v6988_v52  ;;  %v5126_v52 = vld [vmem:[%s11286_s16 + $0x4d0] sm:$0xff]  ;;  %v4631_v45 = vld [vmem:[%s11285_s14 + $0x218] sm:$0xff] }
 0x6bd   :  { %7023 = vmatprep.subr.bf16.mxu1 %v7022_v35  ;;  %v10620_v35 = vpop.f32.mrb[36].mxu0  ;;  %v5006_v18 = vld [vmem:[%s11286_s16 + $0x110] sm:$0xff]  ;;  %v5007_v19 = vld [vmem:[%s11286_s16 + $0x118] sm:$0xff] }
 0x6be   :  { %6837 = vmatpush3.bf16.msra.mxu0 %v6836_v15  ;;  %v4609_v15 = vld [vmem:[%s11285_s14 + $0x168] sm:$0xff]  ;;  %v10628_v33 = vpop.f32.mrb[37].mxu0 }
 0x6bf   :  { %6839 = vmatprep.subr.bf16.mxu0 %v6838_v60  ;;  %5433 = vmatmul.mubr.f32.vlgmr.msra.gmra.mrb[8].mxu1 %v7802_v24  ;;  %v4627_v60 = vld [vmem:[%s11285_s14 + $0x1f8] sm:$0xff]  ;;  %v10636_v38 = vpop.f32.mrb[38].mxu0  ;;  %v7042_v24 = vpack.c.bf16 %v5127_v41, %v5126_v52  ;;  %v4650_v41 = vld [vmem:[%s11285_s14 + $0x2b0] sm:$0xff] }
 0x6c0   :  { %7025 = vmatpush3.bf16.msra.mxu1 %v7024_v40  ;;  %5572 = vmatprep.mubr.f32.mxu1 %v7804_v11  ;;  %v4484_v40 = vpop.f32.mrb[39].mxu0  ;;  %v6856_v11 = vpack.c.bf16 %v4609_v15, %v4608_v0  ;;  %v6858_v8 = vpack.c.bf16 %v4627_v60, %v4626_v37  ;;  %v7088_v0 = vpack.c.bf16 %v5165_v9, %v5164_v59  ;;  %v5166_v60 = vld [vmem:[%s11286_s16 + $0x610] sm:$0xff]  ;;  %v5191_v59 = vld [vmem:[%s11286_s16 + $0x6d8] sm:$0xff] }
 0x6c1   :  { %7027 = vmatprep.subr.bf16.mxu1 %v7026_v14  ;;  %v5128_v14 = vld [vmem:[%s11286_s16 + $0x4e0] sm:$0xff]  ;;  %7811 = vtanh.f32 %v4484_v40  ;;  %v10749_v40 = vpop.f32.mrb[40].mxu0 }
 0x6c2   :  { %6841 = vmatpush3.bf16.msra.mxu0 %v6840_v30  ;;  %v4610_v30 = vld [vmem:[%s11285_s14 + $0x170] sm:$0xff]  ;;  %7813 = vtanh.f32 %v10294_v34  ;;  %v5193_v34 = vld [vmem:[%s11286_s16 + $0x6e8] sm:$0xff] }
 0x6c3   :  { %6843 = vmatprep.subr.bf16.mxu0 %v6842_v16  ;;  %v7046_v16 = vpack.c.bf16 %v5129_v51, %v5128_v14  ;;  %v6860_v32 = vpack.c.bf16 %v4611_v39, %v4610_v30  ;;  %v4634_v14 = vld [vmem:[%s11285_s14 + $0x230] sm:$0xff]  ;;  %v4635_v51 = vld [vmem:[%s11285_s14 + $0x238] sm:$0xff]  ;;  %v4652_v30 = vld [vmem:[%s11285_s14 + $0x2c0] sm:$0xff]  ;;  %7815 = vtanh.f32 %v10276_v10 }
 0x6c4   :  { %7029 = vmatpush3.bf16.msra.mxu1 %v7028_v3  ;;  %v5131_v3 = vld [vmem:[%s11286_s16 + $0x4f8] sm:$0xff]  ;;  %v4653_v39 = vld [vmem:[%s11285_s14 + $0x2c8] sm:$0xff]  ;;  %v6876_v22 = vpack.c.bf16 %v4635_v51, %v4634_v14  ;;  %7817 = vtanh.f32 %v10636_v38  ;;  %v5194_v51 = vld [vmem:[%s11286_s16 + $0x6f0] sm:$0xff] }
 0x6c5   :  { %7031 = vmatprep.subr.bf16.mxu1 %v7030_v7  ;;  %v6862_v7 = vpack.c.bf16 %v4645_v5, %v4644_v42  ;;  %v7050_v56 = vpack.c.bf16 %v5131_v3, %v5130_v21  ;;  %v7094_v5 = vpack.c.bf16 %v5185_v6, %v5184_v36  ;;  %v6878_v21 = vpack.c.bf16 %v4653_v39, %v4652_v30  ;;  %v4636_v3 = vld [vmem:[%s11285_s14 + $0x240] sm:$0xff]  ;;  %v4643_v10 = vld [vmem:[%s11285_s14 + $0x278] sm:$0xff]  ;;  %v5022_v38 = vld [vmem:[%s11286_s16 + $0x190] sm:$0xff] }
 0x6c6   :  { %6845 = vmatpush3.bf16.msra.mxu0 %v6844_v47  ;;  %v4647_v47 = vld [vmem:[%s11285_s14 + $0x298] sm:$0xff]  ;;  %v5176_v6 = vld [vmem:[%s11286_s16 + $0x660] sm:$0xff]  ;;  %7819 = vtanh.f32 %v10292_v55 }
 0x6c7   :  { %6847 = vmatprep.subr.bf16.mxu0 %v6846_v57  ;;  %v5114_v57 = vld [vmem:[%s11286_s16 + $0x470] sm:$0xff]  ;;  %v5195_v30 = vld [vmem:[%s11286_s16 + $0x6f8] sm:$0xff]  ;;  %7821 = vtanh.f32 %v10427_v13  ;;  %v5085_v13 = vld [vmem:[%s11286_s16 + $0x388] sm:$0xff] }
 0x6c8   :  { %7033 = vmatpush3.bf16.msra.mxu1 %v7032_v4  ;;  %v6866_v4 = vpack.c.bf16 %v4647_v47, %v4646_v25  ;;  %v7052_v29 = vpack.c.bf16 %v5115_v58, %v5114_v57  ;;  %v5188_v58 = vld [vmem:[%s11286_s16 + $0x6c0] sm:$0xff]  ;;  %v5019_v55 = vld [vmem:[%s11286_s16 + $0x178] sm:$0xff]  ;;  %7823 = vtanh.f32 %v10419_v43 }
 0x6c9   :  { %7035 = vmatprep.subr.bf16.mxu1 %v7034_v62  ;;  %v4630_v62 = vld [vmem:[%s11285_s14 + $0x210] sm:$0xff]  ;;  %7825 = vtanh.f32 %v10628_v33  ;;  %v5083_v43 = vld [vmem:[%s11286_s16 + $0x378] sm:$0xff]  ;;  %v5149_v33 = vld [vmem:[%s11286_s16 + $0x588] sm:$0xff] }
 0x6ca   :  { %6849 = vmatpush3.bf16.msra.mxu0 %v6848_v46  ;;  %v4648_v46 = vld [vmem:[%s11285_s14 + $0x2a0] sm:$0xff]  ;;  %v6868_v28 = vpack.c.bf16 %v4631_v45, %v4630_v62  ;;  %v4657_v45 = vld [vmem:[%s11285_s14 + $0x2e8] sm:$0xff]  ;;  %7827 = vtanh.f32 %v10620_v35  ;;  %v5147_v35 = vld [vmem:[%s11286_s16 + $0x578] sm:$0xff] }
 0x6cb   :  { %6851 = vmatprep.subr.bf16.mxu0 %v6850_v53  ;;  %v7808_v53 = vpop.eup %7807  ;;  %v6870_v61 = vpack.c.bf16 %v4649_v48, %v4648_v46  ;;  %v4656_v62 = vld [vmem:[%s11285_s14 + $0x2e0] sm:$0xff] }
 0x6cc   :  { %7037 = vmatpush3.bf16.msra.mxu1 %v7036_v1  ;;  %v5182_v1 = vld [vmem:[%s11286_s16 + $0x690] sm:$0xff]  ;;  %v7810_v52 = vpop.eup %7809  ;;  %v5172_v48 = vld [vmem:[%s11286_s16 + $0x640] sm:$0xff]  ;;  %v6886_v9 = vpack.c.bf16 %v4657_v45, %v4656_v62  ;;  %v5027_v62 = vld [vmem:[%s11286_s16 + $0x1b8] sm:$0xff] }
 0x6cd   :  { %7039 = vmatprep.subr.bf16.mxu1 %v7038_v63  ;;  %v5183_v63 = vld [vmem:[%s11286_s16 + $0x698] sm:$0xff]  ;;  %v7812_v15 = vpop.eup %7811 }
 0x6ce   :  { %6853 = vmatpush3.bf16.msra.mxu0 %v6852_v12  ;;  %v4633_v12 = vld [vmem:[%s11285_s14 + $0x228] sm:$0xff]  ;;  %v7090_v37 = vpack.c.bf16 %v5183_v63, %v5182_v1  ;;  %v4658_v63 = vld [vmem:[%s11285_s14 + $0x2f0] sm:$0xff] }
 0x6cf   :  { %6855 = vmatprep.subr.bf16.mxu0 %v6854_v31  ;;  %v4651_v31 = vld [vmem:[%s11285_s14 + $0x2b8] sm:$0xff]  ;;  %v4641_v1 = vld [vmem:[%s11285_s14 + $0x268] sm:$0xff] }
 0x6d0   :  { %7041 = vmatpush3.bf16.msra.mxu1 %v7040_v20  ;;  %v5167_v20 = vld [vmem:[%s11286_s16 + $0x618] sm:$0xff] }
 0x6d1   :  { %7043 = vmatprep.subr.bf16.mxu1 %v7042_v24  ;;  %v6872_v24 = vpack.c.bf16 %v4633_v12, %v4632_v44  ;;  %v7092_v42 = vpack.c.bf16 %v5167_v20, %v5166_v60  ;;  %v5020_v60 = vld [vmem:[%s11286_s16 + $0x180] sm:$0xff]  ;;  %v5021_v20 = vld [vmem:[%s11286_s16 + $0x188] sm:$0xff] }
 0x6d2   :  { %6857 = vmatpush3.bf16.msra.mxu0 %v6856_v11  ;;  %v6874_v11 = vpack.c.bf16 %v4651_v31, %v4650_v41  ;;  %v5175_v41 = vld [vmem:[%s11286_s16 + $0x658] sm:$0xff]  ;;  %v6926_v39 = vpack.c.bf16 %v5021_v20, %v5020_v60 }
 0x6d3   :  { %6859 = vmatprep.subr.bf16.mxu0 %v6858_v8  ;;  %v10757_v8 = vpop.f32.mrb[41].mxu0  ;;  %v5035_v60 = vld [vmem:[%s11286_s16 + $0x1f8] sm:$0xff] }
 0x6d4   :  { %7045 = vmatpush3.bf16.msra.mxu1 %v7044_v50  ;;  %v5168_v50 = vld [vmem:[%s11286_s16 + $0x620] sm:$0xff]  ;;  %7829 = vtanh.f32 %v10757_v8  ;;  %v5213_v8 = vld [vmem:[%s11286_s16 + $0x788] sm:$0xff] }
 0x6d5   :  { %7047 = vmatprep.subr.bf16.mxu1 %v7046_v16  ;;  %v5169_v16 = vld [vmem:[%s11286_s16 + $0x628] sm:$0xff]  ;;  %7831 = vtanh.f32 %v10749_v40 }
 0x6d6   :  { %6861 = vmatpush3.bf16.msra.mxu0 %v6860_v32  ;;  %v5187_v32 = vld [vmem:[%s11286_s16 + $0x6b8] sm:$0xff]  ;;  %v7096_v25 = vpack.c.bf16 %v5169_v16, %v5168_v50 }
 0x6d7   :  { %6863 = vmatprep.subr.bf16.mxu0 %v6862_v7  ;;  %v4637_v7 = vld [vmem:[%s11285_s14 + $0x248] sm:$0xff]  ;;  %v7098_v47 = vpack.c.bf16 %v5187_v32, %v5186_v2  ;;  %v5023_v50 = vld [vmem:[%s11286_s16 + $0x198] sm:$0xff]  ;;  %v5178_v2 = vld [vmem:[%s11286_s16 + $0x670] sm:$0xff] }
 0x6d8   :  { %7049 = vmatpush3.bf16.msra.mxu1 %v7048_v23  ;;  %v5170_v23 = vld [vmem:[%s11286_s16 + $0x630] sm:$0xff]  ;;  %v6880_v57 = vpack.c.bf16 %v4637_v7, %v4636_v3  ;;  %v5179_v32 = vld [vmem:[%s11286_s16 + $0x678] sm:$0xff]  ;;  %v7814_v3 = vpop.eup %7813  ;;  %v6930_v7 = vpack.c.bf16 %v5023_v50, %v5022_v38 }
 0x6d9   :  { %4881 = vmatmul.mubr.f32.vlgmr.msra.gmra.mrb[46].mxu0 %v7806_v49  ;;  %7051 = vmatprep.subr.bf16.mxu1 %v7050_v56  ;;  %v5171_v56 = vld [vmem:[%s11286_s16 + $0x638] sm:$0xff] }
 0x6da   :  { %6865 = vmatpush3.bf16.msra.mxu0 %v6864_v17  ;;  %4950 = vmatprep.mubr.f32.mxu0 %v7808_v53  ;;  %v5189_v17 = vld [vmem:[%s11286_s16 + $0x6c8] sm:$0xff]  ;;  %v7100_v49 = vpack.c.bf16 %v5171_v56, %v5170_v23  ;;  %v7116_v56 = vpack.c.bf16 %v5179_v32, %v5178_v2  ;;  %v5071_v2 = vld [vmem:[%s11286_s16 + $0x318] sm:$0xff]  ;;  %v5088_v32 = vld [vmem:[%s11286_s16 + $0x3a0] sm:$0xff] }
 0x6db   :  { %6867 = vmatprep.subr.bf16.mxu0 %v6866_v4  ;;  %v4639_v4 = vld [vmem:[%s11285_s14 + $0x258] sm:$0xff]  ;;  %v7102_v46 = vpack.c.bf16 %v5189_v17, %v5188_v58  ;;  %v5025_v23 = vld [vmem:[%s11286_s16 + $0x1a8] sm:$0xff]  ;;  %v5008_v17 = vld [vmem:[%s11286_s16 + $0x120] sm:$0xff] }
 0x6dc   :  { %7053 = vmatpush3.bf16.msra.mxu1 %v7052_v29  ;;  %v5173_v29 = vld [vmem:[%s11286_s16 + $0x648] sm:$0xff]  ;;  %v6884_v53 = vpack.c.bf16 %v4639_v4, %v4638_v27  ;;  %v5026_v4 = vld [vmem:[%s11286_s16 + $0x1b0] sm:$0xff] }
 0x6dd   :  { %7087 = vmatprep.subr.bf16.mxu1 %v7086_v54  ;;  %v5190_v54 = vld [vmem:[%s11286_s16 + $0x6d0] sm:$0xff]  ;;  %v7104_v44 = vpack.c.bf16 %v5173_v29, %v5172_v48  ;;  %v5011_v48 = vld [vmem:[%s11286_s16 + $0x138] sm:$0xff]  ;;  %v5028_v29 = vld [vmem:[%s11286_s16 + $0x1c0] sm:$0xff] }
 0x6de   :  { %6869 = vmatpush3.bf16.msra.mxu0 %v6868_v28  ;;  %v4640_v28 = vld [vmem:[%s11285_s14 + $0x260] sm:$0xff]  ;;  %v7106_v12 = vpack.c.bf16 %v5191_v59, %v5190_v54 }
 0x6df   :  { %6871 = vmatprep.subr.bf16.mxu0 %v6870_v61  ;;  %5573 = vmatmul.mubr.f32.vlgmr.msra.gmra.mrb[10].mxu1 %v7810_v52  ;;  %v4659_v61 = vld [vmem:[%s11285_s14 + $0x2f8] sm:$0xff]  ;;  %v5174_v52 = vld [vmem:[%s11286_s16 + $0x650] sm:$0xff]  ;;  %v6888_v31 = vpack.c.bf16 %v4641_v1, %v4640_v28  ;;  %v5013_v28 = vld [vmem:[%s11286_s16 + $0x148] sm:$0xff] }
 0x6e0   :  { %7089 = vmatpush3.bf16.msra.mxu1 %v7088_v0  ;;  %5712 = vmatprep.mubr.f32.mxu1 %v7812_v15  ;;  %v5192_v0 = vld [vmem:[%s11286_s16 + $0x6e0] sm:$0xff]  ;;  %v6890_v15 = vpack.c.bf16 %v4659_v61, %v4658_v63  ;;  %v5030_v1 = vld [vmem:[%s11286_s16 + $0x1d0] sm:$0xff]  ;;  %v5031_v63 = vld [vmem:[%s11286_s16 + $0x1d8] sm:$0xff] }
 0x6e1   :  { %7091 = vmatprep.subr.bf16.mxu1 %v7090_v37  ;;  %v4642_v37 = vld [vmem:[%s11285_s14 + $0x270] sm:$0xff]  ;;  %v7110_v36 = vpack.c.bf16 %v5193_v34, %v5192_v0 }
 0x6e2   :  { %6873 = vmatpush3.bf16.msra.mxu0 %v6872_v24  ;;  %v7108_v24 = vpack.c.bf16 %v5175_v41, %v5174_v52  ;;  %v6892_v14 = vpack.c.bf16 %v4643_v10, %v4642_v37  ;;  %v5015_v52 = vld [vmem:[%s11286_s16 + $0x158] sm:$0xff]  ;;  %v5032_v41 = vld [vmem:[%s11286_s16 + $0x1e0] sm:$0xff]  ;;  %v5017_v37 = vld [vmem:[%s11286_s16 + $0x168] sm:$0xff] }
 0x6e3   :  { %6875 = vmatprep.subr.bf16.mxu0 %v6874_v11  ;;  %v5177_v11 = vld [vmem:[%s11286_s16 + $0x668] sm:$0xff]  ;;  %v5034_v10 = vld [vmem:[%s11286_s16 + $0x1f0] sm:$0xff] }
 0x6e4   :  { %7093 = vmatpush3.bf16.msra.mxu1 %v7092_v42  ;;  %v5004_v42 = vld [vmem:[%s11286_s16 + $0x100] sm:$0xff]  ;;  %v7112_v16 = vpack.c.bf16 %v5177_v11, %v5176_v6 }
 0x6e5   :  { %7095 = vmatprep.subr.bf16.mxu1 %v7094_v5  ;;  %v5005_v5 = vld [vmem:[%s11286_s16 + $0x108] sm:$0xff]  ;;  %v5084_v6 = vld [vmem:[%s11286_s16 + $0x380] sm:$0xff] }
 0x6e6   :  { %6877 = vmatpush3.bf16.msra.mxu0 %v6876_v22  ;;  %v7114_v22 = vpack.c.bf16 %v5195_v30, %v5194_v51  ;;  %v5068_v51 = vld [vmem:[%s11286_s16 + $0x300] sm:$0xff]  ;;  %v5069_v30 = vld [vmem:[%s11286_s16 + $0x308] sm:$0xff] }
 0x6e7   :  { %6879 = vmatprep.subr.bf16.mxu0 %v6878_v21  ;;  %v6928_v21 = vpack.c.bf16 %v5005_v5, %v5004_v42  ;;  %v5087_v42 = vld [vmem:[%s11286_s16 + $0x398] sm:$0xff]  ;;  %v6992_v38 = vpack.c.bf16 %v5069_v30, %v5068_v51  ;;  %v5153_v51 = vld [vmem:[%s11286_s16 + $0x5a8] sm:$0xff] }
 0x6e8   :  { %7097 = vmatpush3.bf16.msra.mxu1 %v7096_v25  ;;  %v7816_v25 = vpop.eup %7815 }
 0x6e9   :  { %7099 = vmatprep.subr.bf16.mxu1 %v7098_v47  ;;  %v5024_v47 = vld [vmem:[%s11286_s16 + $0x1a0] sm:$0xff]  ;;  %v7818_v27 = vpop.eup %7817 }
 0x6ea   :  { %6881 = vmatpush3.bf16.msra.mxu0 %v6880_v57  ;;  %v6932_v57 = vpack.c.bf16 %v5007_v19, %v5006_v18  ;;  %v6934_v58 = vpack.c.bf16 %v5025_v23, %v5024_v47  ;;  %v7820_v5 = vpop.eup %7819  ;;  %v5072_v18 = vld [vmem:[%s11286_s16 + $0x320] sm:$0xff]  ;;  %v5073_v19 = vld [vmem:[%s11286_s16 + $0x328] sm:$0xff]  ;;  %v5091_v47 = vld [vmem:[%s11286_s16 + $0x3b8] sm:$0xff] }
 0x6eb   :  { %6883 = vmatprep.subr.bf16.mxu0 %v6882_v26  ;;  %v5009_v26 = vld [vmem:[%s11286_s16 + $0x128] sm:$0xff]  ;;  %v7822_v50 = vpop.eup %7821  ;;  %v7000_v23 = vpack.c.bf16 %v5073_v19, %v5072_v18  ;;  %v5140_v19 = vld [vmem:[%s11286_s16 + $0x540] sm:$0xff] }
 0x6ec   :  { %7101 = vmatpush3.bf16.msra.mxu1 %v7100_v49  ;;  %v6936_v45 = vpack.c.bf16 %v5009_v26, %v5008_v17  ;;  %v6938_v49 = vpack.c.bf16 %v5027_v62, %v5026_v4  ;;  %v5092_v17 = vld [vmem:[%s11286_s16 + $0x3c0] sm:$0xff]  ;;  %v5093_v26 = vld [vmem:[%s11286_s16 + $0x3c8] sm:$0xff] }
 0x6ed   :  { %7103 = vmatprep.subr.bf16.mxu1 %v7102_v46  ;;  %v5010_v46 = vld [vmem:[%s11286_s16 + $0x130] sm:$0xff]  ;;  %v7006_v4 = vpack.c.bf16 %v5093_v26, %v5092_v17  ;;  %v5076_v62 = vld [vmem:[%s11286_s16 + $0x340] sm:$0xff]  ;;  %v5143_v17 = vld [vmem:[%s11286_s16 + $0x558] sm:$0xff] }
 0x6ee   :  { %6885 = vmatpush3.bf16.msra.mxu0 %v6884_v53  ;;  %v5029_v53 = vld [vmem:[%s11286_s16 + $0x1c8] sm:$0xff]  ;;  %v6940_v54 = vpack.c.bf16 %v5011_v48, %v5010_v46  ;;  %v5095_v46 = vld [vmem:[%s11286_s16 + $0x3d8] sm:$0xff]  ;;  %v5160_v26 = vld [vmem:[%s11286_s16 + $0x5e0] sm:$0xff] }
 0x6ef   :  { %6887 = vmatprep.subr.bf16.mxu0 %v6886_v9  ;;  %v6942_v59 = vpack.c.bf16 %v5029_v53, %v5028_v29  ;;  %v5012_v9 = vld [vmem:[%s11286_s16 + $0x140] sm:$0xff]  ;;  %v5078_v53 = vld [vmem:[%s11286_s16 + $0x350] sm:$0xff] }
 0x6f0   :  { %7105 = vmatpush3.bf16.msra.mxu1 %v7104_v44  ;;  %v6944_v61 = vpack.c.bf16 %v5013_v28, %v5012_v9  ;;  %v6946_v44 = vpack.c.bf16 %v5031_v63, %v5030_v1  ;;  %v5097_v9 = vld [vmem:[%s11286_s16 + $0x3e8] sm:$0xff]  ;;  %v5080_v63 = vld [vmem:[%s11286_s16 + $0x360] sm:$0xff] }
 0x6f1   :  { %7107 = vmatprep.subr.bf16.mxu1 %v7106_v12  ;;  %v5014_v12 = vld [vmem:[%s11286_s16 + $0x150] sm:$0xff] }
 0x6f2   :  { %6889 = vmatpush3.bf16.msra.mxu0 %v6888_v31  ;;  %v5033_v31 = vld [vmem:[%s11286_s16 + $0x1e8] sm:$0xff]  ;;  %v6948_v0 = vpack.c.bf16 %v5015_v52, %v5014_v12  ;;  %v5099_v12 = vld [vmem:[%s11286_s16 + $0x3f8] sm:$0xff] }
 0x6f3   :  { %6891 = vmatprep.subr.bf16.mxu0 %v6890_v15  ;;  %v6950_v34 = vpack.c.bf16 %v5033_v31, %v5032_v41  ;;  %v5016_v15 = vld [vmem:[%s11286_s16 + $0x160] sm:$0xff]  ;;  %v5082_v31 = vld [vmem:[%s11286_s16 + $0x370] sm:$0xff] }
 0x6f4   :  { %7109 = vmatpush3.bf16.msra.mxu1 %v7108_v24  ;;  %v6952_v20 = vpack.c.bf16 %v5017_v37, %v5016_v15  ;;  %v6954_v24 = vpack.c.bf16 %v5035_v60, %v5034_v10  ;;  %v5132_v37 = vld [vmem:[%s11286_s16 + $0x500] sm:$0xff]  ;;  %v5133_v10 = vld [vmem:[%s11286_s16 + $0x508] sm:$0xff]  ;;  %v5150_v60 = vld [vmem:[%s11286_s16 + $0x590] sm:$0xff] }
 0x6f5   :  { %7111 = vmatprep.subr.bf16.mxu1 %v7110_v36  ;;  %v5018_v36 = vld [vmem:[%s11286_s16 + $0x170] sm:$0xff] }
 0x6f6   :  { %6893 = vmatpush3.bf16.msra.mxu0 %v6892_v14  ;;  %v6956_v11 = vpack.c.bf16 %v5019_v55, %v5018_v36  ;;  %v6990_v14 = vpack.c.bf16 %v5085_v13, %v5084_v6  ;;  %v7056_v36 = vpack.c.bf16 %v5133_v10, %v5132_v37  ;;  %v5134_v13 = vld [vmem:[%s11286_s16 + $0x510] sm:$0xff]  ;;  %v5200_v10 = vld [vmem:[%s11286_s16 + $0x720] sm:$0xff] }
 0x6f7   :  { %6927 = vmatprep.subr.bf16.mxu0 %v6926_v39  ;;  %v5086_v39 = vld [vmem:[%s11286_s16 + $0x390] sm:$0xff] }
 0x6f8   :  { %7113 = vmatpush3.bf16.msra.mxu1 %v7112_v16  ;;  %v6994_v16 = vpack.c.bf16 %v5087_v42, %v5086_v39  ;;  %v5136_v42 = vld [vmem:[%s11286_s16 + $0x520] sm:$0xff] }
 0x6f9   :  { %4951 = vmatmul.mubr.f32.vlgmr.msra.gmra.mrb[48].mxu0 %v7816_v25  ;;  %7115 = vmatprep.subr.bf16.mxu1 %v7114_v22  ;;  %v5070_v22 = vld [vmem:[%s11286_s16 + $0x310] sm:$0xff] }
 0x6fa   :  { %6929 = vmatpush3.bf16.msra.mxu0 %v6928_v21  ;;  %5362 = vmatprep.mubr.f32.mxu0 %v7814_v3  ;;  %v5089_v21 = vld [vmem:[%s11286_s16 + $0x3a8] sm:$0xff]  ;;  %v6996_v3 = vpack.c.bf16 %v5071_v2, %v5070_v22  ;;  %v5090_v25 = vld [vmem:[%s11286_s16 + $0x3b0] sm:$0xff] }
 0x6fb   :  { %6931 = vmatprep.subr.bf16.mxu0 %v6930_v7  ;;  %v6998_v7 = vpack.c.bf16 %v5089_v21, %v5088_v32  ;;  %v5138_v2 = vld [vmem:[%s11286_s16 + $0x530] sm:$0xff]  ;;  %v5139_v32 = vld [vmem:[%s11286_s16 + $0x538] sm:$0xff]  ;;  %v5156_v21 = vld [vmem:[%s11286_s16 + $0x5c0] sm:$0xff] }
 0x6fc   :  { %7117 = vmatpush3.bf16.msra.mxu1 %v7116_v56  ;;  %v7002_v56 = vpack.c.bf16 %v5091_v47, %v5090_v25  ;;  %v5141_v25 = vld [vmem:[%s11286_s16 + $0x548] sm:$0xff]  ;;  %v5158_v47 = vld [vmem:[%s11286_s16 + $0x5d0] sm:$0xff] }
 0x6fe   :  { %6933 = vmatpush3.bf16.msra.mxu0 %v6932_v57  ;;  %v5074_v57 = vld [vmem:[%s11286_s16 + $0x330] sm:$0xff] }
 0x6ff   :  { %6935 = vmatprep.subr.bf16.mxu0 %v6934_v58  ;;  %5713 = vmatmul.mubr.f32.vlgmr.msra.gmra.mrb[12].mxu1 %v7818_v27  ;;  %v5075_v58 = vld [vmem:[%s11286_s16 + $0x338] sm:$0xff] }
 0x700   :  { %v7004_v27 = vpack.c.bf16 %v5075_v58, %v5074_v57  ;;  %v5142_v58 = vld [vmem:[%s11286_s16 + $0x550] sm:$0xff] }
 0x702   :  { %6937 = vmatpush3.bf16.msra.mxu0 %v6936_v45  ;;  %v5077_v45 = vld [vmem:[%s11286_s16 + $0x348] sm:$0xff] }
 0x703   :  { %6939 = vmatprep.subr.bf16.mxu0 %v6938_v49  ;;  %v5094_v49 = vld [vmem:[%s11286_s16 + $0x3d0] sm:$0xff]  ;;  %v7008_v48 = vpack.c.bf16 %v5077_v45, %v5076_v62  ;;  %v5144_v45 = vld [vmem:[%s11286_s16 + $0x560] sm:$0xff] }
 0x704   :  { %v7010_v29 = vpack.c.bf16 %v5095_v46, %v5094_v49  ;;  %v5145_v49 = vld [vmem:[%s11286_s16 + $0x568] sm:$0xff]  ;;  %v5162_v46 = vld [vmem:[%s11286_s16 + $0x5f0] sm:$0xff] }
 0x706   :  { %6941 = vmatpush3.bf16.msra.mxu0 %v6940_v54  ;;  %v5079_v54 = vld [vmem:[%s11286_s16 + $0x358] sm:$0xff] }
 0x707   :  { %6943 = vmatprep.subr.bf16.mxu0 %v6942_v59  ;;  %v5096_v59 = vld [vmem:[%s11286_s16 + $0x3e0] sm:$0xff]  ;;  %v7012_v28 = vpack.c.bf16 %v5079_v54, %v5078_v53  ;;  %v5146_v54 = vld [vmem:[%s11286_s16 + $0x570] sm:$0xff] }
 0x708   :  { %v7014_v1 = vpack.c.bf16 %v5097_v9, %v5096_v59  ;;  %v5212_v59 = vld [vmem:[%s11286_s16 + $0x780] sm:$0xff]  ;;  %v7084_v9 = vpack.c.bf16 %v5147_v35, %v5146_v54 }
 0x70a   :  { %6945 = vmatpush3.bf16.msra.mxu0 %v6944_v61  ;;  %v5081_v61 = vld [vmem:[%s11286_s16 + $0x368] sm:$0xff] }
 0x70b   :  { %6947 = vmatprep.subr.bf16.mxu0 %v6946_v44  ;;  %v5098_v44 = vld [vmem:[%s11286_s16 + $0x3f0] sm:$0xff]  ;;  %v7016_v52 = vpack.c.bf16 %v5081_v61, %v5080_v63  ;;  %v5197_v63 = vld [vmem:[%s11286_s16 + $0x708] sm:$0xff] }
 0x70c   :  { %v7018_v41 = vpack.c.bf16 %v5099_v12, %v5098_v44  ;;  %v5214_v61 = vld [vmem:[%s11286_s16 + $0x790] sm:$0xff]  ;;  %v5215_v44 = vld [vmem:[%s11286_s16 + $0x798] sm:$0xff] }
 0x70e   :  { %6949 = vmatpush3.bf16.msra.mxu0 %v6948_v0  ;;  %v5148_v0 = vld [vmem:[%s11286_s16 + $0x580] sm:$0xff] }
 0x70f   :  { %6951 = vmatprep.subr.bf16.mxu0 %v6950_v34  ;;  %v7020_v34 = vpack.c.bf16 %v5083_v43, %v5082_v31  ;;  %v7054_v15 = vpack.c.bf16 %v5149_v33, %v5148_v0  ;;  %v7122_v31 = vpack.c.bf16 %v5215_v44, %v5214_v61  ;;  %v5198_v43 = vld [vmem:[%s11286_s16 + $0x710] sm:$0xff]  ;;  %v5199_v0 = vld [vmem:[%s11286_s16 + $0x718] sm:$0xff]  ;;  %v5216_v33 = vld [vmem:[%s11286_s16 + $0x7a0] sm:$0xff] }
 0x712   :  { %6953 = vmatpush3.bf16.msra.mxu0 %v6952_v20  ;;  %v5151_v20 = vld [vmem:[%s11286_s16 + $0x598] sm:$0xff] }
 0x713   :  { %6955 = vmatprep.subr.bf16.mxu0 %v6954_v24  ;;  %v7824_v24 = vpop.eup %7823  ;;  %v7058_v6 = vpack.c.bf16 %v5151_v20, %v5150_v60  ;;  %v5201_v60 = vld [vmem:[%s11286_s16 + $0x728] sm:$0xff]  ;;  %v5218_v20 = vld [vmem:[%s11286_s16 + $0x7b0] sm:$0xff] }
 0x714   :  { %v7826_v55 = vpop.eup %7825 }
 0x715   :  { %v7828_v12 = vpop.eup %7827 }
 0x716   :  { %6957 = vmatpush3.bf16.msra.mxu0 %v6956_v11  ;;  %v5135_v11 = vld [vmem:[%s11286_s16 + $0x518] sm:$0xff] }
 0x717   :  { %6991 = vmatprep.subr.bf16.mxu0 %v6990_v14  ;;  %v5152_v14 = vld [vmem:[%s11286_s16 + $0x5a0] sm:$0xff]  ;;  %v7060_v30 = vpack.c.bf16 %v5135_v11, %v5134_v13  ;;  %v5203_v13 = vld [vmem:[%s11286_s16 + $0x738] sm:$0xff] }
 0x718   :  { %v7062_v39 = vpack.c.bf16 %v5153_v51, %v5152_v14  ;;  %v5220_v11 = vld [vmem:[%s11286_s16 + $0x7c0] sm:$0xff]  ;;  %v5221_v14 = vld [vmem:[%s11286_s16 + $0x7c8] sm:$0xff] }
 0x719   :  { %5363 = vmatmul.mubr.f32.vlgmr.msra.gmra.mrb[50].mxu0 %v7820_v5  ;;  %v5137_v5 = vld [vmem:[%s11286_s16 + $0x528] sm:$0xff] }
 0x71a   :  { %6993 = vmatpush3.bf16.msra.mxu0 %v6992_v38  ;;  %5502 = vmatprep.mubr.f32.mxu0 %v7822_v50  ;;  %v5154_v38 = vld [vmem:[%s11286_s16 + $0x5b0] sm:$0xff]  ;;  %v5155_v50 = vld [vmem:[%s11286_s16 + $0x5b8] sm:$0xff] }
 0x71b   :  { %6995 = vmatprep.subr.bf16.mxu0 %v6994_v16  ;;  %v7064_v16 = vpack.c.bf16 %v5137_v5, %v5136_v42  ;;  %v7066_v22 = vpack.c.bf16 %v5155_v50, %v5154_v38  ;;  %v5205_v42 = vld [vmem:[%s11286_s16 + $0x748] sm:$0xff]  ;;  %v5222_v5 = vld [vmem:[%s11286_s16 + $0x7d0] sm:$0xff]  ;;  %v5223_v38 = vld [vmem:[%s11286_s16 + $0x7d8] sm:$0xff] }
 0x71e   :  { %6997 = vmatpush3.bf16.msra.mxu0 %v6996_v3  ;;  %v5157_v3 = vld [vmem:[%s11286_s16 + $0x5c8] sm:$0xff] }
 0x71f   :  { %6999 = vmatprep.subr.bf16.mxu0 %v6998_v7  ;;  %v7068_v7 = vpack.c.bf16 %v5139_v32, %v5138_v2  ;;  %v7070_v18 = vpack.c.bf16 %v5157_v3, %v5156_v21  ;;  %v5207_v2 = vld [vmem:[%s11286_s16 + $0x758] sm:$0xff]  ;;  %v5224_v32 = vld [vmem:[%s11286_s16 + $0x7e0] sm:$0xff]  ;;  %v5225_v21 = vld [vmem:[%s11286_s16 + $0x7e8] sm:$0xff] }
 0x722   :  { %7001 = vmatpush3.bf16.msra.mxu0 %v7000_v23  ;;  %v5159_v23 = vld [vmem:[%s11286_s16 + $0x5d8] sm:$0xff] }
 0x723   :  { %7003 = vmatprep.subr.bf16.mxu0 %v7002_v56  ;;  %v7072_v56 = vpack.c.bf16 %v5141_v25, %v5140_v19  ;;  %v7074_v57 = vpack.c.bf16 %v5159_v23, %v5158_v47  ;;  %v5209_v19 = vld [vmem:[%s11286_s16 + $0x768] sm:$0xff]  ;;  %v5226_v47 = vld [vmem:[%s11286_s16 + $0x7f0] sm:$0xff]  ;;  %v5227_v23 = vld [vmem:[%s11286_s16 + $0x7f8] sm:$0xff] }
 0x726   :  { %7005 = vmatpush3.bf16.msra.mxu0 %v7004_v27  ;;  %v5161_v27 = vld [vmem:[%s11286_s16 + $0x5e8] sm:$0xff] }
 0x727   :  { %7007 = vmatprep.subr.bf16.mxu0 %v7006_v4  ;;  %v7076_v4 = vpack.c.bf16 %v5143_v17, %v5142_v58  ;;  %v7078_v62 = vpack.c.bf16 %v5161_v27, %v5160_v26  ;;  %v7146_v58 = vpack.c.bf16 %v5227_v23, %v5226_v47  ;;  %v5210_v17 = vld [vmem:[%s11286_s16 + $0x770] sm:$0xff]  ;;  %v5211_v26 = vld [vmem:[%s11286_s16 + $0x778] sm:$0xff] }
 0x728   :  { %v7148_v27 = vpack.c.bf16 %v5211_v26, %v5210_v17 }
 0x72a   :  { %7009 = vmatpush3.bf16.msra.mxu0 %v7008_v48  ;;  %v5163_v48 = vld [vmem:[%s11286_s16 + $0x5f8] sm:$0xff] }
 0x72b   :  { %7011 = vmatprep.subr.bf16.mxu0 %v7010_v29  ;;  %v7080_v29 = vpack.c.bf16 %v5145_v49, %v5144_v45  ;;  %v7082_v53 = vpack.c.bf16 %v5163_v48, %v5162_v46 }
 0x72e   :  { %7013 = vmatpush3.bf16.msra.mxu0 %v7012_v28  ;;  %v7118_v28 = vpack.c.bf16 %v5213_v8, %v5212_v59 }
 0x72f   :  { %7015 = vmatprep.subr.bf16.mxu0 %v7014_v1  ;;  %v5196_v1 = vld [vmem:[%s11286_s16 + $0x700] sm:$0xff] }
 0x732   :  { %7017 = vmatpush3.bf16.msra.mxu0 %v7016_v52  ;;  %v7120_v52 = vpack.c.bf16 %v5197_v63, %v5196_v1 }
 0x733   :  { %7019 = vmatprep.subr.bf16.mxu0 %v7018_v41  ;;  %v7830_v41 = vpop.eup %7829 }
 0x734   :  { %v7832_v40 = vpop.eup %7831 }
 0x736   :  { %7021 = vmatpush3.bf16.msra.mxu0 %v7020_v34  ;;  %v5217_v34 = vld [vmem:[%s11286_s16 + $0x7a8] sm:$0xff] }
 0x737   :  { %7055 = vmatprep.subr.bf16.mxu0 %v7054_v15  ;;  %v7124_v15 = vpack.c.bf16 %v5199_v0, %v5198_v43  ;;  %v7126_v37 = vpack.c.bf16 %v5217_v34, %v5216_v33 }
 0x739   :  { %5503 = vmatmul.mubr.f32.vlgmr.msra.gmra.mrb[52].mxu0 %v7824_v24  ;;  %v5219_v24 = vld [vmem:[%s11286_s16 + $0x7b8] sm:$0xff] }
 0x73a   :  { %7057 = vmatpush3.bf16.msra.mxu0 %v7056_v36  ;;  %5642 = vmatprep.mubr.f32.mxu0 %v7826_v55  ;;  %v7128_v36 = vpack.c.bf16 %v5201_v60, %v5200_v10  ;;  %v7130_v55 = vpack.c.bf16 %v5219_v24, %v5218_v20 }
 0x73b   :  { %7059 = vmatprep.subr.bf16.mxu0 %v7058_v6  ;;  %v5202_v6 = vld [vmem:[%s11286_s16 + $0x730] sm:$0xff] }
 0x73c   :  { %v7132_v51 = vpack.c.bf16 %v5203_v13, %v5202_v6 }
 0x73e   :  { %7061 = vmatpush3.bf16.msra.mxu0 %v7060_v30  ;;  %v7134_v30 = vpack.c.bf16 %v5221_v14, %v5220_v11 }
 0x73f   :  { %7063 = vmatprep.subr.bf16.mxu0 %v7062_v39  ;;  %v5204_v39 = vld [vmem:[%s11286_s16 + $0x740] sm:$0xff] }
 0x740   :  { %v7136_v50 = vpack.c.bf16 %v5205_v42, %v5204_v39 }
 0x742   :  { %7065 = vmatpush3.bf16.msra.mxu0 %v7064_v16  ;;  %v7138_v16 = vpack.c.bf16 %v5223_v38, %v5222_v5 }
 0x743   :  { %7067 = vmatprep.subr.bf16.mxu0 %v7066_v22  ;;  %v5206_v22 = vld [vmem:[%s11286_s16 + $0x750] sm:$0xff] }
 0x744   :  { %v7140_v3 = vpack.c.bf16 %v5207_v2, %v5206_v22 }
 0x746   :  { %7069 = vmatpush3.bf16.msra.mxu0 %v7068_v7  ;;  %v7142_v7 = vpack.c.bf16 %v5225_v21, %v5224_v32 }
 0x747   :  { %7071 = vmatprep.subr.bf16.mxu0 %v7070_v18  ;;  %v5208_v18 = vld [vmem:[%s11286_s16 + $0x760] sm:$0xff] }
 0x74a   :  { %7073 = vmatpush3.bf16.msra.mxu0 %v7072_v56 }
 0x74b   :  { %7075 = vmatprep.subr.bf16.mxu0 %v7074_v57  ;;  %v7144_v57 = vpack.c.bf16 %v5209_v19, %v5208_v18 }
 0x74e   :  { %7077 = vmatpush3.bf16.msra.mxu0 %v7076_v4 }
 0x74f   :  { %7079 = vmatprep.subr.bf16.mxu0 %v7078_v62 }
 0x752   :  { %7081 = vmatpush3.bf16.msra.mxu0 %v7080_v29 }
 0x753   :  { %7083 = vmatprep.subr.bf16.mxu0 %v7082_v53 }
 0x756   :  { %7085 = vmatpush3.bf16.msra.mxu0 %v7084_v9 }
 0x757   :  { %7119 = vmatprep.subr.bf16.mxu0 %v7118_v28 }
 0x759   :  { %5643 = vmatmul.mubr.f32.vlgmr.msra.gmra.mrb[54].mxu0 %v7828_v12 }
 0x75a   :  { %7121 = vmatpush3.bf16.msra.mxu0 %v7120_v52  ;;  %5782 = vmatprep.mubr.f32.mxu0 %v7830_v41 }
 0x75b   :  { %7123 = vmatprep.subr.bf16.mxu0 %v7122_v31 }
 0x75e   :  { %7125 = vmatpush3.bf16.msra.mxu0 %v7124_v15 }
 0x75f   :  { %7127 = vmatprep.subr.bf16.mxu0 %v7126_v37 }
 0x762   :  { %7129 = vmatpush3.bf16.msra.mxu0 %v7128_v36 }
 0x763   :  { %7131 = vmatprep.subr.bf16.mxu0 %v7130_v55 }
 0x766   :  { %7133 = vmatpush3.bf16.msra.mxu0 %v7132_v51 }
 0x767   :  { %7135 = vmatprep.subr.bf16.mxu0 %v7134_v30 }
 0x76a   :  { %7137 = vmatpush3.bf16.msra.mxu0 %v7136_v50 }
 0x76b   :  { %7139 = vmatprep.subr.bf16.mxu0 %v7138_v16 }
 0x76c   :  { %v4742_v25 = vpop.f32.mrb[42].mxu0 }
 0x76d   :  { %v6630_v56 = vpop.f32.mrb[43].mxu0 }
 0x76e   :  { %7141 = vmatpush3.bf16.msra.mxu0 %v7140_v3 }
 0x76f   :  { %7143 = vmatprep.subr.bf16.mxu0 %v7142_v7 }
 0x772   :  { %7145 = vmatpush3.bf16.msra.mxu0 %v7144_v57  ;;  %v6355_v4 = vpop.f32.mrb[6].mxu1 }
 0x773   :  { %7147 = vmatprep.subr.bf16.mxu0 %v7146_v58  ;;  %v6356_v62 = vpop.f32.mrb[7].mxu1 }
 0x774   :  { %v6357_v45 = vadd.f32 %v6356_v62, %v6355_v4 }
 0x776   :  { %7149 = vmatpush3.bf16.msra.mxu0 %v7148_v27 }
 0x779   :  { %5783 = vmatmul.mubr.f32.vlgmr.msra.gmra.mrb[56].mxu0 %v7832_v40 }
 0x78c   :  { %v6250_v49 = vpop.f32.mrb[44].mxu0 }
 0x78d   :  { %v6251_v46 = vpop.f32.mrb[45].mxu0 }
 0x78e   :  { %v6252_v48 = vadd.f32 %v6251_v46, %v6250_v49 }
 0x790   :  { %v4813_v29 = vadd.f32 %v6252_v48, %v4742_v25 }
 0x792   :  { %v6425_v53 = vpop.f32.mrb[8].mxu1 }
 0x793   :  { %v6426_v54 = vpop.f32.mrb[9].mxu1 }
 0x794   :  { %v6427_v35 = vadd.f32 %v6426_v54, %v6425_v53 }
 0x7ac   :  { %v6285_v59 = vpop.f32.mrb[46].mxu0 }
 0x7ad   :  { %v6286_v8 = vpop.f32.mrb[47].mxu0 }
 0x7ae   :  { %v6287_v9 = vadd.f32 %v6286_v8, %v6285_v59 }
 0x7b0   :  { %v4883_v28 = vadd.f32 %v6287_v9, %v4813_v29 }
 0x7b2   :  { %v6495_v1 = vpop.f32.mrb[10].mxu1 }
 0x7b3   :  { %v6496_v63 = vpop.f32.mrb[11].mxu1 }
 0x7b4   :  { %v6497_v61 = vadd.f32 %v6496_v63, %v6495_v1 }
 0x7cc   :  { %v6320_v44 = vpop.f32.mrb[48].mxu0 }
 0x7cd   :  { %v6321_v12 = vpop.f32.mrb[49].mxu0 }
 0x7ce   :  { %v6322_v52 = vadd.f32 %v6321_v12, %v6320_v44 }
 0x7d0   :  { %v4953_v41 = vadd.f32 %v6322_v52, %v4883_v28 }
 0x7d2   :  { %v6565_v31 = vpop.f32.mrb[12].mxu1 }
 0x7d3   :  { %v6566_v43 = vpop.f32.mrb[13].mxu1 }
 0x7d4   :  { %v6567_v0 = vadd.f32 %v6566_v43, %v6565_v31 }
 0x7ec   :  { %v6390_v33 = vpop.f32.mrb[50].mxu0 }
 0x7ed   :  { %v6391_v34 = vpop.f32.mrb[51].mxu0 }
 0x7ee   :  { %v6392_v15 = vadd.f32 %v6391_v34, %v6390_v33 }
 0x7f0   :  { %v5365_v37 = vadd.f32 %v6392_v15, %v6357_v45 }
 0x7f2   :  { %v5435_v10 = vadd.f32 %v6427_v35, %v5365_v37 }
 0x80c   :  { %v6460_v60 = vpop.f32.mrb[52].mxu0 }
 0x80d   :  { %v6461_v20 = vpop.f32.mrb[53].mxu0 }
 0x80e   :  { %v6462_v24 = vadd.f32 %v6461_v20, %v6460_v60 }
 0x810   :  { %v5505_v36 = vadd.f32 %v6462_v24, %v5435_v10 }
 0x812   :  { %v5575_v55 = vadd.f32 %v6497_v61, %v5505_v36 }
 0x82c   :  { %v6530_v6 = vpop.f32.mrb[54].mxu0 }
 0x82d   :  { %v6531_v13 = vpop.f32.mrb[55].mxu0 }
 0x82e   :  { %v6532_v11 = vadd.f32 %v6531_v13, %v6530_v6 }
 0x830   :  { %v5645_v14 = vadd.f32 %v6532_v11, %v5575_v55 }
 0x832   :  { %v5715_v51 = vadd.f32 %v6567_v0, %v5645_v14 }
 0x84c   :  { %v6600_v30 = vpop.f32.mrb[56].mxu0 }
 0x84d   :  { %v6601_v39 = vpop.f32.mrb[57].mxu0 }
 0x84e   :  { %v6602_v42 = vadd.f32 %v6601_v39, %v6600_v30 }
 0x850   :  { %v5785_v5 = vadd.f32 %v6602_v42, %v5715_v51 }
 0x852   :  { %v5788_v38 = vadd.f32 %v5785_v5, %v4953_v41 }
 0x854   :  { %5790 = vst.msk [vmem:[%s11287_s17] sm:$0x3] %vm5789_vm9, %v5788_v38 }

</bundles_post_ra>
